<compile_context>
chip_gen: v5e
topology: v5e:2x2
jax: 0.10.0
libtpu: 0.0.40
codegen_flags: <defaults>
</compile_context>

<pallas_src>
import jax
import jax.numpy as jnp
from jax.experimental import pallas as pl
from jax.experimental.pallas import tpu as pltpu


def interactive_attention_kernel(v_ref, q_ref, w1_ref, b1_ref,
                                 wq_ref, bq_ref, w2_ref, o_ref):
    bb, cv, s = v_ref.shape          # v block: (bb, Cv, S) -- NCHW with HW flattened
    mid = w1_ref.shape[1]

    # NCHW -> channels-last inside VMEM: per-batch 2-D transposes merged along
    # the sublane axis.  Fuses the layout change into the kernel instead of an
    # extra HBM read+write pass in the wrapper.
    v_cl = jnp.concatenate([v_ref[b].T for b in range(bb)], axis=0)       # (bb*S, Cv)

    # conv1 (1x1 conv, Cv -> mid): one merged MXU matmul over all bb*S pixels.
    x = jnp.dot(v_cl, w1_ref[...],
                preferred_element_type=jnp.float32) + b1_ref[...]          # (bb*S, mid)

    # fc1 on q (Cq -> mid).
    y = jnp.dot(q_ref[...], wq_ref[...],
                preferred_element_type=jnp.float32) + bq_ref[...]          # (bb, mid)

    # relu(x + broadcast(y)) per batch element.
    h = jnp.maximum(x.reshape(bb, s, mid) + y[:, None, :], 0.0)            # (bb, S, mid)

    # conv2 (mid -> 1 glimpse): VPU multiply + lane reduction, no N=1 matmul.
    # conv2 bias omitted on purpose: softmax is shift invariant.
    logits = jnp.sum(h * w2_ref[...].reshape(1, 1, mid),
                     axis=-1, keepdims=True)                               # (bb, S, 1)

    # Softmax over the spatial axis; the 1/sum normalization is folded into the
    # final (bb, Cv) scale instead of dividing the (S, 1) weights.
    m = jnp.max(logits, axis=1, keepdims=True)                             # (bb, 1, 1)
    e = jnp.exp(logits - m)                                                # (bb, S, 1)
    z = jnp.sum(e, axis=1, keepdims=True)                                  # (bb, 1, 1)

    # Attention-weighted pooling: broadcast-multiply + sublane reduce over S.
    pooled = jnp.sum(v_cl.reshape(bb, s, cv) * e, axis=1)                  # (bb, Cv)
    inv_z = 1.0 / z[:, 0, :]                                               # (bb, 1)
    o_ref[...] = (pooled * inv_z).astype(o_ref.dtype)


def _pick_block_batch(n, s, cv, mid, target_rows=256,
                      vmem_budget_bytes=16 * 1024 * 1024):
    """Batch elements per grid step.

    target_rows=256 fills the MXU M dimension on v6e/v7x (and is a multiple of
    128 for v5e).  The VMEM budget keeps double-buffered tiles well under the
    scoped-VMEM default even on v7x (64 MiB physical / 32 MiB scoped).
    """
    bb = max(1, min(n, -(-target_rows // max(s, 1))))     # ceil(target_rows / s)

    def tile_bytes(b):
        # double-buffered v tile + in-kernel channels-last copy + x/h (all f32)
        return (2 * b * s * cv + b * s * cv + 2 * b * s * mid) * 4

    while bb > 1 and tile_bytes(bb) > vmem_budget_bytes:
        bb -= 1
    while n % bb:                                          # grid must tile N exactly
        bb -= 1
    return bb


def interactive_attention(v_nchw, q, w1, b1, wq, bq, w2, b2=None):
    """v_nchw: (N, Cv, H, W), q: (N, Cq).  Matches InteractiveAttention.forward
    with drop=0.0.  `b2` (conv2 bias) is accepted but unused: adding a constant
    to every spatial logit is a no-op under softmax."""
    del b2
    n, cv, H, W = v_nchw.shape
    s = H * W
    mid = w1.shape[1]
    cq = q.shape[1]

    # Free reshapes only -- no HBM transpose pass on the big activation.
    v_ncs = v_nchw.reshape(n, cv, s)
    b1_2d = b1.reshape(1, mid)
    bq_2d = bq.reshape(1, mid)
    w2_row = w2.reshape(1, mid)

    bb = _pick_block_batch(n, s, cv, mid)

    out = pl.pallas_call(
        interactive_attention_kernel,
        out_shape=jax.ShapeDtypeStruct((n, cv), v_nchw.dtype),
        grid_spec=pltpu.PrefetchScalarGridSpec(
            num_scalar_prefetch=0,
            grid=(n // bb,),
            in_specs=[
                pl.BlockSpec((bb, cv, s), lambda i: (i, 0, 0)),   # v  (N, Cv, S)
                pl.BlockSpec((bb, cq),    lambda i: (i, 0)),      # q
                pl.BlockSpec((cv, mid),   lambda i: (0, 0)),      # conv1 weight
                pl.BlockSpec((1, mid),    lambda i: (0, 0)),      # conv1 bias
                pl.BlockSpec((cq, mid),   lambda i: (0, 0)),      # fc1 weight
                pl.BlockSpec((1, mid),    lambda i: (0, 0)),      # fc1 bias
                pl.BlockSpec((1, mid),    lambda i: (0, 0)),      # conv2 weight (row)
            ],
            out_specs=pl.BlockSpec((bb, cv), lambda i: (i, 0)),   # lane-dense output
        ),
        compiler_params=pltpu.CompilerParams(
            dimension_semantics=("parallel",)),                    # megacore-shardable
    )(v_ncs, q, w1, b1_2d, wq, bq_2d, w2_row)
    return out


def reference(v_nchw, q, w1, b1, wq, bq, w2, b2):
    n, cv, H, W = v_nchw.shape
    S = H * W
    v = jnp.transpose(v_nchw.reshape(n, cv, S), (0, 2, 1))            # (n, S, Cv)
    x = jnp.einsum('nsc,cm->nsm', v, w1) + b1                         # (n, S, mid)
    y = q @ wq + bq                                                   # (n, mid)
    h = jnp.maximum(x + y[:, None, :], 0.0)
    logits = jnp.einsum('nsm,mg->nsg', h, w2) + b2                    # (n, S, 1)
    attn = jax.nn.softmax(logits[..., 0], axis=1)                     # (n, S)
    return jnp.einsum('ns,nsc->nc', attn, v)                          # (n, Cv)


if __name__ == "__main__":
    # Small shapes consistent with the module (scaled-down v_dim/q_dim/mid_dim).
    # N=32 exercises both the batch tiling (bb=16 -> bb*S=256 MXU rows) and the grid.
    N, Cv, Cq, MID, H, W = 32, 256, 128, 128, 4, 4

    key = jax.random.PRNGKey(0)
    kv, kq, k1, k2, k3, k4, k5, k6 = jax.random.split(key, 8)

    v = jax.random.normal(kv, (N, Cv, H, W), dtype=jnp.float32)       # NCHW like PyTorch
    q = jax.random.normal(kq, (N, Cq), dtype=jnp.float32)

    # conv1: Cv->mid as (Cv, mid) matmul weight, fc1: Cq->mid, conv2: mid->1.
    w1 = jax.random.normal(k1, (Cv, MID), dtype=jnp.float32) * 0.02
    b1 = jax.random.normal(k2, (MID,), dtype=jnp.float32) * 0.01
    wq = jax.random.normal(k3, (Cq, MID), dtype=jnp.float32) * 0.02
    bq = jax.random.normal(k4, (MID,), dtype=jnp.float32) * 0.01
    w2 = jax.random.normal(k5, (MID, 1), dtype=jnp.float32) * 0.02
    b2 = jax.random.normal(k6, (1,), dtype=jnp.float32) * 0.01

    out = interactive_attention(v, q, w1, b1, wq, bq, w2, b2)
    out = jax.block_until_ready(out)

    ref = reference(v, q, w1, b1, wq, bq, w2, b2)
    assert out.shape == (N, Cv), out.shape
    assert jnp.allclose(out, ref, rtol=1e-3, atol=1e-3), \
        float(jnp.max(jnp.abs(out - ref)))

    print("KERNEL_OK")
</pallas_src>

<mosaic_0001>
module attributes {stable_mosaic.version = 11 : i64} {
  func.func @interactive_attention_kernel(%arg0: i32, %arg1: memref<16x256x16xf32, #tpu.memory_space<vmem>>, %arg2: memref<16x128xf32, #tpu.memory_space<vmem>>, %arg3: memref<256x128xf32, #tpu.memory_space<vmem>>, %arg4: memref<1x128xf32, #tpu.memory_space<vmem>>, %arg5: memref<128x128xf32, #tpu.memory_space<vmem>>, %arg6: memref<1x128xf32, #tpu.memory_space<vmem>>, %arg7: memref<1x128xf32, #tpu.memory_space<vmem>>, %arg8: memref<16x256xf32, #tpu.memory_space<vmem>>) attributes {dimension_semantics = [#tpu.dimension_semantics<parallel>], iteration_bounds = array<i64: 2>, scalar_prefetch = 0 : i64, scratch_operands = 0 : i64, tpu.core_type = #tpu.core_type<tc>, window_params = [{transform_indices = @transform_0, window_bounds = array<i64: 16, 256, 16>}, {transform_indices = @transform_1, window_bounds = array<i64: 16, 128>}, {pipeline_mode = #tpu.pipeline_mode<synchronous>, transform_indices = @transform_2, window_bounds = array<i64: 256, 128>}, {pipeline_mode = #tpu.pipeline_mode<synchronous>, transform_indices = @transform_3, window_bounds = array<i64: 1, 128>}, {pipeline_mode = #tpu.pipeline_mode<synchronous>, transform_indices = @transform_4, window_bounds = array<i64: 128, 128>}, {pipeline_mode = #tpu.pipeline_mode<synchronous>, transform_indices = @transform_5, window_bounds = array<i64: 1, 128>}, {pipeline_mode = #tpu.pipeline_mode<synchronous>, transform_indices = @transform_6, window_bounds = array<i64: 1, 128>}, {transform_indices = @transform_7, window_bounds = array<i64: 16, 256>}]} {
    %c0 = arith.constant 0 : index
    %c0_0 = arith.constant 0 : index
    %c0_1 = arith.constant 0 : index
    %0 = vector.load %arg1[%c0, %c0_0, %c0_1] : memref<16x256x16xf32, #tpu.memory_space<vmem>>, vector<1x256x16xf32>
    %1 = vector.shape_cast %0 : vector<1x256x16xf32> to vector<256x16xf32>
    %2 = tpu.transpose %1, [1, 0] : vector<256x16xf32> -> vector<16x256xf32>
    %c1 = arith.constant 1 : index
    %c0_2 = arith.constant 0 : index
    %c0_3 = arith.constant 0 : index
    %3 = vector.load %arg1[%c1, %c0_2, %c0_3] : memref<16x256x16xf32, #tpu.memory_space<vmem>>, vector<1x256x16xf32>
    %4 = vector.shape_cast %3 : vector<1x256x16xf32> to vector<256x16xf32>
    %5 = tpu.transpose %4, [1, 0] : vector<256x16xf32> -> vector<16x256xf32>
    %c2 = arith.constant 2 : index
    %c0_4 = arith.constant 0 : index
    %c0_5 = arith.constant 0 : index
    %6 = vector.load %arg1[%c2, %c0_4, %c0_5] : memref<16x256x16xf32, #tpu.memory_space<vmem>>, vector<1x256x16xf32>
    %7 = vector.shape_cast %6 : vector<1x256x16xf32> to vector<256x16xf32>
    %8 = tpu.transpose %7, [1, 0] : vector<256x16xf32> -> vector<16x256xf32>
    %c3 = arith.constant 3 : index
    %c0_6 = arith.constant 0 : index
    %c0_7 = arith.constant 0 : index
    %9 = vector.load %arg1[%c3, %c0_6, %c0_7] : memref<16x256x16xf32, #tpu.memory_space<vmem>>, vector<1x256x16xf32>
    %10 = vector.shape_cast %9 : vector<1x256x16xf32> to vector<256x16xf32>
    %11 = tpu.transpose %10, [1, 0] : vector<256x16xf32> -> vector<16x256xf32>
    %c4 = arith.constant 4 : index
    %c0_8 = arith.constant 0 : index
    %c0_9 = arith.constant 0 : index
    %12 = vector.load %arg1[%c4, %c0_8, %c0_9] : memref<16x256x16xf32, #tpu.memory_space<vmem>>, vector<1x256x16xf32>
    %13 = vector.shape_cast %12 : vector<1x256x16xf32> to vector<256x16xf32>
    %14 = tpu.transpose %13, [1, 0] : vector<256x16xf32> -> vector<16x256xf32>
    %c5 = arith.constant 5 : index
    %c0_10 = arith.constant 0 : index
    %c0_11 = arith.constant 0 : index
    %15 = vector.load %arg1[%c5, %c0_10, %c0_11] : memref<16x256x16xf32, #tpu.memory_space<vmem>>, vector<1x256x16xf32>
    %16 = vector.shape_cast %15 : vector<1x256x16xf32> to vector<256x16xf32>
    %17 = tpu.transpose %16, [1, 0] : vector<256x16xf32> -> vector<16x256xf32>
    %c6 = arith.constant 6 : index
    %c0_12 = arith.constant 0 : index
    %c0_13 = arith.constant 0 : index
    %18 = vector.load %arg1[%c6, %c0_12, %c0_13] : memref<16x256x16xf32, #tpu.memory_space<vmem>>, vector<1x256x16xf32>
    %19 = vector.shape_cast %18 : vector<1x256x16xf32> to vector<256x16xf32>
    %20 = tpu.transpose %19, [1, 0] : vector<256x16xf32> -> vector<16x256xf32>
    %c7 = arith.constant 7 : index
    %c0_14 = arith.constant 0 : index
    %c0_15 = arith.constant 0 : index
    %21 = vector.load %arg1[%c7, %c0_14, %c0_15] : memref<16x256x16xf32, #tpu.memory_space<vmem>>, vector<1x256x16xf32>
    %22 = vector.shape_cast %21 : vector<1x256x16xf32> to vector<256x16xf32>
    %23 = tpu.transpose %22, [1, 0] : vector<256x16xf32> -> vector<16x256xf32>
    %c8 = arith.constant 8 : index
    %c0_16 = arith.constant 0 : index
    %c0_17 = arith.constant 0 : index
    %24 = vector.load %arg1[%c8, %c0_16, %c0_17] : memref<16x256x16xf32, #tpu.memory_space<vmem>>, vector<1x256x16xf32>
    %25 = vector.shape_cast %24 : vector<1x256x16xf32> to vector<256x16xf32>
    %26 = tpu.transpose %25, [1, 0] : vector<256x16xf32> -> vector<16x256xf32>
    %c9 = arith.constant 9 : index
    %c0_18 = arith.constant 0 : index
    %c0_19 = arith.constant 0 : index
    %27 = vector.load %arg1[%c9, %c0_18, %c0_19] : memref<16x256x16xf32, #tpu.memory_space<vmem>>, vector<1x256x16xf32>
    %28 = vector.shape_cast %27 : vector<1x256x16xf32> to vector<256x16xf32>
    %29 = tpu.transpose %28, [1, 0] : vector<256x16xf32> -> vector<16x256xf32>
    %c10 = arith.constant 10 : index
    %c0_20 = arith.constant 0 : index
    %c0_21 = arith.constant 0 : index
    %30 = vector.load %arg1[%c10, %c0_20, %c0_21] : memref<16x256x16xf32, #tpu.memory_space<vmem>>, vector<1x256x16xf32>
    %31 = vector.shape_cast %30 : vector<1x256x16xf32> to vector<256x16xf32>
    %32 = tpu.transpose %31, [1, 0] : vector<256x16xf32> -> vector<16x256xf32>
    %c11 = arith.constant 11 : index
    %c0_22 = arith.constant 0 : index
    %c0_23 = arith.constant 0 : index
    %33 = vector.load %arg1[%c11, %c0_22, %c0_23] : memref<16x256x16xf32, #tpu.memory_space<vmem>>, vector<1x256x16xf32>
    %34 = vector.shape_cast %33 : vector<1x256x16xf32> to vector<256x16xf32>
    %35 = tpu.transpose %34, [1, 0] : vector<256x16xf32> -> vector<16x256xf32>
    %c12 = arith.constant 12 : index
    %c0_24 = arith.constant 0 : index
    %c0_25 = arith.constant 0 : index
    %36 = vector.load %arg1[%c12, %c0_24, %c0_25] : memref<16x256x16xf32, #tpu.memory_space<vmem>>, vector<1x256x16xf32>
    %37 = vector.shape_cast %36 : vector<1x256x16xf32> to vector<256x16xf32>
    %38 = tpu.transpose %37, [1, 0] : vector<256x16xf32> -> vector<16x256xf32>
    %c13 = arith.constant 13 : index
    %c0_26 = arith.constant 0 : index
    %c0_27 = arith.constant 0 : index
    %39 = vector.load %arg1[%c13, %c0_26, %c0_27] : memref<16x256x16xf32, #tpu.memory_space<vmem>>, vector<1x256x16xf32>
    %40 = vector.shape_cast %39 : vector<1x256x16xf32> to vector<256x16xf32>
    %41 = tpu.transpose %40, [1, 0] : vector<256x16xf32> -> vector<16x256xf32>
    %c14 = arith.constant 14 : index
    %c0_28 = arith.constant 0 : index
    %c0_29 = arith.constant 0 : index
    %42 = vector.load %arg1[%c14, %c0_28, %c0_29] : memref<16x256x16xf32, #tpu.memory_space<vmem>>, vector<1x256x16xf32>
    %43 = vector.shape_cast %42 : vector<1x256x16xf32> to vector<256x16xf32>
    %44 = tpu.transpose %43, [1, 0] : vector<256x16xf32> -> vector<16x256xf32>
    %c15 = arith.constant 15 : index
    %c0_30 = arith.constant 0 : index
    %c0_31 = arith.constant 0 : index
    %45 = vector.load %arg1[%c15, %c0_30, %c0_31] : memref<16x256x16xf32, #tpu.memory_space<vmem>>, vector<1x256x16xf32>
    %46 = vector.shape_cast %45 : vector<1x256x16xf32> to vector<256x16xf32>
    %47 = tpu.transpose %46, [1, 0] : vector<256x16xf32> -> vector<16x256xf32>
    %48 = tpu.concatenate %2, %5, %8, %11, %14, %17, %20, %23, %26, %29, %32, %35, %38, %41, %44, %47 in 0 : vector<16x256xf32>, vector<16x256xf32>, vector<16x256xf32>, vector<16x256xf32>, vector<16x256xf32>, vector<16x256xf32>, vector<16x256xf32>, vector<16x256xf32>, vector<16x256xf32>, vector<16x256xf32>, vector<16x256xf32>, vector<16x256xf32>, vector<16x256xf32>, vector<16x256xf32>, vector<16x256xf32>, vector<16x256xf32> -> vector<256x256xf32>
    %c0_32 = arith.constant 0 : index
    %c0_33 = arith.constant 0 : index
    %49 = vector.load %arg3[%c0_32, %c0_33] : memref<256x128xf32, #tpu.memory_space<vmem>>, vector<256x128xf32>
    %cst = arith.constant dense<0.000000e+00> : vector<256x128xf32>
    %50 = tpu.matmul %48, %49, %cst {dimension_numbers = #tpu.dot_dimension_numbers<[1], [0], [0], [1], [0, 0, 1, 1], [], []>} : vector<256x256xf32>, vector<256x128xf32>, vector<256x128xf32> -> vector<256x128xf32>
    %c0_34 = arith.constant 0 : index
    %c0_35 = arith.constant 0 : index
    %51 = vector.load %arg4[%c0_34, %c0_35] : memref<1x128xf32, #tpu.memory_space<vmem>>, vector<1x128xf32>
    %52 = vector.broadcast %51 : vector<1x128xf32> to vector<256x128xf32>
    %53 = arith.addf %50, %52 : vector<256x128xf32>
    %c0_36 = arith.constant 0 : index
    %c0_37 = arith.constant 0 : index
    %54 = vector.load %arg2[%c0_36, %c0_37] : memref<16x128xf32, #tpu.memory_space<vmem>>, vector<16x128xf32>
    %c0_38 = arith.constant 0 : index
    %c0_39 = arith.constant 0 : index
    %55 = vector.load %arg5[%c0_38, %c0_39] : memref<128x128xf32, #tpu.memory_space<vmem>>, vector<128x128xf32>
    %cst_40 = arith.constant dense<0.000000e+00> : vector<16x128xf32>
    %56 = tpu.matmul %54, %55, %cst_40 {dimension_numbers = #tpu.dot_dimension_numbers<[1], [0], [0], [1], [0, 0, 1, 1], [], []>} : vector<16x128xf32>, vector<128x128xf32>, vector<16x128xf32> -> vector<16x128xf32>
    %c0_41 = arith.constant 0 : index
    %c0_42 = arith.constant 0 : index
    %57 = vector.load %arg6[%c0_41, %c0_42] : memref<1x128xf32, #tpu.memory_space<vmem>>, vector<1x128xf32>
    %58 = vector.broadcast %57 : vector<1x128xf32> to vector<16x128xf32>
    %59 = arith.addf %56, %58 : vector<16x128xf32>
    %60 = vector.shape_cast %53 : vector<256x128xf32> to vector<16x16x128xf32>
    %61 = vector.shape_cast %59 : vector<16x128xf32> to vector<16x1x128xf32>
    %62 = vector.broadcast %61 : vector<16x1x128xf32> to vector<16x16x128xf32>
    %63 = arith.addf %60, %62 : vector<16x16x128xf32>
    %cst_43 = arith.constant 0.000000e+00 : f32
    %64 = vector.broadcast %cst_43 : f32 to vector<16x16x128xf32>
    %65 = arith.maximumf %63, %64 : vector<16x16x128xf32>
    %c0_44 = arith.constant 0 : index
    %c0_45 = arith.constant 0 : index
    %66 = vector.load %arg7[%c0_44, %c0_45] : memref<1x128xf32, #tpu.memory_space<vmem>>, vector<1x128xf32>
    %67 = vector.shape_cast %66 : vector<1x128xf32> to vector<1x1x128xf32>
    %68 = vector.broadcast %67 : vector<1x1x128xf32> to vector<16x16x128xf32>
    %69 = arith.mulf %65, %68 : vector<16x16x128xf32>
    %cst_46 = arith.constant dense<0.000000e+00> : vector<16x16xf32>
    %70 = vector.multi_reduction <add>, %69, %cst_46 [2] : vector<16x16x128xf32> to vector<16x16xf32>
    %71 = vector.shape_cast %70 : vector<16x16xf32> to vector<16x16x1xf32>
    %cst_47 = arith.constant dense<0xFF800000> : vector<16x1xf32>
    %72 = vector.multi_reduction <maximumf>, %71, %cst_47 [1] : vector<16x16x1xf32> to vector<16x1xf32>
    %73 = vector.shape_cast %72 : vector<16x1xf32> to vector<16x1x1xf32>
    %74 = vector.broadcast %73 : vector<16x1x1xf32> to vector<16x16x1xf32>
    %75 = arith.subf %71, %74 : vector<16x16x1xf32>
    %76 = math.exp %75 : vector<16x16x1xf32>
    %cst_48 = arith.constant dense<0.000000e+00> : vector<16x1xf32>
    %77 = vector.multi_reduction <add>, %76, %cst_48 [1] : vector<16x16x1xf32> to vector<16x1xf32>
    %78 = vector.shape_cast %77 : vector<16x1xf32> to vector<16x1x1xf32>
    %79 = vector.shape_cast %48 : vector<256x256xf32> to vector<16x16x256xf32>
    %80 = vector.broadcast %76 : vector<16x16x1xf32> to vector<16x16x256xf32>
    %81 = arith.mulf %79, %80 : vector<16x16x256xf32>
    %cst_49 = arith.constant dense<0.000000e+00> : vector<16x256xf32>
    %82 = vector.multi_reduction <add>, %81, %cst_49 [1] : vector<16x16x256xf32> to vector<16x256xf32>
    %83 = vector.shape_cast %78 : vector<16x1x1xf32> to vector<16x1xf32>
    %cst_50 = arith.constant 1.000000e+00 : f32
    %84 = vector.broadcast %cst_50 : f32 to vector<16x1xf32>
    %85 = arith.divf %84, %83 : vector<16x1xf32>
    %86 = vector.broadcast %85 : vector<16x1xf32> to vector<16x256xf32>
    %87 = arith.mulf %82, %86 : vector<16x256xf32>
    %c0_51 = arith.constant 0 : index
    %c0_52 = arith.constant 0 : index
    %88 = vector.load %arg8[%c0_51, %c0_52] : memref<16x256xf32, #tpu.memory_space<vmem>>, vector<16x256xf32>
    tpu.vector_store %arg8[%c0_51, %c0_52], %87 {strides = array<i32>} : memref<16x256xf32, #tpu.memory_space<vmem>>, vector<16x256xf32>,
    return
  }
  func.func @transform_0(%arg0: i32) -> (i32, i32, i32) {
    %c0_i32 = arith.constant 0 : i32
    %c0_i32_0 = arith.constant 0 : i32
    %c0_i32_1 = arith.constant 0 : i32
    return %arg0, %c0_i32, %c0_i32_0 : i32, i32, i32
  }
  func.func @transform_1(%arg0: i32) -> (i32, i32) {
    %c0_i32 = arith.constant 0 : i32
    %c0_i32_0 = arith.constant 0 : i32
    return %arg0, %c0_i32 : i32, i32
  }
  func.func @transform_2(%arg0: i32) -> (i32, i32) {
    %c0_i32 = arith.constant 0 : i32
    %c0_i32_0 = arith.constant 0 : i32
    %c0_i32_1 = arith.constant 0 : i32
    return %c0_i32, %c0_i32_0 : i32, i32
  }
  func.func @transform_3(%arg0: i32) -> (i32, i32) {
    %c0_i32 = arith.constant 0 : i32
    %c0_i32_0 = arith.constant 0 : i32
    %c0_i32_1 = arith.constant 0 : i32
    return %c0_i32, %c0_i32_0 : i32, i32
  }
  func.func @transform_4(%arg0: i32) -> (i32, i32) {
    %c0_i32 = arith.constant 0 : i32
    %c0_i32_0 = arith.constant 0 : i32
    %c0_i32_1 = arith.constant 0 : i32
    return %c0_i32, %c0_i32_0 : i32, i32
  }
  func.func @transform_5(%arg0: i32) -> (i32, i32) {
    %c0_i32 = arith.constant 0 : i32
    %c0_i32_0 = arith.constant 0 : i32
    %c0_i32_1 = arith.constant 0 : i32
    return %c0_i32, %c0_i32_0 : i32, i32
  }
  func.func @transform_6(%arg0: i32) -> (i32, i32) {
    %c0_i32 = arith.constant 0 : i32
    %c0_i32_0 = arith.constant 0 : i32
    %c0_i32_1 = arith.constant 0 : i32
    return %c0_i32, %c0_i32_0 : i32, i32
  }
  func.func @transform_7(%arg0: i32) -> (i32, i32) {
    %c0_i32 = arith.constant 0 : i32
    %c0_i32_0 = arith.constant 0 : i32
    return %arg0, %c0_i32 : i32, i32
  }
}

</mosaic_0001>

<bundles_post_ra>
// kernel: tpu_custom_call.1
= control target key start
LH: loop header
LB: loop body
LE: loop exit
PB: predicated region body
PF: predicated region fallthrough
CT: control target
= control target key end

     0   :  { %12 = vsyncpa [#allocation3], 0  ;;  %s6073_s0 = inlined_call_operand.vmem [shape: f32[32,256,16], index: 0, kind: input, shape index: {}]   ;;  %s6074_s1 = inlined_call_operand.vmem [shape: f32[32,128], index: 1, kind: input, shape index: {}]   ;;  %s6075_s2 = inlined_call_operand.vmem [shape: f32[256,128], index: 2, kind: input, shape index: {}]   ;;  %s6076_s3 = inlined_call_operand.vmem [shape: f32[1,128], index: 3, kind: input, shape index: {}]   ;;  %s6077_s4 = inlined_call_operand.vmem [shape: f32[128,128], index: 4, kind: input, shape index: {}]   ;;  %s6078_s5 = inlined_call_operand.vmem [shape: f32[1,128], index: 5, kind: input, shape index: {}]   ;;  %s6079_s6 = inlined_call_operand.vmem [shape: f32[1,128], index: 6, kind: input, shape index: {}]   ;;  %s6080_s7 = inlined_call_operand.hbm [shape: f32[32,256], index: 7, kind: output, shape index: {}]  }
   0x1   :  { %14 = vsyncpa [#allocation3 + $0x1], 0  ;;  %s4198_s24 = smov 0   ;;  %s4200_s25 = smov 0  }
   0x2   :  { %s4202_s26 = smov 0   ;;  %s4204_s27 = smov 0  }
   0x3 LB: > { %s4219_s28 = sadd.s32 4294967295, %s4154_s27   ;;  %s3421_s29 = sadd.s32 4294967294, %s4154_s27   ;;  %s4154_s27 = sphi %s4204_s27, %s6303_s27   ;;  %s4150_s26 = sphi %s4202_s26, %s6302_s26   ;;  %s4146_s25 = sphi %s4200_s25, %s6301_s25   ;;  %s4142_s24 = sphi %s4198_s24, %s6300_s24  }
   0x4   : > { %s4223_s30 = sadd.s32 1, %s4154_s27   ;;  %s184_s8 = sadd.s32 1, %s4150_s26 }
   0x5   : > { %s181_s9 = ssub.s32 %s4154_s27, %s4223_s30  ;;  %p194_p0 = scmp.ne.s32.totalorder %s4150_s26, %s4146_s25 }
   0x6   : > { %p182_p1 = scmp.eq.s32.totalorder %s181_s9, 0  ;;  %p195_p2 = scmp.eq.s32.totalorder %s4219_s28, 1 }
   0x7   : > { %p200_p3 = scmp.ne.s32.totalorder %s4146_s25, %s4142_s24  ;;  %p201_p4 = scmp.eq.s32.totalorder %s3421_s29, 1 }
   0x8   : > { %s4234_s10 = scalar_select %p182_p1, %s4150_s26, %s184_s8  }
   0x9   : > { %p4236_p5 = por %p195_p2, %p194_p0  ;;  %p4240_p6 = por %p201_p4, %p200_p3 }
   0xa   : > { %p3424_p7 = scmp.ge.s32.totalorder %s4154_s27, 1  ;;  %p253_p8 = scmp.lt.s32.totalorder %s4154_s27, 3 }
   0xc   : > { %p254_p9 = pnand %p3424_p7, %p253_p8 }
   0xe   : > { %257 = sbr.rel (%p254_p9) target bundleno = 2004 (0x7d4), region = 48 }
  0x13   : > { %s3426_s13 = sshll.u32 %s4219_s28, 4  ;;  %s3429_s29 = sshll.u32 %s4219_s28, 1  ;;  %vm3287_vm4 = vcmask 1041409  }
  0x14   : > { %p292_p10 = scmp.lt.s32.totalorder %s3426_s13, 31  ;;  %p299_p11 = scmp.lt.s32.totalorder %s3429_s29, 3 }
  0x15   : > { %s288_s20 = sand.u32 1, %s4146_s25   ;;  %s3919_s22 = sshll.u32 %s4219_s28, 5 }
  0x16   : > { %s6305_s13 = smov (!%p292_p10, %s3426_s13), 31  ;;  %s6307_s29 = smov (!%p299_p11, %s3429_s29), 3 }
  0x17   : > { %s3917_s14 = sshll.u32 %s6305_s13, 8  ;;  %s3430_s8 = sshll.u32 %s6307_s29, 3 }
  0x18   : > { %s4250_s17 = scalar_lea.vmem %s6073_s0, %s3917_s14  ;;  %s302_s14 = scalar_lea.vmem %s6074_s1, %s3430_s8 }
  0x19   : > { %v321_v0 = vld [vmem:[%s4250_s17 + $0x80] sm:$0xff]  ;;  %v322_v2 = vld [vmem:[%s4250_s17 + $0x88] sm:$0xff]  ;;  %v323_v4 = vld [vmem:[%s4250_s17 + $0x90] sm:$0xff]  ;;  %s3343_s8 = scalar_lea.hbm %s6080_s7, %s3919_s22  ;;  %s3331_s13 = scalar_lea.sflag [#allocation3], %s288_s20 }
  0x1a   : > { %v305_v1 = vld [vmem:[%s4250_s17] sm:$0xff]  ;;  %369 = vxpose.xlu1.b32.start [1/16] (narrow) %v321_v0, 16  ;;  %v306_v3 = vld [vmem:[%s4250_s17 + $0x8] sm:$0xff]  ;;  %v307_v5 = vld [vmem:[%s4250_s17 + $0x10] sm:$0xff]  ;;  %s3346_s9 = sshll.u32 %s3343_s8, 4  ;;  %s4112_s19 = scalar_lea.hbm %s6080_s7, 64  ;;  %s3347_s9 = int_to_ptr.hbm [resolvable:$true] %s3346_s9 }
  0x1b   : > { %337 = vxpose.xlu0.b32.start [1/16] (narrow) %v305_v1, 16  ;;  %v324_v6 = vld [vmem:[%s4250_s17 + $0x98] sm:$0xff]  ;;  %v325_v8 = vld [vmem:[%s4250_s17 + $0xa0] sm:$0xff]  ;;  %v326_v10 = vld [vmem:[%s4250_s17 + $0xa8] sm:$0xff] }
  0x1c   : > { %v308_v7 = vld [vmem:[%s4250_s17 + $0x18] sm:$0xff]  ;;  %v309_v9 = vld [vmem:[%s4250_s17 + $0x20] sm:$0xff]  ;;  %v310_v11 = vld [vmem:[%s4250_s17 + $0x28] sm:$0xff] }
  0x1d   : > { %v327_v12 = vld [vmem:[%s4250_s17 + $0xb0] sm:$0xff]  ;;  %v328_v14 = vld [vmem:[%s4250_s17 + $0xb8] sm:$0xff]  ;;  %v329_v16 = vld [vmem:[%s4250_s17 + $0xc0] sm:$0xff] }
  0x1e   : > { %v311_v13 = vld [vmem:[%s4250_s17 + $0x30] sm:$0xff]  ;;  %v312_v15 = vld [vmem:[%s4250_s17 + $0x38] sm:$0xff]  ;;  %v313_v17 = vld [vmem:[%s4250_s17 + $0x40] sm:$0xff] }
  0x1f   : > { %v330_v18 = vld [vmem:[%s4250_s17 + $0xc8] sm:$0xff]  ;;  %v331_v20 = vld [vmem:[%s4250_s17 + $0xd0] sm:$0xff]  ;;  %v332_v22 = vld [vmem:[%s4250_s17 + $0xd8] sm:$0xff] }
  0x20   : > { %v314_v19 = vld [vmem:[%s4250_s17 + $0x48] sm:$0xff]  ;;  %v315_v21 = vld [vmem:[%s4250_s17 + $0x50] sm:$0xff]  ;;  %v316_v23 = vld [vmem:[%s4250_s17 + $0x58] sm:$0xff] }
  0x21   : > { %v3431_v24 = vld [vmem:[%s4250_s17 + $0x100] sm:$0xff]  ;;  %v3432_v27 = vld [vmem:[%s4250_s17 + $0x108] sm:$0xff]  ;;  %v3433_v30 = vld [vmem:[%s4250_s17 + $0x110] sm:$0xff] }
  0x22   : > { %370 = vxpose.xlu1.b32.cont [2/16] (narrow) %v322_v2, 16  ;;  %434 = vxpose.xlu2.b32.start [1/16] (narrow) %v3431_v24, 16  ;;  %v333_v25 = vld [vmem:[%s4250_s17 + $0xe0] sm:$0xff]  ;;  %v334_v28 = vld [vmem:[%s4250_s17 + $0xe8] sm:$0xff]  ;;  %v335_v31 = vld [vmem:[%s4250_s17 + $0xf0] sm:$0xff] }
  0x23   : > { %338 = vxpose.xlu0.b32.cont [2/16] (narrow) %v306_v3, 16  ;;  %v317_v26 = vld [vmem:[%s4250_s17 + $0x60] sm:$0xff]  ;;  %v318_v29 = vld [vmem:[%s4250_s17 + $0x68] sm:$0xff]  ;;  %v319_v32 = vld [vmem:[%s4250_s17 + $0x70] sm:$0xff] }
  0x24   : > { %v3434_v33 = vld [vmem:[%s4250_s17 + $0x118] sm:$0xff]  ;;  %v3435_v36 = vld [vmem:[%s4250_s17 + $0x120] sm:$0xff]  ;;  %v3436_v39 = vld [vmem:[%s4250_s17 + $0x128] sm:$0xff] }
  0x25   : > { %v336_v34 = vld [vmem:[%s4250_s17 + $0xf8] sm:$0xff]  ;;  %v3463_v37 = vld [vmem:[%s4250_s17 + $0x200] sm:$0xff]  ;;  %v3464_v40 = vld [vmem:[%s4250_s17 + $0x208] sm:$0xff] }
  0x26   : > { %v320_v35 = vld [vmem:[%s4250_s17 + $0x78] sm:$0xff]  ;;  %v3447_v38 = vld [vmem:[%s4250_s17 + $0x180] sm:$0xff]  ;;  %v3448_v41 = vld [vmem:[%s4250_s17 + $0x188] sm:$0xff] }
  0x27   : > { %v3437_v42 = vld [vmem:[%s4250_s17 + $0x130] sm:$0xff]  ;;  %v3438_v45 = vld [vmem:[%s4250_s17 + $0x138] sm:$0xff]  ;;  %v3439_v48 = vld [vmem:[%s4250_s17 + $0x140] sm:$0xff] }
  0x28   : > { %v3465_v43 = vld [vmem:[%s4250_s17 + $0x210] sm:$0xff]  ;;  %v3466_v46 = vld [vmem:[%s4250_s17 + $0x218] sm:$0xff]  ;;  %v3467_v49 = vld [vmem:[%s4250_s17 + $0x220] sm:$0xff] }
  0x29   : > { %v3449_v44 = vld [vmem:[%s4250_s17 + $0x190] sm:$0xff]  ;;  %v3450_v47 = vld [vmem:[%s4250_s17 + $0x198] sm:$0xff]  ;;  %v3451_v50 = vld [vmem:[%s4250_s17 + $0x1a0] sm:$0xff] }
  0x2a   : > { %371 = vxpose.xlu1.b32.cont [3/16] (narrow) %v323_v4, 16  ;;  %435 = vxpose.xlu2.b32.cont [2/16] (narrow) %v3432_v27, 16  ;;  %v3440_v51 = vld [vmem:[%s4250_s17 + $0x148] sm:$0xff]  ;;  %v3441_v54 = vld [vmem:[%s4250_s17 + $0x150] sm:$0xff]  ;;  %v3442_v57 = vld [vmem:[%s4250_s17 + $0x158] sm:$0xff] }
  0x2b   : > { %339 = vxpose.xlu0.b32.cont [3/16] (narrow) %v307_v5, 16  ;;  %v3468_v52 = vld [vmem:[%s4250_s17 + $0x228] sm:$0xff]  ;;  %v3469_v55 = vld [vmem:[%s4250_s17 + $0x230] sm:$0xff]  ;;  %v3470_v58 = vld [vmem:[%s4250_s17 + $0x238] sm:$0xff] }
  0x2c   : > { %v3452_v53 = vld [vmem:[%s4250_s17 + $0x1a8] sm:$0xff]  ;;  %v3453_v56 = vld [vmem:[%s4250_s17 + $0x1b0] sm:$0xff]  ;;  %v3454_v59 = vld [vmem:[%s4250_s17 + $0x1b8] sm:$0xff] }
  0x2d   : > { %v3443_v60 = vld [vmem:[%s4250_s17 + $0x160] sm:$0xff]  ;;  %v3444_v63 = vld [vmem:[%s4250_s17 + $0x168] sm:$0xff]  ;;  %v3445_v2 = vld [vmem:[%s4250_s17 + $0x170] sm:$0xff] }
  0x2e   : > { %v3471_v61 = vld [vmem:[%s4250_s17 + $0x240] sm:$0xff]  ;;  %v3472_v0 = vld [vmem:[%s4250_s17 + $0x248] sm:$0xff]  ;;  %v3473_v3 = vld [vmem:[%s4250_s17 + $0x250] sm:$0xff] }
  0x2f   : > { %v3455_v62 = vld [vmem:[%s4250_s17 + $0x1c0] sm:$0xff]  ;;  %v3456_v1 = vld [vmem:[%s4250_s17 + $0x1c8] sm:$0xff]  ;;  %v3457_v4 = vld [vmem:[%s4250_s17 + $0x1d0] sm:$0xff] }
  0x30   : > { %v3446_v5 = vld [vmem:[%s4250_s17 + $0x178] sm:$0xff]  ;;  %v3512_v24 = vld [vmem:[%s4250_s17 + $0x388] sm:$0xff]  ;;  %v3513_v27 = vld [vmem:[%s4250_s17 + $0x390] sm:$0xff] }
  0x32   : > { %372 = vxpose.xlu1.b32.cont [4/16] (narrow) %v324_v6, 16  ;;  %436 = vxpose.xlu2.b32.cont [3/16] (narrow) %v3433_v30, 16  ;;  %v3474_v6 = vld [vmem:[%s4250_s17 + $0x258] sm:$0xff] }
  0x33   : > { %340 = vxpose.xlu0.b32.cont [4/16] (narrow) %v308_v7, 16  ;;  %v3458_v7 = vld [vmem:[%s4250_s17 + $0x1d8] sm:$0xff] }
  0x34   : > { %v3514_v30 = vld [vmem:[%s4250_s17 + $0x398] sm:$0xff] }
  0x3a   : > { %373 = vxpose.xlu1.b32.cont [5/16] (narrow) %v325_v8, 16  ;;  %437 = vxpose.xlu2.b32.cont [4/16] (narrow) %v3434_v33, 16  ;;  %v3479_v8 = vld [vmem:[%s4250_s17 + $0x280] sm:$0xff] }
  0x3b   : > { %341 = vxpose.xlu0.b32.cont [5/16] (narrow) %v309_v9, 16  ;;  %v3475_v9 = vld [vmem:[%s4250_s17 + $0x260] sm:$0xff] }
  0x3c   : > { %v3515_v33 = vld [vmem:[%s4250_s17 + $0x3a0] sm:$0xff] }
  0x42   : > { %374 = vxpose.xlu1.b32.cont [6/16] (narrow) %v326_v10, 16  ;;  %438 = vxpose.xlu2.b32.cont [5/16] (narrow) %v3435_v36, 16  ;;  %v3459_v10 = vld [vmem:[%s4250_s17 + $0x1e0] sm:$0xff]  ;;  %v3516_v36 = vld [vmem:[%s4250_s17 + $0x3a8] sm:$0xff] }
  0x43   : > { %342 = vxpose.xlu0.b32.cont [6/16] (narrow) %v310_v11, 16  ;;  %v3480_v11 = vld [vmem:[%s4250_s17 + $0x288] sm:$0xff] }
  0x4a   : > { %375 = vxpose.xlu1.b32.cont [7/16] (narrow) %v327_v12, 16  ;;  %439 = vxpose.xlu2.b32.cont [6/16] (narrow) %v3436_v39, 16  ;;  %v3476_v12 = vld [vmem:[%s4250_s17 + $0x268] sm:$0xff]  ;;  %v3517_v39 = vld [vmem:[%s4250_s17 + $0x3b0] sm:$0xff] }
  0x4b   : > { %343 = vxpose.xlu0.b32.cont [7/16] (narrow) %v311_v13, 16  ;;  %v3460_v13 = vld [vmem:[%s4250_s17 + $0x1e8] sm:$0xff] }
  0x52   : > { %376 = vxpose.xlu1.b32.cont [8/16] (narrow) %v328_v14, 16  ;;  %440 = vxpose.xlu2.b32.cont [7/16] (narrow) %v3437_v42, 16  ;;  %v3481_v14 = vld [vmem:[%s4250_s17 + $0x290] sm:$0xff]  ;;  %v3518_v42 = vld [vmem:[%s4250_s17 + $0x3b8] sm:$0xff] }
  0x53   : > { %344 = vxpose.xlu0.b32.cont [8/16] (narrow) %v312_v15, 16  ;;  %v3477_v15 = vld [vmem:[%s4250_s17 + $0x270] sm:$0xff] }
  0x5a   : > { %377 = vxpose.xlu1.b32.cont [9/16] (narrow) %v329_v16, 16  ;;  %441 = vxpose.xlu2.b32.cont [8/16] (narrow) %v3438_v45, 16  ;;  %v3461_v16 = vld [vmem:[%s4250_s17 + $0x1f0] sm:$0xff]  ;;  %v3519_v45 = vld [vmem:[%s4250_s17 + $0x3c0] sm:$0xff] }
  0x5b   : > { %345 = vxpose.xlu0.b32.cont [9/16] (narrow) %v313_v17, 16  ;;  %v3482_v17 = vld [vmem:[%s4250_s17 + $0x298] sm:$0xff] }
  0x62   : > { %378 = vxpose.xlu1.b32.cont [10/16] (narrow) %v330_v18, 16  ;;  %442 = vxpose.xlu2.b32.cont [9/16] (narrow) %v3439_v48, 16  ;;  %v3478_v18 = vld [vmem:[%s4250_s17 + $0x278] sm:$0xff]  ;;  %v3520_v48 = vld [vmem:[%s4250_s17 + $0x3c8] sm:$0xff] }
  0x63   : > { %346 = vxpose.xlu0.b32.cont [10/16] (narrow) %v314_v19, 16  ;;  %v3462_v19 = vld [vmem:[%s4250_s17 + $0x1f8] sm:$0xff] }
  0x6a   : > { %379 = vxpose.xlu1.b32.cont [11/16] (narrow) %v331_v20, 16  ;;  %443 = vxpose.xlu2.b32.cont [10/16] (narrow) %v3440_v51, 16  ;;  %v3483_v20 = vld [vmem:[%s4250_s17 + $0x2a0] sm:$0xff]  ;;  %v3521_v51 = vld [vmem:[%s4250_s17 + $0x3d0] sm:$0xff] }
  0x6b   : > { %347 = vxpose.xlu0.b32.cont [11/16] (narrow) %v315_v21, 16  ;;  %v3511_v21 = vld [vmem:[%s4250_s17 + $0x380] sm:$0xff] }
  0x72   : > { %380 = vxpose.xlu1.b32.cont [12/16] (narrow) %v332_v22, 16  ;;  %444 = vxpose.xlu2.b32.cont [11/16] (narrow) %v3441_v54, 16  ;;  %v3495_v22 = vld [vmem:[%s4250_s17 + $0x300] sm:$0xff]  ;;  %v3522_v54 = vld [vmem:[%s4250_s17 + $0x3d8] sm:$0xff] }
  0x73   : > { %348 = vxpose.xlu0.b32.cont [12/16] (narrow) %v316_v23, 16  ;;  %v3484_v23 = vld [vmem:[%s4250_s17 + $0x2a8] sm:$0xff] }
  0x7a   : > { %381 = vxpose.xlu1.b32.cont [13/16] (narrow) %v333_v25, 16  ;;  %445 = vxpose.xlu2.b32.cont [12/16] (narrow) %v3442_v57, 16  ;;  %v3496_v25 = vld [vmem:[%s4250_s17 + $0x308] sm:$0xff]  ;;  %v3523_v57 = vld [vmem:[%s4250_s17 + $0x3e0] sm:$0xff] }
  0x7b   : > { %349 = vxpose.xlu0.b32.cont [13/16] (narrow) %v317_v26, 16  ;;  %v3485_v26 = vld [vmem:[%s4250_s17 + $0x2b0] sm:$0xff] }
  0x82   : > { %382 = vxpose.xlu1.b32.cont [14/16] (narrow) %v334_v28, 16  ;;  %446 = vxpose.xlu2.b32.cont [13/16] (narrow) %v3443_v60, 16  ;;  %v3497_v28 = vld [vmem:[%s4250_s17 + $0x310] sm:$0xff]  ;;  %v3524_v60 = vld [vmem:[%s4250_s17 + $0x3e8] sm:$0xff] }
  0x83   : > { %350 = vxpose.xlu0.b32.cont [14/16] (narrow) %v318_v29, 16  ;;  %v3486_v29 = vld [vmem:[%s4250_s17 + $0x2b8] sm:$0xff] }
  0x8a   : > { %383 = vxpose.xlu1.b32.cont [15/16] (narrow) %v335_v31, 16  ;;  %447 = vxpose.xlu2.b32.cont [14/16] (narrow) %v3444_v63, 16  ;;  %v3498_v31 = vld [vmem:[%s4250_s17 + $0x318] sm:$0xff]  ;;  %v3525_v63 = vld [vmem:[%s4250_s17 + $0x3f0] sm:$0xff] }
  0x8b   : > { %351 = vxpose.xlu0.b32.cont [15/16] (narrow) %v319_v32, 16  ;;  %v3487_v32 = vld [vmem:[%s4250_s17 + $0x2c0] sm:$0xff] }
  0x92   : > { %384 = vxpose.xlu1.b32.end [16/16] (narrow) %v336_v34, 16  ;;  %448 = vxpose.xlu2.b32.cont [15/16] (narrow) %v3445_v2, 16  ;;  %v3499_v34 = vld [vmem:[%s4250_s17 + $0x320] sm:$0xff]  ;;  %v3526_v2 = vld [vmem:[%s4250_s17 + $0x3f8] sm:$0xff] }
  0x93   : > { %352 = vxpose.xlu0.b32.end [16/16] (narrow) %v320_v35, 16  ;;  %v3488_v35 = vld [vmem:[%s4250_s17 + $0x2c8] sm:$0xff] }
  0x9a   : > { %531 = vxpose.xlu1.b32.start [1/16] (narrow) %v3463_v37, 16  ;;  %449 = vxpose.xlu2.b32.end [16/16] (narrow) %v3446_v5, 16  ;;  %v3500_v37 = vld [vmem:[%s4250_s17 + $0x328] sm:$0xff]  ;;  %v3559_v5 = vld [vmem:[%s4250_s17 + $0x500] sm:$0xff] }
  0x9b   : > { %466 = vxpose.xlu0.b32.start [1/16] (narrow) %v3447_v38, 16  ;;  %v3489_v38 = vld [vmem:[%s4250_s17 + $0x2d0] sm:$0xff] }
  0xa2   : > { %532 = vxpose.xlu1.b32.cont [2/16] (narrow) %v3464_v40, 16  ;;  %563 = vxpose.xlu2.b32.start [1/16] (narrow) %v3479_v8, 16  ;;  %v3501_v40 = vld [vmem:[%s4250_s17 + $0x330] sm:$0xff]  ;;  %v3560_v8 = vld [vmem:[%s4250_s17 + $0x508] sm:$0xff] }
  0xa3   : > { %467 = vxpose.xlu0.b32.cont [2/16] (narrow) %v3448_v41, 16  ;;  %v3490_v41 = vld [vmem:[%s4250_s17 + $0x2d8] sm:$0xff] }
  0xaa   : > { %533 = vxpose.xlu1.b32.cont [3/16] (narrow) %v3465_v43, 16  ;;  %564 = vxpose.xlu2.b32.cont [2/16] (narrow) %v3480_v11, 16  ;;  %v3502_v43 = vld [vmem:[%s4250_s17 + $0x338] sm:$0xff]  ;;  %v3561_v11 = vld [vmem:[%s4250_s17 + $0x510] sm:$0xff] }
  0xab   : > { %468 = vxpose.xlu0.b32.cont [3/16] (narrow) %v3449_v44, 16  ;;  %v3491_v44 = vld [vmem:[%s4250_s17 + $0x2e0] sm:$0xff] }
  0xb2   : > { %534 = vxpose.xlu1.b32.cont [4/16] (narrow) %v3466_v46, 16  ;;  %565 = vxpose.xlu2.b32.cont [3/16] (narrow) %v3481_v14, 16  ;;  %v3503_v46 = vld [vmem:[%s4250_s17 + $0x340] sm:$0xff]  ;;  %v3562_v14 = vld [vmem:[%s4250_s17 + $0x518] sm:$0xff] }
  0xb3   : > { %469 = vxpose.xlu0.b32.cont [4/16] (narrow) %v3450_v47, 16  ;;  %v3492_v47 = vld [vmem:[%s4250_s17 + $0x2e8] sm:$0xff] }
  0xba   : > { %535 = vxpose.xlu1.b32.cont [5/16] (narrow) %v3467_v49, 16  ;;  %566 = vxpose.xlu2.b32.cont [4/16] (narrow) %v3482_v17, 16  ;;  %v3504_v49 = vld [vmem:[%s4250_s17 + $0x348] sm:$0xff]  ;;  %v3563_v17 = vld [vmem:[%s4250_s17 + $0x520] sm:$0xff] }
  0xbb   : > { %470 = vxpose.xlu0.b32.cont [5/16] (narrow) %v3451_v50, 16  ;;  %v3493_v50 = vld [vmem:[%s4250_s17 + $0x2f0] sm:$0xff] }
  0xc2   : > { %536 = vxpose.xlu1.b32.cont [6/16] (narrow) %v3468_v52, 16  ;;  %567 = vxpose.xlu2.b32.cont [5/16] (narrow) %v3483_v20, 16  ;;  %v3505_v52 = vld [vmem:[%s4250_s17 + $0x350] sm:$0xff]  ;;  %v3564_v20 = vld [vmem:[%s4250_s17 + $0x528] sm:$0xff] }
  0xc3   : > { %471 = vxpose.xlu0.b32.cont [6/16] (narrow) %v3452_v53, 16  ;;  %v3494_v53 = vld [vmem:[%s4250_s17 + $0x2f8] sm:$0xff] }
  0xca   : > { %537 = vxpose.xlu1.b32.cont [7/16] (narrow) %v3469_v55, 16  ;;  %568 = vxpose.xlu2.b32.cont [6/16] (narrow) %v3484_v23, 16  ;;  %v3506_v55 = vld [vmem:[%s4250_s17 + $0x358] sm:$0xff]  ;;  %v3565_v23 = vld [vmem:[%s4250_s17 + $0x530] sm:$0xff] }
  0xcb   : > { %472 = vxpose.xlu0.b32.cont [7/16] (narrow) %v3453_v56, 16  ;;  %v3527_v56 = vld [vmem:[%s4250_s17 + $0x400] sm:$0xff] }
  0xd2   : > { %538 = vxpose.xlu1.b32.cont [8/16] (narrow) %v3470_v58, 16  ;;  %569 = vxpose.xlu2.b32.cont [7/16] (narrow) %v3485_v26, 16  ;;  %v3507_v58 = vld [vmem:[%s4250_s17 + $0x360] sm:$0xff]  ;;  %v3566_v26 = vld [vmem:[%s4250_s17 + $0x538] sm:$0xff] }
  0xd3   : > { %473 = vxpose.xlu0.b32.cont [8/16] (narrow) %v3454_v59, 16  ;;  %v3528_v59 = vld [vmem:[%s4250_s17 + $0x408] sm:$0xff] }
  0xda   : > { %539 = vxpose.xlu1.b32.cont [9/16] (narrow) %v3471_v61, 16  ;;  %570 = vxpose.xlu2.b32.cont [8/16] (narrow) %v3486_v29, 16  ;;  %v3508_v61 = vld [vmem:[%s4250_s17 + $0x368] sm:$0xff]  ;;  %v3567_v29 = vld [vmem:[%s4250_s17 + $0x540] sm:$0xff] }
  0xdb   : > { %474 = vxpose.xlu0.b32.cont [9/16] (narrow) %v3455_v62, 16  ;;  %v3529_v62 = vld [vmem:[%s4250_s17 + $0x410] sm:$0xff] }
  0xe2   : > { %540 = vxpose.xlu1.b32.cont [10/16] (narrow) %v3472_v0, 16  ;;  %571 = vxpose.xlu2.b32.cont [9/16] (narrow) %v3487_v32, 16  ;;  %v3509_v0 = vld [vmem:[%s4250_s17 + $0x370] sm:$0xff]  ;;  %v3568_v32 = vld [vmem:[%s4250_s17 + $0x548] sm:$0xff] }
  0xe3   : > { %475 = vxpose.xlu0.b32.cont [10/16] (narrow) %v3456_v1, 16  ;;  %v3530_v1 = vld [vmem:[%s4250_s17 + $0x418] sm:$0xff] }
  0xea   : > { %541 = vxpose.xlu1.b32.cont [11/16] (narrow) %v3473_v3, 16  ;;  %572 = vxpose.xlu2.b32.cont [10/16] (narrow) %v3488_v35, 16  ;;  %v3510_v3 = vld [vmem:[%s4250_s17 + $0x378] sm:$0xff]  ;;  %v3569_v35 = vld [vmem:[%s4250_s17 + $0x550] sm:$0xff] }
  0xeb   : > { %476 = vxpose.xlu0.b32.cont [11/16] (narrow) %v3457_v4, 16  ;;  %v3531_v4 = vld [vmem:[%s4250_s17 + $0x420] sm:$0xff] }
  0xf2   : > { %542 = vxpose.xlu1.b32.cont [12/16] (narrow) %v3474_v6, 16  ;;  %573 = vxpose.xlu2.b32.cont [11/16] (narrow) %v3489_v38, 16  ;;  %v3543_v6 = vld [vmem:[%s4250_s17 + $0x480] sm:$0xff]  ;;  %v3570_v38 = vld [vmem:[%s4250_s17 + $0x558] sm:$0xff] }
  0xf3   : > { %477 = vxpose.xlu0.b32.cont [12/16] (narrow) %v3458_v7, 16  ;;  %v3532_v7 = vld [vmem:[%s4250_s17 + $0x428] sm:$0xff] }
  0xfa   : > { %543 = vxpose.xlu1.b32.cont [13/16] (narrow) %v3475_v9, 16  ;;  %574 = vxpose.xlu2.b32.cont [12/16] (narrow) %v3490_v41, 16  ;;  %v3544_v9 = vld [vmem:[%s4250_s17 + $0x488] sm:$0xff]  ;;  %v3571_v41 = vld [vmem:[%s4250_s17 + $0x560] sm:$0xff] }
  0xfb   : > { %478 = vxpose.xlu0.b32.cont [13/16] (narrow) %v3459_v10, 16  ;;  %v3533_v10 = vld [vmem:[%s4250_s17 + $0x430] sm:$0xff] }
 0x102   : > { %544 = vxpose.xlu1.b32.cont [14/16] (narrow) %v3476_v12, 16  ;;  %575 = vxpose.xlu2.b32.cont [13/16] (narrow) %v3491_v44, 16  ;;  %v3545_v12 = vld [vmem:[%s4250_s17 + $0x490] sm:$0xff]  ;;  %v3572_v44 = vld [vmem:[%s4250_s17 + $0x568] sm:$0xff] }
 0x103   : > { %479 = vxpose.xlu0.b32.cont [14/16] (narrow) %v3460_v13, 16  ;;  %v3534_v13 = vld [vmem:[%s4250_s17 + $0x438] sm:$0xff] }
 0x10a   : > { %545 = vxpose.xlu1.b32.cont [15/16] (narrow) %v3477_v15, 16  ;;  %576 = vxpose.xlu2.b32.cont [14/16] (narrow) %v3492_v47, 16  ;;  %v3546_v15 = vld [vmem:[%s4250_s17 + $0x498] sm:$0xff]  ;;  %v3573_v47 = vld [vmem:[%s4250_s17 + $0x570] sm:$0xff] }
 0x10b   : > { %480 = vxpose.xlu0.b32.cont [15/16] (narrow) %v3461_v16, 16  ;;  %v3535_v16 = vld [vmem:[%s4250_s17 + $0x440] sm:$0xff] }
 0x112   : > { %546 = vxpose.xlu1.b32.end [16/16] (narrow) %v3478_v18, 16  ;;  %577 = vxpose.xlu2.b32.cont [15/16] (narrow) %v3493_v50, 16  ;;  %v3547_v18 = vld [vmem:[%s4250_s17 + $0x4a0] sm:$0xff]  ;;  %v3574_v50 = vld [vmem:[%s4250_s17 + $0x578] sm:$0xff] }
 0x113   : > { %481 = vxpose.xlu0.b32.end [16/16] (narrow) %v3462_v19, 16  ;;  %v3536_v19 = vld [vmem:[%s4250_s17 + $0x448] sm:$0xff] }
 0x11a   : > { %660 = vxpose.xlu1.b32.start [1/16] (narrow) %v3511_v21, 16  ;;  %578 = vxpose.xlu2.b32.end [16/16] (narrow) %v3494_v53, 16  ;;  %v3548_v21 = vld [vmem:[%s4250_s17 + $0x4a8] sm:$0xff]  ;;  %v3607_v53 = vld [vmem:[%s4250_s17 + $0x680] sm:$0xff] }
 0x11b   : > { %628 = vxpose.xlu0.b32.start [1/16] (narrow) %v3495_v22, 16  ;;  %v3537_v22 = vld [vmem:[%s4250_s17 + $0x450] sm:$0xff] }
 0x122   : > { %661 = vxpose.xlu1.b32.cont [2/16] (narrow) %v3512_v24, 16  ;;  %725 = vxpose.xlu2.b32.start [1/16] (narrow) %v3527_v56, 16  ;;  %v3549_v24 = vld [vmem:[%s4250_s17 + $0x4b0] sm:$0xff]  ;;  %v3608_v56 = vld [vmem:[%s4250_s17 + $0x688] sm:$0xff] }
 0x123   : > { %629 = vxpose.xlu0.b32.cont [2/16] (narrow) %v3496_v25, 16  ;;  %v3538_v25 = vld [vmem:[%s4250_s17 + $0x458] sm:$0xff] }
 0x12a   : > { %662 = vxpose.xlu1.b32.cont [3/16] (narrow) %v3513_v27, 16  ;;  %726 = vxpose.xlu2.b32.cont [2/16] (narrow) %v3528_v59, 16  ;;  %v3550_v27 = vld [vmem:[%s4250_s17 + $0x4b8] sm:$0xff]  ;;  %v3609_v59 = vld [vmem:[%s4250_s17 + $0x690] sm:$0xff] }
 0x12b   : > { %630 = vxpose.xlu0.b32.cont [3/16] (narrow) %v3497_v28, 16  ;;  %v3539_v28 = vld [vmem:[%s4250_s17 + $0x460] sm:$0xff] }
 0x132   : > { %663 = vxpose.xlu1.b32.cont [4/16] (narrow) %v3514_v30, 16  ;;  %727 = vxpose.xlu2.b32.cont [3/16] (narrow) %v3529_v62, 16  ;;  %v3551_v30 = vld [vmem:[%s4250_s17 + $0x4c0] sm:$0xff]  ;;  %v3610_v62 = vld [vmem:[%s4250_s17 + $0x698] sm:$0xff] }
 0x133   : > { %631 = vxpose.xlu0.b32.cont [4/16] (narrow) %v3498_v31, 16  ;;  %v3540_v31 = vld [vmem:[%s4250_s17 + $0x468] sm:$0xff] }
 0x13a   : > { %664 = vxpose.xlu1.b32.cont [5/16] (narrow) %v3515_v33, 16  ;;  %728 = vxpose.xlu2.b32.cont [4/16] (narrow) %v3530_v1, 16  ;;  %v3552_v33 = vld [vmem:[%s4250_s17 + $0x4c8] sm:$0xff]  ;;  %v3611_v1 = vld [vmem:[%s4250_s17 + $0x6a0] sm:$0xff] }
 0x13b   : > { %632 = vxpose.xlu0.b32.cont [5/16] (narrow) %v3499_v34, 16  ;;  %v3541_v34 = vld [vmem:[%s4250_s17 + $0x470] sm:$0xff] }
 0x142   : > { %665 = vxpose.xlu1.b32.cont [6/16] (narrow) %v3516_v36, 16  ;;  %729 = vxpose.xlu2.b32.cont [5/16] (narrow) %v3531_v4, 16  ;;  %v3553_v36 = vld [vmem:[%s4250_s17 + $0x4d0] sm:$0xff]  ;;  %v3612_v4 = vld [vmem:[%s4250_s17 + $0x6a8] sm:$0xff] }
 0x143   : > { %633 = vxpose.xlu0.b32.cont [6/16] (narrow) %v3500_v37, 16  ;;  %v3542_v37 = vld [vmem:[%s4250_s17 + $0x478] sm:$0xff] }
 0x14a   : > { %666 = vxpose.xlu1.b32.cont [7/16] (narrow) %v3517_v39, 16  ;;  %730 = vxpose.xlu2.b32.cont [6/16] (narrow) %v3532_v7, 16  ;;  %v3554_v39 = vld [vmem:[%s4250_s17 + $0x4d8] sm:$0xff]  ;;  %v3613_v7 = vld [vmem:[%s4250_s17 + $0x6b0] sm:$0xff] }
 0x14b   : > { %634 = vxpose.xlu0.b32.cont [7/16] (narrow) %v3501_v40, 16  ;;  %v3575_v40 = vld [vmem:[%s4250_s17 + $0x580] sm:$0xff] }
 0x152   : > { %667 = vxpose.xlu1.b32.cont [8/16] (narrow) %v3518_v42, 16  ;;  %731 = vxpose.xlu2.b32.cont [7/16] (narrow) %v3533_v10, 16  ;;  %v3555_v42 = vld [vmem:[%s4250_s17 + $0x4e0] sm:$0xff]  ;;  %v3614_v10 = vld [vmem:[%s4250_s17 + $0x6b8] sm:$0xff] }
 0x153   : > { %635 = vxpose.xlu0.b32.cont [8/16] (narrow) %v3502_v43, 16  ;;  %v3576_v43 = vld [vmem:[%s4250_s17 + $0x588] sm:$0xff] }
 0x15a   : > { %668 = vxpose.xlu1.b32.cont [9/16] (narrow) %v3519_v45, 16  ;;  %732 = vxpose.xlu2.b32.cont [8/16] (narrow) %v3534_v13, 16  ;;  %v3556_v45 = vld [vmem:[%s4250_s17 + $0x4e8] sm:$0xff]  ;;  %v3615_v13 = vld [vmem:[%s4250_s17 + $0x6c0] sm:$0xff] }
 0x15b   : > { %636 = vxpose.xlu0.b32.cont [9/16] (narrow) %v3503_v46, 16  ;;  %v3577_v46 = vld [vmem:[%s4250_s17 + $0x590] sm:$0xff] }
 0x162   : > { %669 = vxpose.xlu1.b32.cont [10/16] (narrow) %v3520_v48, 16  ;;  %733 = vxpose.xlu2.b32.cont [9/16] (narrow) %v3535_v16, 16  ;;  %v3557_v48 = vld [vmem:[%s4250_s17 + $0x4f0] sm:$0xff]  ;;  %v3616_v16 = vld [vmem:[%s4250_s17 + $0x6c8] sm:$0xff] }
 0x163   : > { %637 = vxpose.xlu0.b32.cont [10/16] (narrow) %v3504_v49, 16  ;;  %v3578_v49 = vld [vmem:[%s4250_s17 + $0x598] sm:$0xff] }
 0x16a   : > { %670 = vxpose.xlu1.b32.cont [11/16] (narrow) %v3521_v51, 16  ;;  %734 = vxpose.xlu2.b32.cont [10/16] (narrow) %v3536_v19, 16  ;;  %v3558_v51 = vld [vmem:[%s4250_s17 + $0x4f8] sm:$0xff]  ;;  %v3617_v19 = vld [vmem:[%s4250_s17 + $0x6d0] sm:$0xff] }
 0x16b   : > { %638 = vxpose.xlu0.b32.cont [11/16] (narrow) %v3505_v52, 16  ;;  %v3579_v52 = vld [vmem:[%s4250_s17 + $0x5a0] sm:$0xff] }
 0x172   : > { %671 = vxpose.xlu1.b32.cont [12/16] (narrow) %v3522_v54, 16  ;;  %735 = vxpose.xlu2.b32.cont [11/16] (narrow) %v3537_v22, 16  ;;  %v3591_v54 = vld [vmem:[%s4250_s17 + $0x600] sm:$0xff]  ;;  %v3618_v22 = vld [vmem:[%s4250_s17 + $0x6d8] sm:$0xff] }
 0x173   : > { %639 = vxpose.xlu0.b32.cont [12/16] (narrow) %v3506_v55, 16  ;;  %v3580_v55 = vld [vmem:[%s4250_s17 + $0x5a8] sm:$0xff] }
 0x17a   : > { %672 = vxpose.xlu1.b32.cont [13/16] (narrow) %v3523_v57, 16  ;;  %736 = vxpose.xlu2.b32.cont [12/16] (narrow) %v3538_v25, 16  ;;  %v3592_v57 = vld [vmem:[%s4250_s17 + $0x608] sm:$0xff]  ;;  %v3619_v25 = vld [vmem:[%s4250_s17 + $0x6e0] sm:$0xff] }
 0x17b   : > { %640 = vxpose.xlu0.b32.cont [13/16] (narrow) %v3507_v58, 16  ;;  %v3581_v58 = vld [vmem:[%s4250_s17 + $0x5b0] sm:$0xff] }
 0x182   : > { %673 = vxpose.xlu1.b32.cont [14/16] (narrow) %v3524_v60, 16  ;;  %737 = vxpose.xlu2.b32.cont [13/16] (narrow) %v3539_v28, 16  ;;  %v3593_v60 = vld [vmem:[%s4250_s17 + $0x610] sm:$0xff]  ;;  %v3620_v28 = vld [vmem:[%s4250_s17 + $0x6e8] sm:$0xff] }
 0x183   : > { %641 = vxpose.xlu0.b32.cont [14/16] (narrow) %v3508_v61, 16  ;;  %v3582_v61 = vld [vmem:[%s4250_s17 + $0x5b8] sm:$0xff] }
 0x18a   : > { %674 = vxpose.xlu1.b32.cont [15/16] (narrow) %v3525_v63, 16  ;;  %738 = vxpose.xlu2.b32.cont [14/16] (narrow) %v3540_v31, 16  ;;  %v3594_v63 = vld [vmem:[%s4250_s17 + $0x618] sm:$0xff]  ;;  %v3621_v31 = vld [vmem:[%s4250_s17 + $0x6f0] sm:$0xff] }
 0x18b   : > { %642 = vxpose.xlu0.b32.cont [15/16] (narrow) %v3509_v0, 16  ;;  %v3583_v0 = vld [vmem:[%s4250_s17 + $0x5c0] sm:$0xff] }
 0x192   : > { %675 = vxpose.xlu1.b32.end [16/16] (narrow) %v3526_v2, 16  ;;  %739 = vxpose.xlu2.b32.cont [15/16] (narrow) %v3541_v34, 16  ;;  %v3595_v2 = vld [vmem:[%s4250_s17 + $0x620] sm:$0xff]  ;;  %v3622_v34 = vld [vmem:[%s4250_s17 + $0x6f8] sm:$0xff] }
 0x193   : > { %643 = vxpose.xlu0.b32.end [16/16] (narrow) %v3510_v3, 16  ;;  %v3584_v3 = vld [vmem:[%s4250_s17 + $0x5c8] sm:$0xff] }
 0x19a   : > { %822 = vxpose.xlu1.b32.start [1/16] (narrow) %v3559_v5, 16  ;;  %740 = vxpose.xlu2.b32.end [16/16] (narrow) %v3542_v37, 16  ;;  %v3596_v5 = vld [vmem:[%s4250_s17 + $0x628] sm:$0xff]  ;;  %v3655_v37 = vld [vmem:[%s4250_s17 + $0x800] sm:$0xff] }
 0x19b   : > { %757 = vxpose.xlu0.b32.start [1/16] (narrow) %v3543_v6, 16  ;;  %v3585_v6 = vld [vmem:[%s4250_s17 + $0x5d0] sm:$0xff] }
 0x1a2   : > { %823 = vxpose.xlu1.b32.cont [2/16] (narrow) %v3560_v8, 16  ;;  %854 = vxpose.xlu2.b32.start [1/16] (narrow) %v3575_v40, 16  ;;  %v3597_v8 = vld [vmem:[%s4250_s17 + $0x630] sm:$0xff]  ;;  %v3656_v40 = vld [vmem:[%s4250_s17 + $0x808] sm:$0xff] }
 0x1a3   : > { %758 = vxpose.xlu0.b32.cont [2/16] (narrow) %v3544_v9, 16  ;;  %v3586_v9 = vld [vmem:[%s4250_s17 + $0x5d8] sm:$0xff] }
 0x1aa   : > { %824 = vxpose.xlu1.b32.cont [3/16] (narrow) %v3561_v11, 16  ;;  %855 = vxpose.xlu2.b32.cont [2/16] (narrow) %v3576_v43, 16  ;;  %v3598_v11 = vld [vmem:[%s4250_s17 + $0x638] sm:$0xff]  ;;  %v3657_v43 = vld [vmem:[%s4250_s17 + $0x810] sm:$0xff] }
 0x1ab   : > { %759 = vxpose.xlu0.b32.cont [3/16] (narrow) %v3545_v12, 16  ;;  %v3587_v12 = vld [vmem:[%s4250_s17 + $0x5e0] sm:$0xff] }
 0x1b2   : > { %825 = vxpose.xlu1.b32.cont [4/16] (narrow) %v3562_v14, 16  ;;  %856 = vxpose.xlu2.b32.cont [3/16] (narrow) %v3577_v46, 16  ;;  %v3599_v14 = vld [vmem:[%s4250_s17 + $0x640] sm:$0xff]  ;;  %v3658_v46 = vld [vmem:[%s4250_s17 + $0x818] sm:$0xff] }
 0x1b3   : > { %760 = vxpose.xlu0.b32.cont [4/16] (narrow) %v3546_v15, 16  ;;  %v3588_v15 = vld [vmem:[%s4250_s17 + $0x5e8] sm:$0xff] }
 0x1ba   : > { %826 = vxpose.xlu1.b32.cont [5/16] (narrow) %v3563_v17, 16  ;;  %857 = vxpose.xlu2.b32.cont [4/16] (narrow) %v3578_v49, 16  ;;  %v3600_v17 = vld [vmem:[%s4250_s17 + $0x648] sm:$0xff]  ;;  %v3659_v49 = vld [vmem:[%s4250_s17 + $0x820] sm:$0xff] }
 0x1bb   : > { %761 = vxpose.xlu0.b32.cont [5/16] (narrow) %v3547_v18, 16  ;;  %v3589_v18 = vld [vmem:[%s4250_s17 + $0x5f0] sm:$0xff] }
 0x1c2   : > { %827 = vxpose.xlu1.b32.cont [6/16] (narrow) %v3564_v20, 16  ;;  %858 = vxpose.xlu2.b32.cont [5/16] (narrow) %v3579_v52, 16  ;;  %v3601_v20 = vld [vmem:[%s4250_s17 + $0x650] sm:$0xff]  ;;  %v3660_v52 = vld [vmem:[%s4250_s17 + $0x828] sm:$0xff] }
 0x1c3   : > { %762 = vxpose.xlu0.b32.cont [6/16] (narrow) %v3548_v21, 16  ;;  %v3590_v21 = vld [vmem:[%s4250_s17 + $0x5f8] sm:$0xff] }
 0x1ca   : > { %828 = vxpose.xlu1.b32.cont [7/16] (narrow) %v3565_v23, 16  ;;  %859 = vxpose.xlu2.b32.cont [6/16] (narrow) %v3580_v55, 16  ;;  %v3602_v23 = vld [vmem:[%s4250_s17 + $0x658] sm:$0xff]  ;;  %v3661_v55 = vld [vmem:[%s4250_s17 + $0x830] sm:$0xff] }
 0x1cb   : > { %763 = vxpose.xlu0.b32.cont [7/16] (narrow) %v3549_v24, 16  ;;  %v3623_v24 = vld [vmem:[%s4250_s17 + $0x700] sm:$0xff] }
 0x1d2   : > { %829 = vxpose.xlu1.b32.cont [8/16] (narrow) %v3566_v26, 16  ;;  %860 = vxpose.xlu2.b32.cont [7/16] (narrow) %v3581_v58, 16  ;;  %v3603_v26 = vld [vmem:[%s4250_s17 + $0x660] sm:$0xff]  ;;  %v3662_v58 = vld [vmem:[%s4250_s17 + $0x838] sm:$0xff] }
 0x1d3   : > { %764 = vxpose.xlu0.b32.cont [8/16] (narrow) %v3550_v27, 16  ;;  %v3624_v27 = vld [vmem:[%s4250_s17 + $0x708] sm:$0xff] }
 0x1da   : > { %830 = vxpose.xlu1.b32.cont [9/16] (narrow) %v3567_v29, 16  ;;  %861 = vxpose.xlu2.b32.cont [8/16] (narrow) %v3582_v61, 16  ;;  %v3604_v29 = vld [vmem:[%s4250_s17 + $0x668] sm:$0xff]  ;;  %v3663_v61 = vld [vmem:[%s4250_s17 + $0x840] sm:$0xff] }
 0x1db   : > { %765 = vxpose.xlu0.b32.cont [9/16] (narrow) %v3551_v30, 16  ;;  %v3625_v30 = vld [vmem:[%s4250_s17 + $0x710] sm:$0xff] }
 0x1e2   : > { %831 = vxpose.xlu1.b32.cont [10/16] (narrow) %v3568_v32, 16  ;;  %862 = vxpose.xlu2.b32.cont [9/16] (narrow) %v3583_v0, 16  ;;  %v3605_v32 = vld [vmem:[%s4250_s17 + $0x670] sm:$0xff]  ;;  %v3664_v0 = vld [vmem:[%s4250_s17 + $0x848] sm:$0xff] }
 0x1e3   : > { %766 = vxpose.xlu0.b32.cont [10/16] (narrow) %v3552_v33, 16  ;;  %v3626_v33 = vld [vmem:[%s4250_s17 + $0x718] sm:$0xff] }
 0x1ea   : > { %832 = vxpose.xlu1.b32.cont [11/16] (narrow) %v3569_v35, 16  ;;  %863 = vxpose.xlu2.b32.cont [10/16] (narrow) %v3584_v3, 16  ;;  %v3606_v35 = vld [vmem:[%s4250_s17 + $0x678] sm:$0xff]  ;;  %v3665_v3 = vld [vmem:[%s4250_s17 + $0x850] sm:$0xff] }
 0x1eb   : > { %767 = vxpose.xlu0.b32.cont [11/16] (narrow) %v3553_v36, 16  ;;  %v3627_v36 = vld [vmem:[%s4250_s17 + $0x720] sm:$0xff] }
 0x1f2   : > { %833 = vxpose.xlu1.b32.cont [12/16] (narrow) %v3570_v38, 16  ;;  %864 = vxpose.xlu2.b32.cont [11/16] (narrow) %v3585_v6, 16  ;;  %v3639_v38 = vld [vmem:[%s4250_s17 + $0x780] sm:$0xff]  ;;  %v3666_v6 = vld [vmem:[%s4250_s17 + $0x858] sm:$0xff] }
 0x1f3   : > { %768 = vxpose.xlu0.b32.cont [12/16] (narrow) %v3554_v39, 16  ;;  %v3628_v39 = vld [vmem:[%s4250_s17 + $0x728] sm:$0xff] }
 0x1fa   : > { %834 = vxpose.xlu1.b32.cont [13/16] (narrow) %v3571_v41, 16  ;;  %865 = vxpose.xlu2.b32.cont [12/16] (narrow) %v3586_v9, 16  ;;  %v3640_v41 = vld [vmem:[%s4250_s17 + $0x788] sm:$0xff]  ;;  %v3667_v9 = vld [vmem:[%s4250_s17 + $0x860] sm:$0xff] }
 0x1fb   : > { %769 = vxpose.xlu0.b32.cont [13/16] (narrow) %v3555_v42, 16  ;;  %v3629_v42 = vld [vmem:[%s4250_s17 + $0x730] sm:$0xff] }
 0x202   : > { %835 = vxpose.xlu1.b32.cont [14/16] (narrow) %v3572_v44, 16  ;;  %866 = vxpose.xlu2.b32.cont [13/16] (narrow) %v3587_v12, 16  ;;  %v3641_v44 = vld [vmem:[%s4250_s17 + $0x790] sm:$0xff]  ;;  %v3668_v12 = vld [vmem:[%s4250_s17 + $0x868] sm:$0xff] }
 0x203   : > { %770 = vxpose.xlu0.b32.cont [14/16] (narrow) %v3556_v45, 16  ;;  %v3630_v45 = vld [vmem:[%s4250_s17 + $0x738] sm:$0xff] }
 0x20a   : > { %836 = vxpose.xlu1.b32.cont [15/16] (narrow) %v3573_v47, 16  ;;  %867 = vxpose.xlu2.b32.cont [14/16] (narrow) %v3588_v15, 16  ;;  %v3642_v47 = vld [vmem:[%s4250_s17 + $0x798] sm:$0xff]  ;;  %v3669_v15 = vld [vmem:[%s4250_s17 + $0x870] sm:$0xff] }
 0x20b   : > { %771 = vxpose.xlu0.b32.cont [15/16] (narrow) %v3557_v48, 16  ;;  %v3631_v48 = vld [vmem:[%s4250_s17 + $0x740] sm:$0xff] }
 0x212   : > { %837 = vxpose.xlu1.b32.end [16/16] (narrow) %v3574_v50, 16  ;;  %868 = vxpose.xlu2.b32.cont [15/16] (narrow) %v3589_v18, 16  ;;  %v3643_v50 = vld [vmem:[%s4250_s17 + $0x7a0] sm:$0xff]  ;;  %v3670_v18 = vld [vmem:[%s4250_s17 + $0x878] sm:$0xff] }
 0x213   : > { %772 = vxpose.xlu0.b32.end [16/16] (narrow) %v3558_v51, 16  ;;  %v3632_v51 = vld [vmem:[%s4250_s17 + $0x748] sm:$0xff] }
 0x21a   : > { %951 = vxpose.xlu1.b32.start [1/16] (narrow) %v3607_v53, 16  ;;  %869 = vxpose.xlu2.b32.end [16/16] (narrow) %v3590_v21, 16  ;;  %v3644_v53 = vld [vmem:[%s4250_s17 + $0x7a8] sm:$0xff]  ;;  %v3703_v21 = vld [vmem:[%s4250_s17 + $0x980] sm:$0xff] }
 0x21b   : > { %919 = vxpose.xlu0.b32.start [1/16] (narrow) %v3591_v54, 16  ;;  %v3633_v54 = vld [vmem:[%s4250_s17 + $0x750] sm:$0xff] }
 0x222   : > { %952 = vxpose.xlu1.b32.cont [2/16] (narrow) %v3608_v56, 16  ;;  %1016 = vxpose.xlu2.b32.start [1/16] (narrow) %v3623_v24, 16  ;;  %v3645_v56 = vld [vmem:[%s4250_s17 + $0x7b0] sm:$0xff]  ;;  %v3704_v24 = vld [vmem:[%s4250_s17 + $0x988] sm:$0xff] }
 0x223   : > { %920 = vxpose.xlu0.b32.cont [2/16] (narrow) %v3592_v57, 16  ;;  %v3634_v57 = vld [vmem:[%s4250_s17 + $0x758] sm:$0xff] }
 0x22a   : > { %953 = vxpose.xlu1.b32.cont [3/16] (narrow) %v3609_v59, 16  ;;  %1017 = vxpose.xlu2.b32.cont [2/16] (narrow) %v3624_v27, 16  ;;  %v3646_v59 = vld [vmem:[%s4250_s17 + $0x7b8] sm:$0xff]  ;;  %v3705_v27 = vld [vmem:[%s4250_s17 + $0x990] sm:$0xff] }
 0x22b   : > { %921 = vxpose.xlu0.b32.cont [3/16] (narrow) %v3593_v60, 16  ;;  %v3635_v60 = vld [vmem:[%s4250_s17 + $0x760] sm:$0xff] }
 0x232   : > { %954 = vxpose.xlu1.b32.cont [4/16] (narrow) %v3610_v62, 16  ;;  %1018 = vxpose.xlu2.b32.cont [3/16] (narrow) %v3625_v30, 16  ;;  %v3647_v62 = vld [vmem:[%s4250_s17 + $0x7c0] sm:$0xff]  ;;  %v3706_v30 = vld [vmem:[%s4250_s17 + $0x998] sm:$0xff] }
 0x233   : > { %922 = vxpose.xlu0.b32.cont [4/16] (narrow) %v3594_v63, 16  ;;  %v3636_v63 = vld [vmem:[%s4250_s17 + $0x768] sm:$0xff] }
 0x23a   : > { %955 = vxpose.xlu1.b32.cont [5/16] (narrow) %v3611_v1, 16  ;;  %1019 = vxpose.xlu2.b32.cont [4/16] (narrow) %v3626_v33, 16  ;;  %v3648_v1 = vld [vmem:[%s4250_s17 + $0x7c8] sm:$0xff]  ;;  %v3707_v33 = vld [vmem:[%s4250_s17 + $0x9a0] sm:$0xff] }
 0x23b   : > { %923 = vxpose.xlu0.b32.cont [5/16] (narrow) %v3595_v2, 16  ;;  %v3637_v2 = vld [vmem:[%s4250_s17 + $0x770] sm:$0xff] }
 0x242   : > { %956 = vxpose.xlu1.b32.cont [6/16] (narrow) %v3612_v4, 16  ;;  %1020 = vxpose.xlu2.b32.cont [5/16] (narrow) %v3627_v36, 16  ;;  %v3649_v4 = vld [vmem:[%s4250_s17 + $0x7d0] sm:$0xff]  ;;  %v3708_v36 = vld [vmem:[%s4250_s17 + $0x9a8] sm:$0xff] }
 0x243   : > { %924 = vxpose.xlu0.b32.cont [6/16] (narrow) %v3596_v5, 16  ;;  %v3638_v5 = vld [vmem:[%s4250_s17 + $0x778] sm:$0xff] }
 0x24a   : > { %957 = vxpose.xlu1.b32.cont [7/16] (narrow) %v3613_v7, 16  ;;  %1021 = vxpose.xlu2.b32.cont [6/16] (narrow) %v3628_v39, 16  ;;  %v3650_v7 = vld [vmem:[%s4250_s17 + $0x7d8] sm:$0xff]  ;;  %v3709_v39 = vld [vmem:[%s4250_s17 + $0x9b0] sm:$0xff] }
 0x24b   : > { %925 = vxpose.xlu0.b32.cont [7/16] (narrow) %v3597_v8, 16  ;;  %v3671_v8 = vld [vmem:[%s4250_s17 + $0x880] sm:$0xff] }
 0x252   : > { %958 = vxpose.xlu1.b32.cont [8/16] (narrow) %v3614_v10, 16  ;;  %1022 = vxpose.xlu2.b32.cont [7/16] (narrow) %v3629_v42, 16  ;;  %v3651_v10 = vld [vmem:[%s4250_s17 + $0x7e0] sm:$0xff]  ;;  %v3710_v42 = vld [vmem:[%s4250_s17 + $0x9b8] sm:$0xff] }
 0x253   : > { %926 = vxpose.xlu0.b32.cont [8/16] (narrow) %v3598_v11, 16  ;;  %v3672_v11 = vld [vmem:[%s4250_s17 + $0x888] sm:$0xff] }
 0x25a   : > { %959 = vxpose.xlu1.b32.cont [9/16] (narrow) %v3615_v13, 16  ;;  %1023 = vxpose.xlu2.b32.cont [8/16] (narrow) %v3630_v45, 16  ;;  %v3652_v13 = vld [vmem:[%s4250_s17 + $0x7e8] sm:$0xff]  ;;  %v3711_v45 = vld [vmem:[%s4250_s17 + $0x9c0] sm:$0xff] }
 0x25b   : > { %927 = vxpose.xlu0.b32.cont [9/16] (narrow) %v3599_v14, 16  ;;  %v3673_v14 = vld [vmem:[%s4250_s17 + $0x890] sm:$0xff] }
 0x262   : > { %960 = vxpose.xlu1.b32.cont [10/16] (narrow) %v3616_v16, 16  ;;  %1024 = vxpose.xlu2.b32.cont [9/16] (narrow) %v3631_v48, 16  ;;  %v3653_v16 = vld [vmem:[%s4250_s17 + $0x7f0] sm:$0xff]  ;;  %v3712_v48 = vld [vmem:[%s4250_s17 + $0x9c8] sm:$0xff] }
 0x263   : > { %928 = vxpose.xlu0.b32.cont [10/16] (narrow) %v3600_v17, 16  ;;  %v3674_v17 = vld [vmem:[%s4250_s17 + $0x898] sm:$0xff] }
 0x26a   : > { %961 = vxpose.xlu1.b32.cont [11/16] (narrow) %v3617_v19, 16  ;;  %1025 = vxpose.xlu2.b32.cont [10/16] (narrow) %v3632_v51, 16  ;;  %v3654_v19 = vld [vmem:[%s4250_s17 + $0x7f8] sm:$0xff]  ;;  %v3713_v51 = vld [vmem:[%s4250_s17 + $0x9d0] sm:$0xff] }
 0x26b   : > { %929 = vxpose.xlu0.b32.cont [11/16] (narrow) %v3601_v20, 16  ;;  %v3675_v20 = vld [vmem:[%s4250_s17 + $0x8a0] sm:$0xff] }
 0x272   : > { %962 = vxpose.xlu1.b32.cont [12/16] (narrow) %v3618_v22, 16  ;;  %1026 = vxpose.xlu2.b32.cont [11/16] (narrow) %v3633_v54, 16  ;;  %v3687_v22 = vld [vmem:[%s4250_s17 + $0x900] sm:$0xff]  ;;  %v3714_v54 = vld [vmem:[%s4250_s17 + $0x9d8] sm:$0xff] }
 0x273   : > { %930 = vxpose.xlu0.b32.cont [12/16] (narrow) %v3602_v23, 16  ;;  %v3676_v23 = vld [vmem:[%s4250_s17 + $0x8a8] sm:$0xff] }
 0x27a   : > { %963 = vxpose.xlu1.b32.cont [13/16] (narrow) %v3619_v25, 16  ;;  %1027 = vxpose.xlu2.b32.cont [12/16] (narrow) %v3634_v57, 16  ;;  %v3688_v25 = vld [vmem:[%s4250_s17 + $0x908] sm:$0xff]  ;;  %v3715_v57 = vld [vmem:[%s4250_s17 + $0x9e0] sm:$0xff] }
 0x27b   : > { %931 = vxpose.xlu0.b32.cont [13/16] (narrow) %v3603_v26, 16  ;;  %v3677_v26 = vld [vmem:[%s4250_s17 + $0x8b0] sm:$0xff] }
 0x282   : > { %964 = vxpose.xlu1.b32.cont [14/16] (narrow) %v3620_v28, 16  ;;  %1028 = vxpose.xlu2.b32.cont [13/16] (narrow) %v3635_v60, 16  ;;  %v3689_v28 = vld [vmem:[%s4250_s17 + $0x910] sm:$0xff]  ;;  %v3716_v60 = vld [vmem:[%s4250_s17 + $0x9e8] sm:$0xff] }
 0x283   : > { %932 = vxpose.xlu0.b32.cont [14/16] (narrow) %v3604_v29, 16  ;;  %v3678_v29 = vld [vmem:[%s4250_s17 + $0x8b8] sm:$0xff] }
 0x28a   : > { %965 = vxpose.xlu1.b32.cont [15/16] (narrow) %v3621_v31, 16  ;;  %1029 = vxpose.xlu2.b32.cont [14/16] (narrow) %v3636_v63, 16  ;;  %v3690_v31 = vld [vmem:[%s4250_s17 + $0x918] sm:$0xff]  ;;  %v3717_v63 = vld [vmem:[%s4250_s17 + $0x9f0] sm:$0xff] }
 0x28b   : > { %933 = vxpose.xlu0.b32.cont [15/16] (narrow) %v3605_v32, 16  ;;  %v3679_v32 = vld [vmem:[%s4250_s17 + $0x8c0] sm:$0xff] }
 0x292   : > { %966 = vxpose.xlu1.b32.end [16/16] (narrow) %v3622_v34, 16  ;;  %1030 = vxpose.xlu2.b32.cont [15/16] (narrow) %v3637_v2, 16  ;;  %v3691_v34 = vld [vmem:[%s4250_s17 + $0x920] sm:$0xff]  ;;  %v3718_v2 = vld [vmem:[%s4250_s17 + $0x9f8] sm:$0xff] }
 0x293   : > { %934 = vxpose.xlu0.b32.end [16/16] (narrow) %v3606_v35, 16  ;;  %v3680_v35 = vld [vmem:[%s4250_s17 + $0x8c8] sm:$0xff] }
 0x29a   : > { %1113 = vxpose.xlu1.b32.start [1/16] (narrow) %v3655_v37, 16  ;;  %1031 = vxpose.xlu2.b32.end [16/16] (narrow) %v3638_v5, 16  ;;  %v3692_v37 = vld [vmem:[%s4250_s17 + $0x928] sm:$0xff]  ;;  %v3751_v5 = vld [vmem:[%s4250_s17 + $0xb00] sm:$0xff] }
 0x29b   : > { %1048 = vxpose.xlu0.b32.start [1/16] (narrow) %v3639_v38, 16  ;;  %v3681_v38 = vld [vmem:[%s4250_s17 + $0x8d0] sm:$0xff] }
 0x2a2   : > { %1114 = vxpose.xlu1.b32.cont [2/16] (narrow) %v3656_v40, 16  ;;  %1145 = vxpose.xlu2.b32.start [1/16] (narrow) %v3671_v8, 16  ;;  %v3693_v40 = vld [vmem:[%s4250_s17 + $0x930] sm:$0xff]  ;;  %v3752_v8 = vld [vmem:[%s4250_s17 + $0xb08] sm:$0xff] }
 0x2a3   : > { %1049 = vxpose.xlu0.b32.cont [2/16] (narrow) %v3640_v41, 16  ;;  %v3682_v41 = vld [vmem:[%s4250_s17 + $0x8d8] sm:$0xff] }
 0x2aa   : > { %1115 = vxpose.xlu1.b32.cont [3/16] (narrow) %v3657_v43, 16  ;;  %1146 = vxpose.xlu2.b32.cont [2/16] (narrow) %v3672_v11, 16  ;;  %v3694_v43 = vld [vmem:[%s4250_s17 + $0x938] sm:$0xff]  ;;  %v3753_v11 = vld [vmem:[%s4250_s17 + $0xb10] sm:$0xff] }
 0x2ab   : > { %1050 = vxpose.xlu0.b32.cont [3/16] (narrow) %v3641_v44, 16  ;;  %v3683_v44 = vld [vmem:[%s4250_s17 + $0x8e0] sm:$0xff] }
 0x2b2   : > { %1116 = vxpose.xlu1.b32.cont [4/16] (narrow) %v3658_v46, 16  ;;  %1147 = vxpose.xlu2.b32.cont [3/16] (narrow) %v3673_v14, 16  ;;  %v3695_v46 = vld [vmem:[%s4250_s17 + $0x940] sm:$0xff]  ;;  %v3754_v14 = vld [vmem:[%s4250_s17 + $0xb18] sm:$0xff] }
 0x2b3   : > { %1051 = vxpose.xlu0.b32.cont [4/16] (narrow) %v3642_v47, 16  ;;  %v3684_v47 = vld [vmem:[%s4250_s17 + $0x8e8] sm:$0xff] }
 0x2ba   : > { %1117 = vxpose.xlu1.b32.cont [5/16] (narrow) %v3659_v49, 16  ;;  %1148 = vxpose.xlu2.b32.cont [4/16] (narrow) %v3674_v17, 16  ;;  %v3696_v49 = vld [vmem:[%s4250_s17 + $0x948] sm:$0xff]  ;;  %v3755_v17 = vld [vmem:[%s4250_s17 + $0xb20] sm:$0xff] }
 0x2bb   : > { %1052 = vxpose.xlu0.b32.cont [5/16] (narrow) %v3643_v50, 16  ;;  %v3685_v50 = vld [vmem:[%s4250_s17 + $0x8f0] sm:$0xff] }
 0x2c2   : > { %1118 = vxpose.xlu1.b32.cont [6/16] (narrow) %v3660_v52, 16  ;;  %1149 = vxpose.xlu2.b32.cont [5/16] (narrow) %v3675_v20, 16  ;;  %v3697_v52 = vld [vmem:[%s4250_s17 + $0x950] sm:$0xff]  ;;  %v3756_v20 = vld [vmem:[%s4250_s17 + $0xb28] sm:$0xff] }
 0x2c3   : > { %1053 = vxpose.xlu0.b32.cont [6/16] (narrow) %v3644_v53, 16  ;;  %v3686_v53 = vld [vmem:[%s4250_s17 + $0x8f8] sm:$0xff] }
 0x2ca   : > { %1119 = vxpose.xlu1.b32.cont [7/16] (narrow) %v3661_v55, 16  ;;  %1150 = vxpose.xlu2.b32.cont [6/16] (narrow) %v3676_v23, 16  ;;  %v3698_v55 = vld [vmem:[%s4250_s17 + $0x958] sm:$0xff]  ;;  %v3757_v23 = vld [vmem:[%s4250_s17 + $0xb30] sm:$0xff] }
 0x2cb   : > { %1054 = vxpose.xlu0.b32.cont [7/16] (narrow) %v3645_v56, 16  ;;  %v3719_v56 = vld [vmem:[%s4250_s17 + $0xa00] sm:$0xff] }
 0x2d2   : > { %1120 = vxpose.xlu1.b32.cont [8/16] (narrow) %v3662_v58, 16  ;;  %1151 = vxpose.xlu2.b32.cont [7/16] (narrow) %v3677_v26, 16  ;;  %v3699_v58 = vld [vmem:[%s4250_s17 + $0x960] sm:$0xff]  ;;  %v3758_v26 = vld [vmem:[%s4250_s17 + $0xb38] sm:$0xff] }
 0x2d3   : > { %1055 = vxpose.xlu0.b32.cont [8/16] (narrow) %v3646_v59, 16  ;;  %v3720_v59 = vld [vmem:[%s4250_s17 + $0xa08] sm:$0xff] }
 0x2da   : > { %1121 = vxpose.xlu1.b32.cont [9/16] (narrow) %v3663_v61, 16  ;;  %1152 = vxpose.xlu2.b32.cont [8/16] (narrow) %v3678_v29, 16  ;;  %v3700_v61 = vld [vmem:[%s4250_s17 + $0x968] sm:$0xff]  ;;  %v3759_v29 = vld [vmem:[%s4250_s17 + $0xb40] sm:$0xff] }
 0x2db   : > { %1056 = vxpose.xlu0.b32.cont [9/16] (narrow) %v3647_v62, 16  ;;  %v3721_v62 = vld [vmem:[%s4250_s17 + $0xa10] sm:$0xff] }
 0x2e2   : > { %1122 = vxpose.xlu1.b32.cont [10/16] (narrow) %v3664_v0, 16  ;;  %1153 = vxpose.xlu2.b32.cont [9/16] (narrow) %v3679_v32, 16  ;;  %v3701_v0 = vld [vmem:[%s4250_s17 + $0x970] sm:$0xff]  ;;  %v3760_v32 = vld [vmem:[%s4250_s17 + $0xb48] sm:$0xff] }
 0x2e3   : > { %1057 = vxpose.xlu0.b32.cont [10/16] (narrow) %v3648_v1, 16  ;;  %v3722_v1 = vld [vmem:[%s4250_s17 + $0xa18] sm:$0xff] }
 0x2ea   : > { %1123 = vxpose.xlu1.b32.cont [11/16] (narrow) %v3665_v3, 16  ;;  %1154 = vxpose.xlu2.b32.cont [10/16] (narrow) %v3680_v35, 16  ;;  %v3702_v3 = vld [vmem:[%s4250_s17 + $0x978] sm:$0xff]  ;;  %v3761_v35 = vld [vmem:[%s4250_s17 + $0xb50] sm:$0xff] }
 0x2eb   : > { %1058 = vxpose.xlu0.b32.cont [11/16] (narrow) %v3649_v4, 16  ;;  %v3723_v4 = vld [vmem:[%s4250_s17 + $0xa20] sm:$0xff] }
 0x2f2   : > { %1124 = vxpose.xlu1.b32.cont [12/16] (narrow) %v3666_v6, 16  ;;  %1155 = vxpose.xlu2.b32.cont [11/16] (narrow) %v3681_v38, 16  ;;  %v3735_v6 = vld [vmem:[%s4250_s17 + $0xa80] sm:$0xff]  ;;  %v3762_v38 = vld [vmem:[%s4250_s17 + $0xb58] sm:$0xff] }
 0x2f3   : > { %1059 = vxpose.xlu0.b32.cont [12/16] (narrow) %v3650_v7, 16  ;;  %v3724_v7 = vld [vmem:[%s4250_s17 + $0xa28] sm:$0xff] }
 0x2fa   : > { %1125 = vxpose.xlu1.b32.cont [13/16] (narrow) %v3667_v9, 16  ;;  %1156 = vxpose.xlu2.b32.cont [12/16] (narrow) %v3682_v41, 16  ;;  %v3736_v9 = vld [vmem:[%s4250_s17 + $0xa88] sm:$0xff]  ;;  %v3763_v41 = vld [vmem:[%s4250_s17 + $0xb60] sm:$0xff] }
 0x2fb   : > { %1060 = vxpose.xlu0.b32.cont [13/16] (narrow) %v3651_v10, 16  ;;  %v3725_v10 = vld [vmem:[%s4250_s17 + $0xa30] sm:$0xff] }
 0x302   : > { %1126 = vxpose.xlu1.b32.cont [14/16] (narrow) %v3668_v12, 16  ;;  %1157 = vxpose.xlu2.b32.cont [13/16] (narrow) %v3683_v44, 16  ;;  %v3737_v12 = vld [vmem:[%s4250_s17 + $0xa90] sm:$0xff]  ;;  %v3764_v44 = vld [vmem:[%s4250_s17 + $0xb68] sm:$0xff] }
 0x303   : > { %1061 = vxpose.xlu0.b32.cont [14/16] (narrow) %v3652_v13, 16  ;;  %v3726_v13 = vld [vmem:[%s4250_s17 + $0xa38] sm:$0xff] }
 0x30a   : > { %1127 = vxpose.xlu1.b32.cont [15/16] (narrow) %v3669_v15, 16  ;;  %1158 = vxpose.xlu2.b32.cont [14/16] (narrow) %v3684_v47, 16  ;;  %v3738_v15 = vld [vmem:[%s4250_s17 + $0xa98] sm:$0xff]  ;;  %v3765_v47 = vld [vmem:[%s4250_s17 + $0xb70] sm:$0xff] }
 0x30b   : > { %1062 = vxpose.xlu0.b32.cont [15/16] (narrow) %v3653_v16, 16  ;;  %v3727_v16 = vld [vmem:[%s4250_s17 + $0xa40] sm:$0xff] }
 0x312   : > { %1128 = vxpose.xlu1.b32.end [16/16] (narrow) %v3670_v18, 16  ;;  %1159 = vxpose.xlu2.b32.cont [15/16] (narrow) %v3685_v50, 16  ;;  %v3739_v18 = vld [vmem:[%s4250_s17 + $0xaa0] sm:$0xff]  ;;  %v3766_v50 = vld [vmem:[%s4250_s17 + $0xb78] sm:$0xff] }
 0x313   : > { %1063 = vxpose.xlu0.b32.end [16/16] (narrow) %v3654_v19, 16  ;;  %v3728_v19 = vld [vmem:[%s4250_s17 + $0xa48] sm:$0xff] }
 0x31a   : > { %1242 = vxpose.xlu1.b32.start [1/16] (narrow) %v3703_v21, 16  ;;  %1160 = vxpose.xlu2.b32.end [16/16] (narrow) %v3686_v53, 16  ;;  %v3740_v21 = vld [vmem:[%s4250_s17 + $0xaa8] sm:$0xff]  ;;  %v3799_v53 = vld [vmem:[%s4250_s17 + $0xc80] sm:$0xff] }
 0x31b   : > { %1210 = vxpose.xlu0.b32.start [1/16] (narrow) %v3687_v22, 16  ;;  %v3729_v22 = vld [vmem:[%s4250_s17 + $0xa50] sm:$0xff] }
 0x322   : > { %1243 = vxpose.xlu1.b32.cont [2/16] (narrow) %v3704_v24, 16  ;;  %1307 = vxpose.xlu2.b32.start [1/16] (narrow) %v3719_v56, 16  ;;  %v3741_v24 = vld [vmem:[%s4250_s17 + $0xab0] sm:$0xff]  ;;  %v3800_v56 = vld [vmem:[%s4250_s17 + $0xc88] sm:$0xff] }
 0x323   : > { %1211 = vxpose.xlu0.b32.cont [2/16] (narrow) %v3688_v25, 16  ;;  %v3730_v25 = vld [vmem:[%s4250_s17 + $0xa58] sm:$0xff] }
 0x32a   : > { %1244 = vxpose.xlu1.b32.cont [3/16] (narrow) %v3705_v27, 16  ;;  %1308 = vxpose.xlu2.b32.cont [2/16] (narrow) %v3720_v59, 16  ;;  %v3742_v27 = vld [vmem:[%s4250_s17 + $0xab8] sm:$0xff]  ;;  %v3801_v59 = vld [vmem:[%s4250_s17 + $0xc90] sm:$0xff] }
 0x32b   : > { %1212 = vxpose.xlu0.b32.cont [3/16] (narrow) %v3689_v28, 16  ;;  %v3731_v28 = vld [vmem:[%s4250_s17 + $0xa60] sm:$0xff] }
 0x332   : > { %1245 = vxpose.xlu1.b32.cont [4/16] (narrow) %v3706_v30, 16  ;;  %1309 = vxpose.xlu2.b32.cont [3/16] (narrow) %v3721_v62, 16  ;;  %v3743_v30 = vld [vmem:[%s4250_s17 + $0xac0] sm:$0xff]  ;;  %v3802_v62 = vld [vmem:[%s4250_s17 + $0xc98] sm:$0xff] }
 0x333   : > { %1213 = vxpose.xlu0.b32.cont [4/16] (narrow) %v3690_v31, 16  ;;  %v3732_v31 = vld [vmem:[%s4250_s17 + $0xa68] sm:$0xff] }
 0x33a   : > { %1246 = vxpose.xlu1.b32.cont [5/16] (narrow) %v3707_v33, 16  ;;  %1310 = vxpose.xlu2.b32.cont [4/16] (narrow) %v3722_v1, 16  ;;  %v3744_v33 = vld [vmem:[%s4250_s17 + $0xac8] sm:$0xff]  ;;  %v3803_v1 = vld [vmem:[%s4250_s17 + $0xca0] sm:$0xff] }
 0x33b   : > { %1214 = vxpose.xlu0.b32.cont [5/16] (narrow) %v3691_v34, 16  ;;  %v3733_v34 = vld [vmem:[%s4250_s17 + $0xa70] sm:$0xff] }
 0x342   : > { %1247 = vxpose.xlu1.b32.cont [6/16] (narrow) %v3708_v36, 16  ;;  %1311 = vxpose.xlu2.b32.cont [5/16] (narrow) %v3723_v4, 16  ;;  %v3745_v36 = vld [vmem:[%s4250_s17 + $0xad0] sm:$0xff]  ;;  %v3804_v4 = vld [vmem:[%s4250_s17 + $0xca8] sm:$0xff] }
 0x343   : > { %1215 = vxpose.xlu0.b32.cont [6/16] (narrow) %v3692_v37, 16  ;;  %v3734_v37 = vld [vmem:[%s4250_s17 + $0xa78] sm:$0xff] }
 0x34a   : > { %1248 = vxpose.xlu1.b32.cont [7/16] (narrow) %v3709_v39, 16  ;;  %1312 = vxpose.xlu2.b32.cont [6/16] (narrow) %v3724_v7, 16  ;;  %v3746_v39 = vld [vmem:[%s4250_s17 + $0xad8] sm:$0xff]  ;;  %v3805_v7 = vld [vmem:[%s4250_s17 + $0xcb0] sm:$0xff] }
 0x34b   : > { %1216 = vxpose.xlu0.b32.cont [7/16] (narrow) %v3693_v40, 16  ;;  %v3767_v40 = vld [vmem:[%s4250_s17 + $0xb80] sm:$0xff] }
 0x352   : > { %1249 = vxpose.xlu1.b32.cont [8/16] (narrow) %v3710_v42, 16  ;;  %1313 = vxpose.xlu2.b32.cont [7/16] (narrow) %v3725_v10, 16  ;;  %v3747_v42 = vld [vmem:[%s4250_s17 + $0xae0] sm:$0xff]  ;;  %v3806_v10 = vld [vmem:[%s4250_s17 + $0xcb8] sm:$0xff] }
 0x353   : > { %1217 = vxpose.xlu0.b32.cont [8/16] (narrow) %v3694_v43, 16  ;;  %v3768_v43 = vld [vmem:[%s4250_s17 + $0xb88] sm:$0xff] }
 0x35a   : > { %1250 = vxpose.xlu1.b32.cont [9/16] (narrow) %v3711_v45, 16  ;;  %1314 = vxpose.xlu2.b32.cont [8/16] (narrow) %v3726_v13, 16  ;;  %v3748_v45 = vld [vmem:[%s4250_s17 + $0xae8] sm:$0xff]  ;;  %v3807_v13 = vld [vmem:[%s4250_s17 + $0xcc0] sm:$0xff] }
 0x35b   : > { %1218 = vxpose.xlu0.b32.cont [9/16] (narrow) %v3695_v46, 16  ;;  %v3769_v46 = vld [vmem:[%s4250_s17 + $0xb90] sm:$0xff] }
 0x362   : > { %1251 = vxpose.xlu1.b32.cont [10/16] (narrow) %v3712_v48, 16  ;;  %1315 = vxpose.xlu2.b32.cont [9/16] (narrow) %v3727_v16, 16  ;;  %v3749_v48 = vld [vmem:[%s4250_s17 + $0xaf0] sm:$0xff]  ;;  %v3808_v16 = vld [vmem:[%s4250_s17 + $0xcc8] sm:$0xff] }
 0x363   : > { %1219 = vxpose.xlu0.b32.cont [10/16] (narrow) %v3696_v49, 16  ;;  %v3770_v49 = vld [vmem:[%s4250_s17 + $0xb98] sm:$0xff] }
 0x36a   : > { %1252 = vxpose.xlu1.b32.cont [11/16] (narrow) %v3713_v51, 16  ;;  %1316 = vxpose.xlu2.b32.cont [10/16] (narrow) %v3728_v19, 16  ;;  %v3750_v51 = vld [vmem:[%s4250_s17 + $0xaf8] sm:$0xff]  ;;  %v3809_v19 = vld [vmem:[%s4250_s17 + $0xcd0] sm:$0xff] }
 0x36b   : > { %1220 = vxpose.xlu0.b32.cont [11/16] (narrow) %v3697_v52, 16  ;;  %v3771_v52 = vld [vmem:[%s4250_s17 + $0xba0] sm:$0xff] }
 0x372   : > { %1253 = vxpose.xlu1.b32.cont [12/16] (narrow) %v3714_v54, 16  ;;  %1317 = vxpose.xlu2.b32.cont [11/16] (narrow) %v3729_v22, 16  ;;  %v3783_v54 = vld [vmem:[%s4250_s17 + $0xc00] sm:$0xff]  ;;  %v3810_v22 = vld [vmem:[%s4250_s17 + $0xcd8] sm:$0xff] }
 0x373   : > { %1221 = vxpose.xlu0.b32.cont [12/16] (narrow) %v3698_v55, 16  ;;  %v3772_v55 = vld [vmem:[%s4250_s17 + $0xba8] sm:$0xff] }
 0x37a   : > { %1254 = vxpose.xlu1.b32.cont [13/16] (narrow) %v3715_v57, 16  ;;  %1318 = vxpose.xlu2.b32.cont [12/16] (narrow) %v3730_v25, 16  ;;  %v3784_v57 = vld [vmem:[%s4250_s17 + $0xc08] sm:$0xff]  ;;  %v3811_v25 = vld [vmem:[%s4250_s17 + $0xce0] sm:$0xff] }
 0x37b   : > { %1222 = vxpose.xlu0.b32.cont [13/16] (narrow) %v3699_v58, 16  ;;  %v3773_v58 = vld [vmem:[%s4250_s17 + $0xbb0] sm:$0xff] }
 0x382   : > { %1255 = vxpose.xlu1.b32.cont [14/16] (narrow) %v3716_v60, 16  ;;  %1319 = vxpose.xlu2.b32.cont [13/16] (narrow) %v3731_v28, 16  ;;  %v3785_v60 = vld [vmem:[%s4250_s17 + $0xc10] sm:$0xff]  ;;  %v3812_v28 = vld [vmem:[%s4250_s17 + $0xce8] sm:$0xff] }
 0x383   : > { %1223 = vxpose.xlu0.b32.cont [14/16] (narrow) %v3700_v61, 16  ;;  %v3774_v61 = vld [vmem:[%s4250_s17 + $0xbb8] sm:$0xff] }
 0x38a   : > { %1256 = vxpose.xlu1.b32.cont [15/16] (narrow) %v3717_v63, 16  ;;  %1320 = vxpose.xlu2.b32.cont [14/16] (narrow) %v3732_v31, 16  ;;  %v3786_v63 = vld [vmem:[%s4250_s17 + $0xc18] sm:$0xff]  ;;  %v3813_v31 = vld [vmem:[%s4250_s17 + $0xcf0] sm:$0xff] }
 0x38b   : > { %1224 = vxpose.xlu0.b32.cont [15/16] (narrow) %v3701_v0, 16  ;;  %v3775_v0 = vld [vmem:[%s4250_s17 + $0xbc0] sm:$0xff] }
 0x392   : > { %1257 = vxpose.xlu1.b32.end [16/16] (narrow) %v3718_v2, 16  ;;  %1321 = vxpose.xlu2.b32.cont [15/16] (narrow) %v3733_v34, 16  ;;  %v3787_v2 = vld [vmem:[%s4250_s17 + $0xc20] sm:$0xff]  ;;  %v1871_v34 = vld [vmem:[%s6075_s2 + $0x78] sm:$0xff] }
 0x393   : > { %1225 = vxpose.xlu0.b32.end [16/16] (narrow) %v3702_v3, 16  ;;  %v3776_v3 = vld [vmem:[%s4250_s17 + $0xbc8] sm:$0xff]  ;;  %1892 = vmatpush.msra.mxu0 %v1871_v34 }
 0x394   : > { %3920 = vmatpush.msra.mxu3 %v1871_v34  ;;  %v3826_v34 = vld [vmem:[%s4250_s17 + $0xd58] sm:$0xff] }
 0x39a   : > { %1404 = vxpose.xlu1.b32.start [1/16] (narrow) %v3751_v5, 16  ;;  %1322 = vxpose.xlu2.b32.end [16/16] (narrow) %v3734_v37, 16  ;;  %v3788_v5 = vld [vmem:[%s4250_s17 + $0xc28] sm:$0xff]  ;;  %v1886_v37 = vld [vmem:[%s6075_s2 + $0xf0] sm:$0xff] }
 0x39b   : > { %1339 = vxpose.xlu0.b32.start [1/16] (narrow) %v3735_v6, 16  ;;  %v3777_v6 = vld [vmem:[%s4250_s17 + $0xbd0] sm:$0xff] }
 0x3a2   : > { %1405 = vxpose.xlu1.b32.cont [2/16] (narrow) %v3752_v8, 16  ;;  %1436 = vxpose.xlu2.b32.start [1/16] (narrow) %v3767_v40, 16  ;;  %v3789_v8 = vld [vmem:[%s4250_s17 + $0xc30] sm:$0xff]  ;;  %v3798_v40 = vld [vmem:[%s4250_s17 + $0xc78] sm:$0xff] }
 0x3a3   : > { %1340 = vxpose.xlu0.b32.cont [2/16] (narrow) %v3736_v9, 16  ;;  %v3778_v9 = vld [vmem:[%s4250_s17 + $0xbd8] sm:$0xff] }
 0x3aa   : > { %1406 = vxpose.xlu1.b32.cont [3/16] (narrow) %v3753_v11, 16  ;;  %1437 = vxpose.xlu2.b32.cont [2/16] (narrow) %v3768_v43, 16  ;;  %v3790_v11 = vld [vmem:[%s4250_s17 + $0xc38] sm:$0xff]  ;;  %v3819_v43 = vld [vmem:[%s4250_s17 + $0xd20] sm:$0xff] }
 0x3ab   : > { %1341 = vxpose.xlu0.b32.cont [3/16] (narrow) %v3737_v12, 16  ;;  %v3779_v12 = vld [vmem:[%s4250_s17 + $0xbe0] sm:$0xff] }
 0x3b2   : > { %1407 = vxpose.xlu1.b32.cont [4/16] (narrow) %v3754_v14, 16  ;;  %1438 = vxpose.xlu2.b32.cont [3/16] (narrow) %v3769_v46, 16  ;;  %v3791_v14 = vld [vmem:[%s4250_s17 + $0xc40] sm:$0xff]  ;;  %v1866_v46 = vld [vmem:[%s6075_s2 + $0x50] sm:$0xff] }
 0x3b3   : > { %1342 = vxpose.xlu0.b32.cont [4/16] (narrow) %v3738_v15, 16  ;;  %v3780_v15 = vld [vmem:[%s4250_s17 + $0xbe8] sm:$0xff] }
 0x3ba   : > { %1408 = vxpose.xlu1.b32.cont [5/16] (narrow) %v3755_v17, 16  ;;  %1439 = vxpose.xlu2.b32.cont [4/16] (narrow) %v3770_v49, 16  ;;  %v3792_v17 = vld [vmem:[%s4250_s17 + $0xc48] sm:$0xff]  ;;  %v1882_v49 = vld [vmem:[%s6075_s2 + $0xd0] sm:$0xff] }
 0x3bb   : > { %1343 = vxpose.xlu0.b32.cont [5/16] (narrow) %v3739_v18, 16  ;;  %v3781_v18 = vld [vmem:[%s4250_s17 + $0xbf0] sm:$0xff] }
 0x3c2   : > { %1409 = vxpose.xlu1.b32.cont [6/16] (narrow) %v3756_v20, 16  ;;  %1440 = vxpose.xlu2.b32.cont [5/16] (narrow) %v3771_v52, 16  ;;  %v3793_v20 = vld [vmem:[%s4250_s17 + $0xc50] sm:$0xff]  ;;  %v1864_v52 = vld [vmem:[%s6075_s2 + $0x40] sm:$0xff] }
 0x3c3   : > { %1344 = vxpose.xlu0.b32.cont [6/16] (narrow) %v3740_v21, 16  ;;  %v3782_v21 = vld [vmem:[%s4250_s17 + $0xbf8] sm:$0xff] }
 0x3ca   : > { %1410 = vxpose.xlu1.b32.cont [7/16] (narrow) %v3757_v23, 16  ;;  %1441 = vxpose.xlu2.b32.cont [6/16] (narrow) %v3772_v55, 16  ;;  %v3794_v23 = vld [vmem:[%s4250_s17 + $0xc58] sm:$0xff] }
 0x3cb   : > { %1345 = vxpose.xlu0.b32.cont [7/16] (narrow) %v3741_v24, 16  ;;  %v3815_v24 = vld [vmem:[%s4250_s17 + $0xd00] sm:$0xff]  ;;  %v1863_v55 = vld [vmem:[%s6075_s2 + $0x38] sm:$0xff] }
 0x3d2   : > { %1411 = vxpose.xlu1.b32.cont [8/16] (narrow) %v3758_v26, 16  ;;  %1442 = vxpose.xlu2.b32.cont [7/16] (narrow) %v3773_v58, 16  ;;  %v3795_v26 = vld [vmem:[%s4250_s17 + $0xc60] sm:$0xff]  ;;  %v1879_v58 = vld [vmem:[%s6075_s2 + $0xb8] sm:$0xff] }
 0x3d3   : > { %1346 = vxpose.xlu0.b32.cont [8/16] (narrow) %v3742_v27, 16  ;;  %v3816_v27 = vld [vmem:[%s4250_s17 + $0xd08] sm:$0xff] }
 0x3da   : > { %1412 = vxpose.xlu1.b32.cont [9/16] (narrow) %v3759_v29, 16  ;;  %1443 = vxpose.xlu2.b32.cont [8/16] (narrow) %v3774_v61, 16  ;;  %v3796_v29 = vld [vmem:[%s4250_s17 + $0xc68] sm:$0xff] }
 0x3db   : > { %1347 = vxpose.xlu0.b32.cont [9/16] (narrow) %v3743_v30, 16  ;;  %v3817_v30 = vld [vmem:[%s4250_s17 + $0xd10] sm:$0xff]  ;;  %v3848_v61 = vld [vmem:[%s4250_s17 + $0xe08] sm:$0xff] }
 0x3e2   : > { %1413 = vxpose.xlu1.b32.cont [10/16] (narrow) %v3760_v32, 16  ;;  %1444 = vxpose.xlu2.b32.cont [9/16] (narrow) %v3775_v0, 16  ;;  %v3797_v32 = vld [vmem:[%s4250_s17 + $0xc70] sm:$0xff]  ;;  %v1877_v0 = vld [vmem:[%s6075_s2 + $0xa8] sm:$0xff] }
 0x3e3   : > { %1348 = vxpose.xlu0.b32.cont [10/16] (narrow) %v3744_v33, 16  ;;  %v3818_v33 = vld [vmem:[%s4250_s17 + $0xd18] sm:$0xff] }
 0x3ea   : > { %1414 = vxpose.xlu1.b32.cont [11/16] (narrow) %v3761_v35, 16  ;;  %1445 = vxpose.xlu2.b32.cont [10/16] (narrow) %v3776_v3, 16  ;;  %v1870_v35 = vld [vmem:[%s6075_s2 + $0x70] sm:$0xff]  ;;  %v1876_v3 = vld [vmem:[%s6075_s2 + $0xa0] sm:$0xff] }
 0x3eb   : > { %1349 = vxpose.xlu0.b32.cont [11/16] (narrow) %v3745_v36, 16  ;;  %v1887_v36 = vld [vmem:[%s6075_s2 + $0xf8] sm:$0xff]  ;;  %1893 = vmatpush.msra.mxu0 %v1870_v35 }
 0x3ec   : > { %2005 = vmatpush.msra.mxu1 %v1887_v36  ;;  %3936 = vmatpush.msra.mxu2 %v1887_v36  ;;  %v3854_v36 = vld [vmem:[%s4250_s17 + $0xe38] sm:$0xff] }
 0x3ed   : > { %3921 = vmatpush.msra.mxu3 %v1870_v35 }
 0x3ee   : > { %2006 = vmatpush.msra.mxu1 %v1886_v37  ;;  %3937 = vmatpush.msra.mxu2 %v1886_v37  ;;  %v3838_v37 = vld [vmem:[%s4250_s17 + $0xdb8] sm:$0xff] }
 0x3f2   : > { %1415 = vxpose.xlu1.b32.cont [12/16] (narrow) %v3762_v38, 16  ;;  %1446 = vxpose.xlu2.b32.cont [11/16] (narrow) %v3777_v6, 16  ;;  %v1869_v38 = vld [vmem:[%s6075_s2 + $0x68] sm:$0xff] }
 0x3f3   : > { %1350 = vxpose.xlu0.b32.cont [12/16] (narrow) %v3746_v39, 16  ;;  %v3814_v39 = vld [vmem:[%s4250_s17 + $0xcf8] sm:$0xff]  ;;  %1894 = vmatpush.msra.mxu0 %v1869_v38  ;;  %v1857_v6 = vld [vmem:[%s6075_s2 + $0x8] sm:$0xff] }
 0x3f4   : > { %3922 = vmatpush.msra.mxu3 %v1869_v38 }
 0x3fa   : > { %1416 = vxpose.xlu1.b32.cont [13/16] (narrow) %v3763_v41, 16  ;;  %1447 = vxpose.xlu2.b32.cont [12/16] (narrow) %v3778_v9, 16  ;;  %v1868_v41 = vld [vmem:[%s6075_s2 + $0x60] sm:$0xff]  ;;  %v3833_v9 = vld [vmem:[%s4250_s17 + $0xd90] sm:$0xff] }
 0x3fb   : > { %1351 = vxpose.xlu0.b32.cont [13/16] (narrow) %v3747_v42, 16  ;;  %v1885_v42 = vld [vmem:[%s6075_s2 + $0xe8] sm:$0xff]  ;;  %1895 = vmatpush.msra.mxu0 %v1868_v41 }
 0x3fc   : > { %2007 = vmatpush.msra.mxu1 %v1885_v42  ;;  %3923 = vmatpush.msra.mxu3 %v1868_v41  ;;  %v3855_v41 = vld [vmem:[%s4250_s17 + $0xe40] sm:$0xff] }
 0x3fd   : > { %3938 = vmatpush.msra.mxu2 %v1885_v42  ;;  %v3839_v42 = vld [vmem:[%s4250_s17 + $0xdc0] sm:$0xff] }
 0x402   : > { %1417 = vxpose.xlu1.b32.cont [14/16] (narrow) %v3764_v44, 16  ;;  %1448 = vxpose.xlu2.b32.cont [13/16] (narrow) %v3779_v12, 16  ;;  %v1867_v44 = vld [vmem:[%s6075_s2 + $0x58] sm:$0xff]  ;;  %v4774_v12 = vpop.trf.xlu0 }
 0x403   : > { %1352 = vxpose.xlu0.b32.cont [14/16] (narrow) %v3748_v45, 16  ;;  %v1884_v45 = vld [vmem:[%s6075_s2 + $0xe0] sm:$0xff]  ;;  %1896 = vmatpush.msra.mxu0 %v1867_v44 }
 0x404   : > { %2008 = vmatpush.msra.mxu1 %v1884_v45  ;;  %3924 = vmatpush.msra.mxu3 %v1867_v44  ;;  %v3828_v44 = vld [vmem:[%s4250_s17 + $0xd68] sm:$0xff] }
 0x405   : > { %1897 = vmatpush.msra.mxu0 %v1866_v46  ;;  %3939 = vmatpush.msra.mxu2 %v1884_v45 }
 0x406   : > { %3925 = vmatpush.msra.mxu3 %v1866_v46  ;;  %v3856_v46 = vld [vmem:[%s4250_s17 + $0xe48] sm:$0xff] }
 0x40a   : > { %1418 = vxpose.xlu1.b32.cont [15/16] (narrow) %v3765_v47, 16  ;;  %1449 = vxpose.xlu2.b32.cont [14/16] (narrow) %v3780_v15, 16  ;;  %v1883_v47 = vld [vmem:[%s6075_s2 + $0xd8] sm:$0xff]  ;;  %v1872_v15 = vld [vmem:[%s6075_s2 + $0x80] sm:$0xff] }
 0x40b   : > { %1353 = vxpose.xlu0.b32.cont [15/16] (narrow) %v3749_v48, 16  ;;  %v1865_v48 = vld [vmem:[%s6075_s2 + $0x48] sm:$0xff]  ;;  %2009 = vmatpush.msra.mxu1 %v1883_v47 }
 0x40c   : > { %1898 = vmatpush.msra.mxu0 %v1865_v48  ;;  %3940 = vmatpush.msra.mxu2 %v1883_v47  ;;  %v3840_v47 = vld [vmem:[%s4250_s17 + $0xdc8] sm:$0xff] }
 0x40d   : > { %2010 = vmatpush.msra.mxu1 %v1882_v49  ;;  %3926 = vmatpush.msra.mxu3 %v1865_v48 }
 0x40e   : > { %1899 = vmatpush.msra.mxu0 %v1864_v52  ;;  %3941 = vmatpush.msra.mxu2 %v1882_v49  ;;  %v3829_v49 = vld [vmem:[%s4250_s17 + $0xd70] sm:$0xff] }
 0x40f   : > { %3927 = vmatpush.msra.mxu3 %v1864_v52  ;;  %v3841_v52 = vld [vmem:[%s4250_s17 + $0xdd0] sm:$0xff] }
 0x410   : > { %1900 = vmatpush.msra.mxu0 %v1863_v55 }
 0x411   : > { %3928 = vmatpush.msra.mxu3 %v1863_v55 }
 0x412   : > { %1419 = vxpose.xlu1.b32.end [16/16] (narrow) %v3766_v50, 16  ;;  %1450 = vxpose.xlu2.b32.cont [15/16] (narrow) %v3781_v18, 16  ;;  %v3847_v50 = vld [vmem:[%s4250_s17 + $0xe00] sm:$0xff]  ;;  %v4786_v18 = vpop.trf.xlu0 }
 0x413   : > { %1354 = vxpose.xlu0.b32.end [16/16] (narrow) %v3750_v51, 16  ;;  %v3831_v51 = vld [vmem:[%s4250_s17 + $0xd80] sm:$0xff] }
 0x41a   : > { %1533 = vxpose.xlu1.b32.start [1/16] (narrow) %v3799_v53, 16  ;;  %1451 = vxpose.xlu2.b32.end [16/16] (narrow) %v3782_v21, 16  ;;  %v1881_v53 = vld [vmem:[%s6075_s2 + $0xc8] sm:$0xff]  ;;  %v3851_v21 = vld [vmem:[%s4250_s17 + $0xe20] sm:$0xff] }
 0x41b   : > { %1501 = vxpose.xlu0.b32.start [1/16] (narrow) %v3783_v54, 16  ;;  %v3820_v54 = vld [vmem:[%s4250_s17 + $0xd28] sm:$0xff]  ;;  %2011 = vmatpush.msra.mxu1 %v1881_v53 }
 0x41c   : > { %3942 = vmatpush.msra.mxu2 %v1881_v53 }
 0x422   : > { %1534 = vxpose.xlu1.b32.cont [2/16] (narrow) %v3800_v56, 16  ;;  %1598 = vxpose.xlu2.b32.start [1/16] (narrow) %v3815_v24, 16  ;;  %v1880_v56 = vld [vmem:[%s6075_s2 + $0xc0] sm:$0xff]  ;;  %v3824_v24 = vld [vmem:[%s4250_s17 + $0xd48] sm:$0xff] }
 0x423   : > { %1502 = vxpose.xlu0.b32.cont [2/16] (narrow) %v3784_v57, 16  ;;  %v1862_v57 = vld [vmem:[%s6075_s2 + $0x30] sm:$0xff]  ;;  %2012 = vmatpush.msra.mxu1 %v1880_v56 }
 0x424   : > { %1901 = vmatpush.msra.mxu0 %v1862_v57  ;;  %3943 = vmatpush.msra.mxu2 %v1880_v56  ;;  %v3858_v56 = vld [vmem:[%s4250_s17 + $0xe58] sm:$0xff] }
 0x425   : > { %2013 = vmatpush.msra.mxu1 %v1879_v58  ;;  %3929 = vmatpush.msra.mxu3 %v1862_v57  ;;  %v3842_v57 = vld [vmem:[%s4250_s17 + $0xdd8] sm:$0xff] }
 0x426   : > { %3944 = vmatpush.msra.mxu2 %v1879_v58 }
 0x42a   : > { %1535 = vxpose.xlu1.b32.cont [3/16] (narrow) %v3801_v59, 16  ;;  %1599 = vxpose.xlu2.b32.cont [2/16] (narrow) %v3816_v27, 16  ;;  %v1861_v59 = vld [vmem:[%s6075_s2 + $0x28] sm:$0xff] }
 0x42b   : > { %1503 = vxpose.xlu0.b32.cont [3/16] (narrow) %v3785_v60, 16  ;;  %v1878_v60 = vld [vmem:[%s6075_s2 + $0xb0] sm:$0xff]  ;;  %1902 = vmatpush.msra.mxu0 %v1861_v59  ;;  %v3836_v27 = vld [vmem:[%s4250_s17 + $0xda8] sm:$0xff] }
 0x42c   : > { %2014 = vmatpush.msra.mxu1 %v1878_v60  ;;  %3930 = vmatpush.msra.mxu3 %v1861_v59  ;;  %v3863_v59 = vld [vmem:[%s4250_s17 + $0xe80] sm:$0xff] }
 0x42d   : > { %3945 = vmatpush.msra.mxu2 %v1878_v60 }
 0x42e   : > { %2015 = vmatpush.msra.mxu1 %v1877_v0 }
 0x42f   : > { %3946 = vmatpush.msra.mxu2 %v1877_v0  ;;  %v3864_v0 = vld [vmem:[%s4250_s17 + $0xe88] sm:$0xff] }
 0x430   : > { %2016 = vmatpush.msra.mxu1 %v1876_v3 }
 0x431   : > { %3947 = vmatpush.msra.mxu2 %v1876_v3  ;;  %v3844_v3 = vld [vmem:[%s4250_s17 + $0xde8] sm:$0xff] }
 0x432   : > { %1536 = vxpose.xlu1.b32.cont [4/16] (narrow) %v3802_v62, 16  ;;  %1600 = vxpose.xlu2.b32.cont [3/16] (narrow) %v3817_v30, 16  ;;  %v3832_v62 = vld [vmem:[%s4250_s17 + $0xd88] sm:$0xff] }
 0x433   : > { %1504 = vxpose.xlu0.b32.cont [4/16] (narrow) %v3786_v63, 16  ;;  %v1860_v63 = vld [vmem:[%s6075_s2 + $0x20] sm:$0xff] }
 0x434   : > { %1903 = vmatpush.msra.mxu0 %v1860_v63  ;;  %3931 = vmatpush.msra.mxu3 %v1860_v63 }
 0x43a   : > { %1537 = vxpose.xlu1.b32.cont [5/16] (narrow) %v3803_v1, 16  ;;  %1601 = vxpose.xlu2.b32.cont [4/16] (narrow) %v3818_v33, 16  ;;  %v3821_v1 = vld [vmem:[%s4250_s17 + $0xd30] sm:$0xff] }
 0x43b   : > { %1505 = vxpose.xlu0.b32.cont [5/16] (narrow) %v3787_v2, 16  ;;  %v1859_v2 = vld [vmem:[%s6075_s2 + $0x18] sm:$0xff] }
 0x43c   : > { %1904 = vmatpush.msra.mxu0 %v1859_v2  ;;  %3932 = vmatpush.msra.mxu3 %v1859_v2  ;;  %v3860_v2 = vld [vmem:[%s4250_s17 + $0xe68] sm:$0xff] }
 0x442   : > { %1538 = vxpose.xlu1.b32.cont [6/16] (narrow) %v3804_v4, 16  ;;  %1602 = vxpose.xlu2.b32.cont [5/16] (narrow) %v3819_v43, 16  ;;  %v1858_v4 = vld [vmem:[%s6075_s2 + $0x10] sm:$0xff] }
 0x443   : > { %1506 = vxpose.xlu0.b32.cont [6/16] (narrow) %v3788_v5, 16  ;;  %v1875_v5 = vld [vmem:[%s6075_s2 + $0x98] sm:$0xff]  ;;  %1905 = vmatpush.msra.mxu0 %v1858_v4 }
 0x444   : > { %2017 = vmatpush.msra.mxu1 %v1875_v5  ;;  %3933 = vmatpush.msra.mxu3 %v1858_v4 }
 0x445   : > { %1906 = vmatpush.msra.mxu0 %v1857_v6  ;;  %3948 = vmatpush.msra.mxu2 %v1875_v5  ;;  %v3865_v5 = vld [vmem:[%s4250_s17 + $0xe90] sm:$0xff] }
 0x446   : > { %3934 = vmatpush.msra.mxu3 %v1857_v6 }
 0x44a   : > { %1539 = vxpose.xlu1.b32.cont [7/16] (narrow) %v3805_v7, 16  ;;  %1603 = vxpose.xlu2.b32.cont [6/16] (narrow) %v3820_v54, 16  ;;  %v1874_v7 = vld [vmem:[%s6075_s2 + $0x90] sm:$0xff]  ;;  %v3830_v54 = vld [vmem:[%s4250_s17 + $0xd78] sm:$0xff] }
 0x44b   : > { %1507 = vxpose.xlu0.b32.cont [7/16] (narrow) %v3789_v8, 16  ;;  %v3849_v8 = vld [vmem:[%s4250_s17 + $0xe10] sm:$0xff]  ;;  %2018 = vmatpush.msra.mxu1 %v1874_v7 }
 0x44c   : > { %3949 = vmatpush.msra.mxu2 %v1874_v7  ;;  %v3861_v7 = vld [vmem:[%s4250_s17 + $0xe70] sm:$0xff] }
 0x452   : > { %1540 = vxpose.xlu1.b32.cont [8/16] (narrow) %v3806_v10, 16  ;;  %1604 = vxpose.xlu2.b32.cont [7/16] (narrow) %v3821_v1, 16  ;;  %v1856_v10 = vld [vmem:[%s6075_s2] sm:$0xff] }
 0x453   : > { %1508 = vxpose.xlu0.b32.cont [8/16] (narrow) %v3790_v11, 16  ;;  %v1873_v11 = vld [vmem:[%s6075_s2 + $0x88] sm:$0xff]  ;;  %1907 = vmatpush.msra.mxu0 %v1856_v10 }
 0x454   : > { %2019 = vmatpush.msra.mxu1 %v1873_v11  ;;  %1908 = vmatmul.f32.vlgmr.msra.gmra.mxu0 %v4774_v12 }
 0x455   : > { %3935 = vmatpush.msra.mxu3 %v1856_v10  ;;  %3950 = vmatpush.msra.mxu2 %v1873_v11  ;;  %v3866_v10 = vld [vmem:[%s4250_s17 + $0xe98] sm:$0xff] }
 0x456   : > { %2020 = vmatpush.msra.mxu1 %v1872_v15 }
 0x457   : > { %3951 = vmatpush.msra.mxu2 %v1872_v15  ;;  %v3846_v15 = vld [vmem:[%s4250_s17 + $0xdf8] sm:$0xff] }
 0x45a   : > { %1541 = vxpose.xlu1.b32.cont [9/16] (narrow) %v3807_v13, 16  ;;  %v3822_v13 = vld [vmem:[%s4250_s17 + $0xd38] sm:$0xff] }
 0x45b   : > { %1509 = vxpose.xlu0.b32.cont [9/16] (narrow) %v3791_v14, 16  ;;  %v4777_v14 = vpop.trf.xlu1  ;;  %1605 = vxpose.xlu2.b32.cont [8/16] (narrow) %v3822_v13, 16  ;;  %v3862_v13 = vld [vmem:[%s4250_s17 + $0xe78] sm:$0xff] }
 0x45c   : > { %2021 = vmatmul.f32.vlgmr.msra.gmra.mxu1 %v4777_v14  ;;  %1911 = vmatmul.f32.gmra.mxu0 %v4786_v18 }
 0x462   : > { %1542 = vxpose.xlu1.b32.cont [10/16] (narrow) %v3808_v16, 16  ;;  %v3850_v16 = vld [vmem:[%s4250_s17 + $0xe18] sm:$0xff] }
 0x463   : > { %1510 = vxpose.xlu0.b32.cont [10/16] (narrow) %v3792_v17, 16  ;;  %v3834_v17 = vld [vmem:[%s4250_s17 + $0xd98] sm:$0xff] }
 0x46a   : > { %1543 = vxpose.xlu1.b32.cont [11/16] (narrow) %v3809_v19, 16  ;;  %v3823_v19 = vld [vmem:[%s4250_s17 + $0xd40] sm:$0xff] }
 0x46b   : > { %1511 = vxpose.xlu0.b32.cont [11/16] (narrow) %v3793_v20, 16  ;;  %v4789_v20 = vpop.trf.xlu1  ;;  %1606 = vxpose.xlu2.b32.cont [9/16] (narrow) %v3823_v19, 16 }
 0x46c   : > { %2024 = vmatmul.f32.gmra.mxu1 %v4789_v20 }
 0x472   : > { %1544 = vxpose.xlu1.b32.cont [12/16] (narrow) %v3810_v22, 16  ;;  %v3835_v22 = vld [vmem:[%s4250_s17 + $0xda0] sm:$0xff] }
 0x473   : > { %1512 = vxpose.xlu0.b32.cont [12/16] (narrow) %v3794_v23, 16  ;;  %v4795_v23 = vpop.trf.xlu2  ;;  %1607 = vxpose.xlu2.b32.cont [10/16] (narrow) %v3824_v24, 16  ;;  %v4813_v33 = vpop.trf.xlu1 }
 0x474   : > { %6145 = vst [vmem:[#allocation5_spill] sm:$0xff] %v4795_v23  ;;  %1914 = vmatmul.f32.gmra.mxu0 %v4795_v23 }
 0x475   : > { %6149 = vst [vmem:[#allocation9_spill] sm:$0xff] %v4813_v33 }
 0x47a   : > { %1545 = vxpose.xlu1.b32.cont [13/16] (narrow) %v3811_v25, 16  ;;  %v4798_v25 = vpop.trf.xlu0 }
 0x47b   : > { %1513 = vxpose.xlu0.b32.cont [13/16] (narrow) %v3795_v26, 16  ;;  %6146 = vst [vmem:[#allocation6_spill] sm:$0xff] %v4798_v25  ;;  %2027 = vmatmul.f32.gmra.mxu1 %v4798_v25  ;;  %v3852_v26 = vld [vmem:[%s4250_s17 + $0xe28] sm:$0xff]  ;;  %v4822_v38 = vpop.trf.xlu1 }
 0x47c   : > { %6151 = vst [vmem:[#allocation11_spill] sm:$0xff] %v4822_v38 }
 0x482   : > { %1546 = vxpose.xlu1.b32.cont [14/16] (narrow) %v3812_v28, 16  ;;  %v4804_v28 = vpop.trf.xlu2  ;;  %v4807_v30 = vpop.trf.xlu0 }
 0x483   : > { %1514 = vxpose.xlu0.b32.cont [14/16] (narrow) %v3796_v29, 16  ;;  %6147 = vst [vmem:[#allocation7_spill] sm:$0xff] %v4804_v28  ;;  %v3825_v29 = vld [vmem:[%s4250_s17 + $0xd50] sm:$0xff]  ;;  %1917 = vmatmul.f32.gmra.mxu0 %v4804_v28  ;;  %v4834_v45 = vpop.trf.xlu1 }
 0x484   : > { %6148 = vst [vmem:[#allocation8_spill] sm:$0xff] %v4807_v30  ;;  %1608 = vxpose.xlu2.b32.cont [11/16] (narrow) %v3825_v29, 16  ;;  %2030 = vmatmul.f32.gmra.mxu1 %v4807_v30  ;;  %v3880_v29 = vld [vmem:[%s4250_s17 + $0xf08] sm:$0xff] }
 0x485   : > { %6154 = vst [vmem:[#allocation14_spill] sm:$0xff] %v4834_v45 }
 0x48a   : > { %1547 = vxpose.xlu1.b32.cont [15/16] (narrow) %v3813_v31, 16  ;;  %v3853_v31 = vld [vmem:[%s4250_s17 + $0xe30] sm:$0xff]  ;;  %v4816_v35 = vpop.trf.xlu2  ;;  %v4831_v43 = vpop.trf.xlu0 }
 0x48b   : > { %1515 = vxpose.xlu0.b32.cont [15/16] (narrow) %v3797_v32, 16  ;;  %v3837_v32 = vld [vmem:[%s4250_s17 + $0xdb0] sm:$0xff]  ;;  %6150 = vst [vmem:[#allocation10_spill] sm:$0xff] %v4816_v35  ;;  %1920 = vmatmul.f32.gmra.mxu0 %v4813_v33 }
 0x48c   : > { %1609 = vxpose.xlu2.b32.cont [12/16] (narrow) %v3826_v34, 16  ;;  %2033 = vmatmul.f32.gmra.mxu1 %v4816_v35  ;;  %6153 = vst [vmem:[#allocation13_spill] sm:$0xff] %v4831_v43  ;;  %v3869_v34 = vld [vmem:[%s4250_s17 + $0xeb0] sm:$0xff] }
 0x492   : > { %1548 = vxpose.xlu1.b32.end [16/16] (narrow) %v3814_v39, 16  ;;  %v3827_v39 = vld [vmem:[%s4250_s17 + $0xd60] sm:$0xff]  ;;  %v4840_v48 = vpop.trf.xlu0 }
 0x493   : > { %1516 = vxpose.xlu0.b32.end [16/16] (narrow) %v3798_v40, 16  ;;  %v4825_v40 = vpop.trf.xlu2  ;;  %1923 = vmatmul.f32.gmra.mxu0 %v4822_v38  ;;  %6155 = vst [vmem:[#allocation15_spill] sm:$0xff] %v4840_v48 }
 0x494   : > { %6152 = vst [vmem:[#allocation12_spill] sm:$0xff] %v4825_v40  ;;  %1610 = vxpose.xlu2.b32.cont [13/16] (narrow) %v3827_v39, 16  ;;  %2036 = vmatmul.f32.gmra.mxu1 %v4825_v40  ;;  %v3897_v39 = vld [vmem:[%s4250_s17 + $0xf90] sm:$0xff] }
 0x49a   : > { %1695 = vxpose.xlu1.b32.start [1/16] (narrow) %v3847_v50, 16  ;;  %v4843_v50 = vpop.trf.xlu1  ;;  %v4852_v55 = vpop.trf.xlu0 }
 0x49b   : > { %1630 = vxpose.xlu0.b32.start [1/16] (narrow) %v3831_v51, 16  ;;  %1926 = vmatmul.f32.gmra.mxu0 %v4831_v43  ;;  %6156 = vst [vmem:[#allocation16_spill] sm:$0xff] %v4843_v50  ;;  %v3857_v51 = vld [vmem:[%s4250_s17 + $0xe50] sm:$0xff]  ;;  %v4849_v53 = vpop.trf.xlu2 }
 0x49c   : > { %1611 = vxpose.xlu2.b32.cont [14/16] (narrow) %v3828_v44, 16  ;;  %2039 = vmatmul.f32.gmra.mxu1 %v4834_v45  ;;  %6157 = vst [vmem:[#allocation17_spill] sm:$0xff] %v4849_v53  ;;  %v2119_v45 = vld [vmem:[%s302_s14 + $0x8] sm:$0xff] }
 0x49d   : > { %6158 = vst [vmem:[#allocation18_spill] sm:$0xff] %v4852_v55 }
 0x4a2   : > { %1696 = vxpose.xlu1.b32.cont [2/16] (narrow) %v3848_v61, 16  ;;  %v4861_v60 = vpop.trf.xlu0  ;;  %v3859_v61 = vld [vmem:[%s4250_s17 + $0xe60] sm:$0xff]  ;;  %v4867_v63 = vpop.trf.xlu1 }
 0x4a3   : > { %1631 = vxpose.xlu0.b32.cont [2/16] (narrow) %v3832_v62, 16  ;;  %1929 = vmatmul.f32.gmra.mxu0 %v4840_v48  ;;  %v4858_v58 = vpop.trf.xlu2  ;;  %6160 = vst [vmem:[#allocation20_spill] sm:$0xff] %v4861_v60  ;;  %v3843_v62 = vld [vmem:[%s4250_s17 + $0xde0] sm:$0xff] }
 0x4a4   : > { %1612 = vxpose.xlu2.b32.cont [15/16] (narrow) %v3829_v49, 16  ;;  %2042 = vmatmul.f32.gmra.mxu1 %v4843_v50  ;;  %6159 = vst [vmem:[#allocation19_spill] sm:$0xff] %v4858_v58 }
 0x4a5   : > { %6161 = vst [vmem:[#allocation21_spill] sm:$0xff] %v4867_v63 }
 0x4aa   : > { %1697 = vxpose.xlu1.b32.cont [3/16] (narrow) %v3849_v8, 16  ;;  %v4876_v4 = vpop.trf.xlu1  ;;  %v3845_v8 = vld [vmem:[%s4250_s17 + $0xdf0] sm:$0xff] }
 0x4ab   : > { %1632 = vxpose.xlu0.b32.cont [3/16] (narrow) %v3833_v9, 16  ;;  %1932 = vmatmul.f32.gmra.mxu0 %v4849_v53  ;;  %v4870_v1 = vpop.trf.xlu2  ;;  %6163 = vst [vmem:[#allocation23_spill] sm:$0xff] %v4876_v4  ;;  %v4885_v9 = vpop.trf.xlu0 }
 0x4ac   : > { %1613 = vxpose.xlu2.b32.end [16/16] (narrow) %v3830_v54, 16  ;;  %2045 = vmatmul.f32.gmra.mxu1 %v4852_v55  ;;  %6162 = vst [vmem:[#allocation22_spill] sm:$0xff] %v4870_v1  ;;  %v3882_v54 = vld [vmem:[%s4250_s17 + $0xf18] sm:$0xff] }
 0x4ad   : > { %6165 = vst [vmem:[#allocation25_spill] sm:$0xff] %v4885_v9 }
 0x4b2   : > { %1698 = vxpose.xlu1.b32.cont [4/16] (narrow) %v3850_v16, 16  ;;  %v4888_v11 = vpop.trf.xlu1 }
 0x4b3   : > { %1633 = vxpose.xlu0.b32.cont [4/16] (narrow) %v3834_v17, 16  ;;  %1935 = vmatmul.f32.gmra.mxu0 %v4858_v58  ;;  %v4879_v6 = vpop.trf.xlu2  ;;  %6166 = vst [vmem:[#allocation26_spill] sm:$0xff] %v4888_v11  ;;  %v4894_v16 = vpop.trf.xlu0  ;;  %v3867_v17 = vld [vmem:[%s4250_s17 + $0xea0] sm:$0xff] }
 0x4b4   : > { %1727 = vxpose.xlu2.b32.start [1/16] (narrow) %v3863_v59, 16  ;;  %2048 = vmatmul.f32.gmra.mxu1 %v4861_v60  ;;  %6164 = vst [vmem:[#allocation24_spill] sm:$0xff] %v4879_v6 }
 0x4b5   : > { %6167 = vst [vmem:[#allocation27_spill] sm:$0xff] %v4894_v16 }
 0x4ba   : > { %1699 = vxpose.xlu1.b32.cont [5/16] (narrow) %v3851_v21, 16  ;;  %v4897_v19 = vpop.trf.xlu1  ;;  %v3879_v21 = vld [vmem:[%s4250_s17 + $0xf00] sm:$0xff] }
 0x4bb   : > { %1634 = vxpose.xlu0.b32.cont [5/16] (narrow) %v3835_v22, 16  ;;  %1938 = vmatmul.f32.gmra.mxu0 %v4867_v63  ;;  %6168 = vst [vmem:[#allocation28_spill] sm:$0xff] %v4897_v19  ;;  %v3895_v22 = vld [vmem:[%s4250_s17 + $0xf80] sm:$0xff]  ;;  %v4903_v24 = vpop.trf.xlu2  ;;  %v2123_v63 = vld [vmem:[%s6077_s4 + $0x18] sm:$0xff] }
 0x4bc   : > { %1728 = vxpose.xlu2.b32.cont [2/16] (narrow) %v3864_v0, 16  ;;  %2051 = vmatmul.f32.gmra.mxu1 %v4870_v1  ;;  %6169 = vst [vmem:[#allocation29_spill] sm:$0xff] %v4903_v24 }
 0x4c2   : > { %1700 = vxpose.xlu1.b32.cont [6/16] (narrow) %v3852_v26, 16  ;;  %v3868_v26 = vld [vmem:[%s4250_s17 + $0xea8] sm:$0xff]  ;;  %v4926_v44 = vpop.trf.xlu1 }
 0x4c3   : > { %1635 = vxpose.xlu0.b32.cont [6/16] (narrow) %v3836_v27, 16  ;;  %1941 = vmatmul.f32.gmra.mxu0 %v4876_v4  ;;  %v4906_v27 = vpop.trf.xlu0  ;;  %6173 = vst [vmem:[#allocation33_spill] sm:$0xff] %v4926_v44  ;;  %v3907_v4 = vld [vmem:[%s4250_s17 + $0xfe0] sm:$0xff] }
 0x4c4   : > { %1729 = vxpose.xlu2.b32.cont [3/16] (narrow) %v3865_v5, 16  ;;  %2054 = vmatmul.f32.gmra.mxu1 %v4879_v6  ;;  %6170 = vst [vmem:[#allocation30_spill] sm:$0xff] %v4906_v27 }
 0x4ca   : > { %1701 = vxpose.xlu1.b32.cont [7/16] (narrow) %v3853_v31, 16  ;;  %v3896_v31 = vld [vmem:[%s4250_s17 + $0xf88] sm:$0xff]  ;;  %v4938_v59 = vpop.trf.xlu1 }
 0x4cb   : > { %1636 = vxpose.xlu0.b32.cont [7/16] (narrow) %v3837_v32, 16  ;;  %1944 = vmatmul.f32.gmra.mxu0 %v4885_v9  ;;  %v4912_v32 = vpop.trf.xlu2  ;;  %6175 = vst [vmem:[#allocation35_spill] sm:$0xff] %v4938_v59 }
 0x4cc   : > { %1730 = vxpose.xlu2.b32.cont [4/16] (narrow) %v3866_v10, 16  ;;  %2057 = vmatmul.f32.gmra.mxu1 %v4888_v11  ;;  %6171 = vst [vmem:[#allocation31_spill] sm:$0xff] %v4912_v32 }
 0x4cd   : > { %1959 = vmatmul.f32.vlgmr.msra.gmra.mxu3 %v4938_v59 }
 0x4d2   : > { %1702 = vxpose.xlu1.b32.cont [8/16] (narrow) %v3854_v36, 16  ;;  %v4915_v36 = vpop.trf.xlu0 }
 0x4d3   : > { %1637 = vxpose.xlu0.b32.cont [8/16] (narrow) %v3838_v37, 16  ;;  %1947 = vmatmul.f32.gmra.mxu0 %v4894_v16  ;;  %6172 = vst [vmem:[#allocation32_spill] sm:$0xff] %v4915_v36  ;;  %v3881_v37 = vld [vmem:[%s4250_s17 + $0xf10] sm:$0xff]  ;;  %v4929_v49 = vpop.trf.xlu2  ;;  %v5212_v16 = vld [vmem:[%s6079_s6] ss:$0 sm:$0xff] }
 0x4d4   : > { %1731 = vxpose.xlu2.b32.cont [5/16] (narrow) %v3867_v17, 16  ;;  %2060 = vmatmul.f32.gmra.mxu1 %v4897_v19  ;;  %6174 = vst [vmem:[#allocation34_spill] sm:$0xff] %v4929_v49  ;;  %v2134_v17 = vld [vmem:[%s6077_s4 + $0x70] sm:$0xff] }
 0x4da   : > { %1703 = vxpose.xlu1.b32.cont [9/16] (narrow) %v3855_v41, 16  ;;  %v4924_v41 = vld [vmem:[%s6076_s3] ss:$0 sm:$0xff] }
 0x4db   : > { %1638 = vxpose.xlu0.b32.cont [9/16] (narrow) %v3839_v42, 16  ;;  %1950 = vmatmul.f32.gmra.mxu0 %v4903_v24  ;;  %v1909_v42 = vpop.f32.mrf.mxu0 }
 0x4dc   : > { %1732 = vxpose.xlu2.b32.cont [6/16] (narrow) %v3868_v26, 16  ;;  %2063 = vmatmul.f32.gmra.mxu1 %v4906_v27  ;;  %v4961_v26 = vpop.trf.xlu1  ;;  %v3878_v27 = vld [vmem:[%s4250_s17 + $0xef8] sm:$0xff] }
 0x4dd   : > { %6178 = vst [vmem:[#allocation38_spill] sm:$0xff] %v4961_v26 }
 0x4e2   : > { %1704 = vxpose.xlu1.b32.cont [10/16] (narrow) %v3856_v46, 16  ;;  %v3870_v46 = vld [vmem:[%s4250_s17 + $0xeb8] sm:$0xff] }
 0x4e3   : > { %1639 = vxpose.xlu0.b32.cont [10/16] (narrow) %v3840_v47, 16  ;;  %1953 = vmatmul.f32.gmra.mxu0 %v4912_v32  ;;  %v2022_v47 = vpop.f32.mrf.mxu1 }
 0x4e4   : > { %1733 = vxpose.xlu2.b32.cont [7/16] (narrow) %v3869_v34, 16  ;;  %2066 = vmatmul.f32.gmra.mxu1 %v4915_v36  ;;  %v3900_v34 = vld [vmem:[%s4250_s17 + $0xfa8] sm:$0xff] }
 0x4ea   : > { %1705 = vxpose.xlu1.b32.cont [11/16] (narrow) %v3857_v51, 16  ;;  %v1910_v51 = vadd.f32 %v4924_v41, %v1909_v42  ;;  %v3873_v42 = vld [vmem:[%s4250_s17 + $0xed0] sm:$0xff] }
 0x4eb   : > { %1640 = vxpose.xlu0.b32.cont [11/16] (narrow) %v3841_v52, 16  ;;  %1956 = vmatmul.f32.gmra.mxu0 %v4926_v44 }
 0x4ec   : > { %1734 = vxpose.xlu2.b32.cont [8/16] (narrow) %v3870_v46, 16  ;;  %v4933_v52 = vadd.f32 %v2022_v47, %v1910_v51  ;;  %2069 = vmatmul.f32.gmra.mxu1 %v4929_v49  ;;  %v2133_v46 = vld [vmem:[%s6077_s4 + $0x68] sm:$0xff] }
 0x4f2   : > { %1706 = vxpose.xlu1.b32.cont [12/16] (narrow) %v3858_v56, 16  ;;  %v3898_v56 = vld [vmem:[%s4250_s17 + $0xf98] sm:$0xff] }
 0x4f3   : > { %1641 = vxpose.xlu0.b32.cont [12/16] (narrow) %v3842_v57, 16  ;;  %v1912_v57 = vpop.f32.mrf.mxu0 }
 0x4f4   : > { %v1913_v0 = vadd.f32 %v4924_v41, %v1912_v57  ;;  %v3885_v57 = vld [vmem:[%s4250_s17 + $0xf30] sm:$0xff] }
 0x4fa   : > { %1707 = vxpose.xlu1.b32.cont [13/16] (narrow) %v3859_v61, 16  ;;  %v3871_v61 = vld [vmem:[%s4250_s17 + $0xec0] sm:$0xff] }
 0x4fb   : > { %1642 = vxpose.xlu0.b32.cont [13/16] (narrow) %v3843_v62, 16  ;;  %v2135_v62 = vld [vmem:[%s6077_s4 + $0x78] sm:$0xff]  ;;  %1735 = vxpose.xlu2.b32.cont [9/16] (narrow) %v3871_v61, 16  ;;  %v1915_v10 = vpop.f32.mrf.mxu0  ;;  %v3901_v61 = vld [vmem:[%s4250_s17 + $0xfb0] sm:$0xff] }
 0x4fc   : > { %2140 = vmatpush.msrb.mxu2 %v2135_v62 }
 0x4fe   : > { %2141 = vmatpush.msrb.mxu2 %v2134_v17 }
 0x500   : > { %2142 = vmatpush.msrb.mxu2 %v2133_v46 }
 0x502   : > { %1708 = vxpose.xlu1.b32.cont [14/16] (narrow) %v3860_v2, 16  ;;  %v2025_v2 = vpop.f32.mrf.mxu1 }
 0x503   : > { %1643 = vxpose.xlu0.b32.cont [14/16] (narrow) %v3844_v3, 16  ;;  %v4946_v3 = vpop.trf.xlu2  ;;  %v4949_v5 = vadd.f32 %v2025_v2, %v1913_v0  ;;  %v3874_v2 = vld [vmem:[%s4250_s17 + $0xed8] sm:$0xff] }
 0x504   : > { %6176 = vst [vmem:[#allocation36_spill] sm:$0xff] %v4946_v3  ;;  %2072 = vmatmul.f32.vlgmr.msra.gmra.mxu2 %v4946_v3 }
 0x50a   : > { %1709 = vxpose.xlu1.b32.cont [15/16] (narrow) %v3861_v7, 16  ;;  %v3883_v7 = vld [vmem:[%s4250_s17 + $0xf20] sm:$0xff] }
 0x50b   : > { %1644 = vxpose.xlu0.b32.cont [15/16] (narrow) %v3845_v8, 16  ;;  %v3899_v8 = vld [vmem:[%s4250_s17 + $0xfa0] sm:$0xff]  ;;  %v4983_v0 = vpop.trf.xlu2 }
 0x50c   : > { %2075 = vmatmul.f32.gmra.mxu2 %v4961_v26  ;;  %6181 = vst [vmem:[#allocation41_spill] sm:$0xff] %v4983_v0 }
 0x512   : > { %1710 = vxpose.xlu1.b32.end [16/16] (narrow) %v3862_v13, 16  ;;  %v4953_v13 = vpop.trf.xlu0 }
 0x513   : > { %1645 = vxpose.xlu0.b32.end [16/16] (narrow) %v3846_v15, 16  ;;  %6177 = vst [vmem:[#allocation37_spill] sm:$0xff] %v4953_v13  ;;  %v3872_v15 = vld [vmem:[%s4250_s17 + $0xec8] sm:$0xff]  ;;  %1962 = vmatmul.f32.gmra.mxu3 %v4953_v13 }
 0x514   : > { %1736 = vxpose.xlu2.b32.cont [10/16] (narrow) %v3872_v15, 16 }
 0x51a   : > { %1792 = vxpose.xlu1.b32.start [1/16] (narrow) %v3879_v21, 16  ;;  %v1916_v21 = vadd.f32 %v4924_v41, %v1915_v10 }
 0x51b   : > { %1824 = vxpose.xlu0.b32.start [1/16] (narrow) %v3895_v22, 16  ;;  %v2028_v22 = vpop.f32.mrf.mxu1 }
 0x51c   : > { %1737 = vxpose.xlu2.b32.cont [11/16] (narrow) %v3873_v42, 16  ;;  %v3875_v42 = vld [vmem:[%s4250_s17 + $0xee0] sm:$0xff] }
 0x522   : > { %1793 = vxpose.xlu1.b32.cont [2/16] (narrow) %v3880_v29, 16  ;;  %v4964_v29 = vadd.f32 %v2028_v22, %v1916_v21  ;;  %v3886_v21 = vld [vmem:[%s4250_s17 + $0xf38] sm:$0xff] }
 0x523   : > { %1825 = vxpose.xlu0.b32.cont [2/16] (narrow) %v3896_v31, 16  ;;  %v3884_v31 = vld [vmem:[%s4250_s17 + $0xf28] sm:$0xff]  ;;  %v2031_v51 = vpop.f32.mrf.mxu1  ;;  %v3902_v22 = vld [vmem:[%s4250_s17 + $0xfb8] sm:$0xff] }
 0x524   : > { %1738 = vxpose.xlu2.b32.cont [12/16] (narrow) %v3874_v2, 16 }
 0x52a   : > { %1794 = vxpose.xlu1.b32.cont [3/16] (narrow) %v3881_v37, 16  ;;  %v1918_v37 = vpop.f32.mrf.mxu0 }
 0x52b   : > { %1826 = vxpose.xlu0.b32.cont [3/16] (narrow) %v3897_v39, 16  ;;  %v4968_v39 = vpop.trf.xlu0  ;;  %v1919_v47 = vadd.f32 %v4924_v41, %v1918_v37  ;;  %v2034_v10 = vpop.f32.mrf.mxu1  ;;  %v2131_v37 = vld [vmem:[%s6077_s4 + $0x58] sm:$0xff] }
 0x52c   : > { %6179 = vst [vmem:[#allocation39_spill] sm:$0xff] %v4968_v39  ;;  %1965 = vmatmul.f32.gmra.mxu3 %v4968_v39  ;;  %1739 = vxpose.xlu2.b32.cont [13/16] (narrow) %v3875_v42, 16  ;;  %v3888_v42 = vld [vmem:[%s4250_s17 + $0xf48] sm:$0xff] }
 0x532   : > { %1795 = vxpose.xlu1.b32.cont [4/16] (narrow) %v3882_v54, 16  ;;  %v4976_v54 = vpop.trf.xlu1  ;;  %v1921_v62 = vpop.f32.mrf.mxu0 }
 0x533   : > { %1827 = vxpose.xlu0.b32.cont [4/16] (narrow) %v3898_v56, 16  ;;  %6180 = vst [vmem:[#allocation40_spill] sm:$0xff] %v4976_v54  ;;  %2078 = vmatmul.f32.gmra.mxu2 %v4976_v54  ;;  %v4979_v56 = vadd.f32 %v2031_v51, %v1919_v47  ;;  %v4991_v15 = vpop.trf.xlu0  ;;  %v2037_v47 = vpop.f32.mrf.mxu1 }
 0x534   : > { %1968 = vmatmul.f32.gmra.mxu3 %v4983_v0  ;;  %6182 = vst [vmem:[#allocation42_spill] sm:$0xff] %v4991_v15 }
 0x53a   : > { %1796 = vxpose.xlu1.b32.cont [5/16] (narrow) %v3883_v7, 16  ;;  %v2132_v7 = vld [vmem:[%s6077_s4 + $0x60] sm:$0xff] }
 0x53b   : > { %1828 = vxpose.xlu0.b32.cont [5/16] (narrow) %v3899_v8, 16  ;;  %v1922_v8 = vadd.f32 %v4924_v41, %v1921_v62  ;;  %2143 = vmatpush.msrb.mxu2 %v2132_v7  ;;  %v5006_v51 = vpop.trf.xlu0  ;;  %v3903_v62 = vld [vmem:[%s4250_s17 + $0xfc0] sm:$0xff]  ;;  %v5013_v7 = vpop.trf.xlu1 }
 0x53c   : > { %2081 = vmatmul.f32.gmra.mxu2 %v4991_v15  ;;  %6184 = vst [vmem:[#allocation44_spill] sm:$0xff] %v5006_v51 }
 0x53d   : > { %v4994_v17 = vadd.f32 %v2034_v10, %v1922_v8  ;;  %2144 = vmatpush.msrb.mxu2 %v2131_v37  ;;  %6185 = vst [vmem:[#allocation45_spill] sm:$0xff] %v5013_v7  ;;  %v2130_v8 = vld [vmem:[%s6077_s4 + $0x50] sm:$0xff]  ;;  %v3876_v10 = vld [vmem:[%s4250_s17 + $0xee8] sm:$0xff] }
 0x53e   : > { %1740 = vxpose.xlu2.b32.cont [14/16] (narrow) %v3876_v10, 16 }
 0x53f   : > { %2145 = vmatpush.msrb.mxu2 %v2130_v8 }
 0x542   : > { %1797 = vxpose.xlu1.b32.cont [6/16] (narrow) %v3884_v31, 16  ;;  %v1924_v31 = vpop.f32.mrf.mxu0 }
 0x543   : > { %1829 = vxpose.xlu0.b32.cont [6/16] (narrow) %v3900_v34, 16  ;;  %v4998_v34 = vpop.trf.xlu2  ;;  %v1925_v46 = vadd.f32 %v4924_v41, %v1924_v31 }
 0x544   : > { %6183 = vst [vmem:[#allocation43_spill] sm:$0xff] %v4998_v34  ;;  %1971 = vmatmul.f32.gmra.mxu3 %v4998_v34  ;;  %2084 = vmatmul.f32.gmra.mxu2 %v5006_v51 }
 0x54a   : > { %1798 = vxpose.xlu1.b32.cont [7/16] (narrow) %v3885_v57, 16  ;;  %v5009_v57 = vadd.f32 %v2037_v47, %v1925_v46  ;;  %v1927_v2 = vpop.f32.mrf.mxu0  ;;  %v3904_v46 = vld [vmem:[%s4250_s17 + $0xfc8] sm:$0xff] }
 0x54b   : > { %1830 = vxpose.xlu0.b32.cont [7/16] (narrow) %v3901_v61, 16  ;;  %v3887_v61 = vld [vmem:[%s4250_s17 + $0xf40] sm:$0xff]  ;;  %v5021_v31 = vpop.trf.xlu2 }
 0x54c   : > { %1974 = vmatmul.f32.gmra.mxu3 %v5013_v7  ;;  %6186 = vst [vmem:[#allocation46_spill] sm:$0xff] %v5021_v31  ;;  %2087 = vmatmul.f32.gmra.mxu2 %v5021_v31 }
 0x552   : > { %1799 = vxpose.xlu1.b32.cont [8/16] (narrow) %v3886_v21, 16  ;;  %v1928_v21 = vadd.f32 %v4924_v41, %v1927_v2  ;;  %v1930_v47 = vpop.f32.mrf.mxu0  ;;  %v3877_v2 = vld [vmem:[%s4250_s17 + $0xef0] sm:$0xff] }
 0x553   : > { %1831 = vxpose.xlu0.b32.cont [8/16] (narrow) %v3902_v22, 16  ;;  %v2040_v22 = vpop.f32.mrf.mxu1  ;;  %v1931_v8 = vadd.f32 %v4924_v41, %v1930_v47  ;;  %1741 = vxpose.xlu2.b32.cont [15/16] (narrow) %v3877_v2, 16  ;;  %v2128_v47 = vld [vmem:[%s6077_s4 + $0x40] sm:$0xff] }
 0x554   : > { %v5024_v37 = vadd.f32 %v2040_v22, %v1928_v21  ;;  %v5036_v21 = vpop.trf.xlu2 }
 0x555   : > { %6188 = vst [vmem:[#allocation48_spill] sm:$0xff] %v5036_v21  ;;  %2090 = vmatmul.f32.gmra.mxu2 %v5036_v21 }
 0x55a   : > { %1800 = vxpose.xlu1.b32.cont [9/16] (narrow) %v3887_v61, 16  ;;  %v2129_v61 = vld [vmem:[%s6077_s4 + $0x48] sm:$0xff]  ;;  %v1933_v36 = vpop.f32.mrf.mxu0 }
 0x55b   : > { %1832 = vxpose.xlu0.b32.cont [9/16] (narrow) %v3903_v62, 16  ;;  %v5031_v62 = vpop.trf.xlu1  ;;  %2146 = vmatpush.msrb.mxu2 %v2129_v61  ;;  %v2043_v10 = vpop.f32.mrf.mxu1  ;;  %v1934_v2 = vadd.f32 %v4924_v41, %v1933_v36  ;;  %v2127_v36 = vld [vmem:[%s6077_s4 + $0x38] sm:$0xff] }
 0x55c   : > { %6187 = vst [vmem:[#allocation47_spill] sm:$0xff] %v5031_v62  ;;  %1977 = vmatmul.f32.gmra.mxu3 %v5031_v62  ;;  %v5039_v22 = vadd.f32 %v2043_v10, %v1931_v8  ;;  %v5046_v61 = vpop.trf.xlu0  ;;  %1742 = vxpose.xlu2.b32.end [16/16] (narrow) %v3878_v27, 16  ;;  %v2126_v27 = vld [vmem:[%s6077_s4 + $0x30] sm:$0xff]  ;;  %v5076_v1 = vpop.trf.xlu2 }
 0x55d   : > { %6189 = vst [vmem:[#allocation49_spill] sm:$0xff] %v5046_v61  ;;  %2147 = vmatpush.msrb.mxu2 %v2128_v47 }
 0x55e   : > { %6193 = vst [vmem:[#allocation53_spill] sm:$0xff] %v5076_v1 }
 0x55f   : > { %2148 = vmatpush.msrb.mxu2 %v2127_v36  ;;  %v3891_v36 = vld [vmem:[%s4250_s17 + $0xf60] sm:$0xff] }
 0x561   : > { %2149 = vmatpush.msrb.mxu2 %v2126_v27 }
 0x562   : > { %1801 = vxpose.xlu1.b32.cont [10/16] (narrow) %v3888_v42, 16  ;;  %v3889_v42 = vld [vmem:[%s4250_s17 + $0xf50] sm:$0xff]  ;;  %v1936_v24 = vpop.f32.mrf.mxu0 }
 0x563   : > { %1833 = vxpose.xlu0.b32.cont [10/16] (narrow) %v3904_v46, 16  ;;  %v3905_v46 = vld [vmem:[%s4250_s17 + $0xfd0] sm:$0xff]  ;;  %v2046_v32 = vpop.f32.mrf.mxu1  ;;  %v5051_v8 = vpop.trf.xlu1 }
 0x564   : > { %1980 = vmatmul.f32.gmra.mxu3 %v5046_v61  ;;  %6190 = vst [vmem:[#allocation50_spill] sm:$0xff] %v5051_v8  ;;  %2093 = vmatmul.f32.gmra.mxu2 %v5051_v8  ;;  %v5054_v10 = vadd.f32 %v2046_v32, %v1934_v2  ;;  %v5061_v47 = vpop.trf.xlu0  ;;  %v1937_v32 = vadd.f32 %v4924_v41, %v1936_v24  ;;  %v2124_v24 = vld [vmem:[%s6077_s4 + $0x20] sm:$0xff] }
 0x565   : > { %6191 = vst [vmem:[#allocation51_spill] sm:$0xff] %v5061_v47 }
 0x56a   : > { %1802 = vxpose.xlu1.b32.cont [11/16] (narrow) %v3889_v42, 16  ;;  %v3890_v42 = vld [vmem:[%s4250_s17 + $0xf58] sm:$0xff] }
 0x56b   : > { %1834 = vxpose.xlu0.b32.cont [11/16] (narrow) %v3905_v46, 16  ;;  %v3906_v46 = vld [vmem:[%s4250_s17 + $0xfd8] sm:$0xff]  ;;  %v2049_v2 = vpop.f32.mrf.mxu1 }
 0x56c   : > { %1983 = vmatmul.f32.gmra.mxu3 %v5061_v47  ;;  %v5074_v6 = vadd.f32 %v2049_v2, %v1937_v32  ;;  %v1939_v32 = vpop.f32.mrf.mxu0  ;;  %v5086_v27 = vpop.trf.xlu0  ;;  %v2122_v2 = vld [vmem:[%s6077_s4 + $0x10] sm:$0xff] }
 0x56d   : > { %6194 = vst [vmem:[#allocation54_spill] sm:$0xff] %v5086_v27 }
 0x572   : > { %1803 = vxpose.xlu1.b32.cont [12/16] (narrow) %v3890_v42, 16  ;;  %v5068_v42 = vpop.trf.xlu1 }
 0x573   : > { %1835 = vxpose.xlu0.b32.cont [12/16] (narrow) %v3906_v46, 16  ;;  %6192 = vst [vmem:[#allocation52_spill] sm:$0xff] %v5068_v42  ;;  %2096 = vmatmul.f32.gmra.mxu2 %v5068_v42  ;;  %v2125_v46 = vld [vmem:[%s6077_s4 + $0x28] sm:$0xff]  ;;  %v1940_v42 = vadd.f32 %v4924_v41, %v1939_v32  ;;  %v2052_v8 = vpop.f32.mrf.mxu1 }
 0x574   : > { %2150 = vmatpush.msrb.mxu2 %v2125_v46  ;;  %1986 = vmatmul.f32.gmra.mxu3 %v5076_v1  ;;  %v1942_v47 = vpop.f32.mrf.mxu0  ;;  %v5100_v61 = vpop.trf.xlu0 }
 0x575   : > { %v5094_v46 = vadd.f32 %v2052_v8, %v1940_v42  ;;  %6196 = vst [vmem:[#allocation56_spill] sm:$0xff] %v5100_v61  ;;  %v1943_v32 = vadd.f32 %v4924_v41, %v1942_v47  ;;  %v3893_v42 = vld [vmem:[%s4250_s17 + $0xf70] sm:$0xff] }
 0x576   : > { %2151 = vmatpush.msrb.mxu2 %v2124_v24  ;;  %v3908_v24 = vld [vmem:[%s4250_s17 + $0xfe8] sm:$0xff] }
 0x578   : > { %2152 = vmatpush.msrb.mxu2 %v2123_v63 }
 0x57a   : > { %1804 = vxpose.xlu1.b32.cont [13/16] (narrow) %v3891_v36, 16  ;;  %2153 = vmatpush.msrb.mxu2 %v2122_v2  ;;  %v5098_v36 = vpop.trf.xlu2  ;;  %v5107_v8 = vpop.trf.xlu1  ;;  %v3909_v2 = vld [vmem:[%s4250_s17 + $0xff0] sm:$0xff] }
 0x57b   : > { %1836 = vxpose.xlu0.b32.cont [13/16] (narrow) %v3907_v4, 16  ;;  %2099 = vmatmul.f32.gmra.mxu2 %v5086_v27  ;;  %v3892_v4 = vld [vmem:[%s4250_s17 + $0xf68] sm:$0xff]  ;;  %6195 = vst [vmem:[#allocation55_spill] sm:$0xff] %v5098_v36  ;;  %v2055_v1 = vpop.f32.mrf.mxu1 }
 0x57c   : > { %1989 = vmatmul.f32.gmra.mxu3 %v5098_v36  ;;  %v5105_v63 = vadd.f32 %v2055_v1, %v1943_v32  ;;  %6197 = vst [vmem:[#allocation57_spill] sm:$0xff] %v5107_v8  ;;  %v3894_v1 = vld [vmem:[%s4250_s17 + $0xf78] sm:$0xff] }
 0x57d   : > { %v3910_v32 = vld [vmem:[%s4250_s17 + $0xff8] sm:$0xff]  ;;  %s3425_s17 = sshll.u32 %s288_s20, 5 }
 0x57e   : > { %s5999_s21 = scalar_lea.vmem [#allocation2], %s3425_s17 }
 0x57f   : > { %s3344_s28 = sshll.u32 %s5999_s21, 4  ;;  %s3345_s28 = int_to_ptr.vmem [resolvable:$true] %s3344_s28 }
 0x582   : > { %1805 = vxpose.xlu1.b32.cont [14/16] (narrow) %v3892_v4, 16  ;;  %v1945_v4 = vpop.f32.mrf.mxu0  ;;  %v5115_v36 = vpop.trf.xlu2 }
 0x583   : > { %1837 = vxpose.xlu0.b32.cont [14/16] (narrow) %v3908_v24, 16  ;;  %2102 = vmatmul.f32.gmra.mxu2 %v5100_v61  ;;  %v1946_v24 = vadd.f32 %v4924_v41, %v1945_v4  ;;  %v2058_v27 = vpop.f32.mrf.mxu1  ;;  %6198 = vst [vmem:[#allocation58_spill] sm:$0xff] %v5115_v36  ;;  %v5120_v61 = vpop.trf.xlu1 }
 0x584   : > { %1992 = vmatmul.f32.gmra.mxu3 %v5107_v8  ;;  %6199 = vst [vmem:[#allocation59_spill] sm:$0xff] %v5120_v61 }
 0x585   : > { %v5113_v47 = vadd.f32 %v2058_v27, %v1946_v24 }
 0x587   : > { %v2073_v55 = vpop.f32.mrf.mxu2 }
 0x58a   : > { %1806 = vxpose.xlu1.b32.cont [15/16] (narrow) %v3893_v42, 16  ;;  %v5122_v42 = vpop.f32.mrf.mxu0  ;;  %v5127_v4 = vpop.trf.xlu2 }
 0x58b   : > { %1838 = vxpose.xlu0.b32.cont [15/16] (narrow) %v3909_v2, 16  ;;  %2105 = vmatmul.f32.gmra.mxu2 %v5115_v36  ;;  %v5124_v2 = vpop.f32.mrf.mxu1  ;;  %6200 = vst [vmem:[#allocation60_spill] sm:$0xff] %v5127_v4  ;;  %v1949_v3 = vadd.f32 %v4924_v41, %v5122_v42 }
 0x58c   : > { %1995 = vmatmul.f32.gmra.mxu3 %v5120_v61  ;;  %v2120_v61 = vld [vmem:[%s6077_s4] sm:$0xff] }
 0x592   : > { %1807 = vxpose.xlu1.b32.end [16/16] (narrow) %v3894_v1, 16  ;;  %v5130_v27 = vpop.f32.mrf.mxu0  ;;  %v2121_v1 = vld [vmem:[%s6077_s4 + $0x8] sm:$0xff] }
 0x593   : > { %1839 = vxpose.xlu0.b32.end [16/16] (narrow) %v3910_v32, 16  ;;  %2108 = vmatmul.f32.gmra.mxu2 %v5127_v4  ;;  %v5132_v24 = vpop.f32.mrf.mxu1  ;;  %v1960_v4 = vpop.f32.mrf.mxu3 }
 0x594   : > { %2154 = vmatpush.msrb.mxu2 %v2121_v1  ;;  %v1961_v58 = vadd.f32 %v4924_v41, %v1960_v4 }
 0x596   : > { %2155 = vmatpush.msrb.mxu2 %v2120_v61  ;;  %v5144_v53 = vadd.f32 %v2073_v55, %v1961_v58 }
 0x59a   : > { %v1954_v32 = vpop.f32.mrf.mxu0 }
 0x59b   : > { %v1955_v36 = vadd.f32 %v4924_v41, %v1954_v32  ;;  %v2067_v8 = vpop.f32.mrf.mxu1 }
 0x59d   : > { %v5138_v60 = vadd.f32 %v2067_v8, %v1955_v36  ;;  %v1963_v36 = vpop.f32.mrf.mxu3  ;;  %v2076_v8 = vpop.f32.mrf.mxu2 }
 0x59e   : > { %v1964_v61 = vadd.f32 %v4924_v41, %v1963_v36 }
 0x5a0   : > { %v5154_v32 = vadd.f32 %v2076_v8, %v1964_v61  ;;  %v2118_v8 = vld [vmem:[%s302_s14] sm:$0xff]  ;;  %s4106_s14 = sshra.s32 %s3347_s9, 4  ;;  %s4107_s14 = int_to_ptr.hbm [resolvable:$true] %s4106_s14 }
 0x5a1   : > { %s4108_s15 = scalar_lea.hbm %s4107_s14, 32  ;;  %p4113_p1 = scmp.lt.s32.totalorder %s4107_s14, %s6080_s7 }
 0x5a2   : > { %v1957_v33 = vpop.f32.mrf.mxu0  ;;  %p4109_p12 = scmp.ne.s32.totalorder %s4107_s14, %s4108_s15  ;;  %p4114_p2 = scmp.lt.s32.totalorder %s4112_s19, %s4108_s15 }
 0x5a3   : > { %v1958_v54 = vadd.f32 %v4924_v41, %v1957_v33  ;;  %v2070_v9 = vpop.f32.mrf.mxu1 }
 0x5a4   : > { %p4110_p13 = pnand %p4109_p12, %p4236_p5  ;;  %p4115_p3 = por %p4114_p2, %p4113_p1 }
 0x5a5   : > { %v2071_v30 = vadd.f32 %v2070_v9, %v1958_v54 }
 0x5a6   : > { %p4111_p0 = pneg %p4110_p13 }
 0x5a8   : > { %p4116_p4 = pnand %p4115_p3, %p4111_p0 }
 0x5af   : > { %v1966_v58 = vpop.f32.mrf.mxu3 }
 0x5b0   : > { %v1967_v62 = vadd.f32 %v4924_v41, %v1966_v58 }
 0x5b6   : > { %v2079_v31 = vpop.f32.mrf.mxu2 }
 0x5b7   : > { %v5166_v36 = vadd.f32 %v2079_v31, %v1967_v62  ;;  %v1969_v61 = vpop.f32.mrf.mxu3 }
 0x5b8   : > { %v1970_v50 = vadd.f32 %v4924_v41, %v1969_v61 }
 0x5be   : > { %v5147_v21 = vpop.trf.xlu1 }
 0x5bf   : > { %6201 = vst [vmem:[#allocation61_spill] sm:$0xff] %v5147_v21  ;;  %v5149_v1 = vpop.trf.xlu0  ;;  %1998 = vmatmul.f32.gmra.mxu3 %v5147_v21  ;;  %v2082_v7 = vpop.f32.mrf.mxu2 }
 0x5c0   : > { %6202 = vst [vmem:[#allocation62_spill] sm:$0xff] %v5149_v1  ;;  %2111 = vmatmul.f32.gmra.mxu2 %v5149_v1  ;;  %v5169_v48 = vadd.f32 %v2082_v7, %v1970_v50 }
 0x5c6   : > { %v5156_v4 = vpop.trf.xlu1 }
 0x5c7   : > { %6203 = vst [vmem:[#allocation63_spill] sm:$0xff] %v5156_v4  ;;  %v5158_v55 = vpop.trf.xlu0  ;;  %2001 = vmatmul.f32.gmra.mxu3 %v5156_v4  ;;  %v1972_v43 = vpop.f32.mrf.mxu3 }
 0x5c8   : > { %6204 = vst [vmem:[#allocation64_spill] sm:$0xff] %v5158_v55  ;;  %2114 = vmatmul.f32.gmra.mxu2 %v5158_v55  ;;  %v2085_v51 = vpop.f32.mrf.mxu2  ;;  %v1973_v58 = vadd.f32 %v4924_v41, %v1972_v43 }
 0x5ca   : > { %v5172_v34 = vadd.f32 %v2085_v51, %v1973_v58 }
 0x5cf   : > { %v1975_v15 = vpop.f32.mrf.mxu3 }
 0x5d0   : > { %2156 = vmatmul.f32.vlgmr.msrb.gmra.mxu2 %v2118_v8  ;;  %v2088_v0 = vpop.f32.mrf.mxu2  ;;  %v1976_v31 = vadd.f32 %v4924_v41, %v1975_v15 }
 0x5d2   : > { %v5175_v62 = vadd.f32 %v2088_v0, %v1976_v31 }
 0x5d8   : > { %2159 = vmatmul.f32.gmra.mxu2 %v2119_v45  ;;  %v2091_v55 = vpop.f32.mrf.mxu2 }
 0x5df   : > { %v1978_v8 = vpop.f32.mrf.mxu3 }
 0x5e0   : > { %v1979_v61 = vadd.f32 %v4924_v41, %v1978_v8 }
 0x5e2   : > { %v5178_v50 = vadd.f32 %v2091_v55, %v1979_v61 }
 0x5e7   : > { %v1981_v7 = vpop.f32.mrf.mxu3  ;;  %v2094_v45 = vpop.f32.mrf.mxu2 }
 0x5e8   : > { %v1982_v4 = vadd.f32 %v4924_v41, %v1981_v7 }
 0x5ea   : > { %v5181_v40 = vadd.f32 %v2094_v45, %v1982_v4 }
 0x5ef   : > { %v1984_v43 = vpop.f32.mrf.mxu3 }
 0x5f6   : > { %v5183_v51 = vpop.f32.mrf.mxu2 }
 0x5f7   : > { %v1987_v58 = vpop.f32.mrf.mxu3 }
 0x5f8   : > { %v1988_v59 = vadd.f32 %v4924_v41, %v1987_v58  ;;  %v1952_v58 = vadd.f32 %v4924_v41, %v5130_v27 }
 0x5fe   : > { %v2100_v1 = vpop.f32.mrf.mxu2 }
 0x5ff   : > { %v1990_v15 = vpop.f32.mrf.mxu3 }
 0x600   : > { %v1991_v31 = vadd.f32 %v4924_v41, %v1990_v15  ;;  %v3994_v15 = vld [vmem:[%s6078_s5] ss:$0 sm:$0xff] }
 0x606   : > { %v2103_v0 = vpop.f32.mrf.mxu2 }
 0x607   : > { %v5186_v38 = vadd.f32 %v2103_v0, %v1991_v31  ;;  %v1993_v8 = vpop.f32.mrf.mxu3 }
 0x608   : > { %v1994_v55 = vadd.f32 %v4924_v41, %v1993_v8 }
 0x60e   : > { %v2106_v61 = vpop.f32.mrf.mxu2 }
 0x60f   : > { %v5189_v21 = vadd.f32 %v2106_v61, %v1994_v55  ;;  %v5197_v35 = vpop.f32.mrf.mxu3 }
 0x616   : > { %v5191_v7 = vpop.f32.mrf.mxu2 }
 0x642   : > { %v5204_v8 = vpop.f32.mrf.mxu3 }
 0x643   : > { %v5193_v4 = vpop.f32.mrf.mxu2 }
 0x64a   : > { %v2002_v9 = vpop.f32.mrf.mxu3 }
 0x64b   : > { %v5195_v45 = vpop.f32.mrf.mxu2 }
 0x653   : > { %v2157_v0 = vpop.f32.mrf.mxu2 }
 0x654   : > { %v5202_v31 = vadd.f32 %v3994_v15, %v2157_v0 }
 0x656   : > { %v2179_v55 = vperm.slane %v5202_v31, 0  ;;  %v2165_v61 = vrot.slane %v5202_v31, 1  ;;  %v2168_v0 = vrot.slane %v5202_v31, 4  ;;  %v2170_v13 = vrot.slane %v5202_v31, 6 }
 0x658   : > { %v2211_v19 = vadd.f32 %v2179_v55, %v4933_v52  ;;  %v2180_v11 = vperm.slane %v2165_v61, 0  ;;  %v2212_v49 = vadd.f32 %v2179_v55, %v4949_v5  ;;  %v2183_v28 = vperm.slane %v2168_v0, 0 }
 0x659   : > { %v5229_v23 = vperm.slane %v2170_v13, 0  ;;  %v2062_v5 = vadd.f32 %v5124_v2, %v1949_v3  ;;  %v2169_v3 = vrot.slane %v5202_v31, 5  ;;  %v1985_v2 = vadd.f32 %v4924_v41, %v1984_v43 }
 0x65a   : > { %v2243_v39 = vmax.f32 %v2211_v19, 0.0  ;;  %v2214_v26 = vadd.f32 %v2180_v11, %v4979_v56  ;;  %v2171_v19 = vrot.slane %v5202_v31, 7  ;;  %v2220_v0 = vadd.f32 %v2183_v28, %v5074_v6 }
 0x65b   : > { %v2160_v52 = vpop.f32.mrf.mxu2 }
 0x65c   : > { %v5222_v44 = vadd.f32 %v3994_v15, %v2160_v52  ;;  %v2279_v33 = vmul.f32 %v5212_v16, %v2243_v39  ;;  %v2246_v61 = vmax.f32 %v2214_v26, 0.0  ;;  %v2244_v39 = vmax.f32 %v2212_v49, 0.0 }
 0x65d   : > { %v2101_v26 = vadd.f32 %v2100_v1, %v1988_v59  ;;  %v2213_v52 = vadd.f32 %v2180_v11, %v4964_v29  ;;  %v5239_v13 = vperm.slane %v2171_v19, 0  ;;  %v2224_v59 = vadd.f32 %v5229_v23, %v2062_v5 }
 0x65e   : > { %2311 = vadd.xlane.f32.xlu2 %v2279_v33  ;;  %v2282_v56 = vmul.f32 %v5212_v16, %v2246_v61  ;;  %v2187_v25 = vperm.slane %v5222_v44, 0  ;;  %v2176_v42 = vrot.slane %v5222_v44, 5  ;;  %v2175_v55 = vrot.slane %v5222_v44, 4 }
 0x65f   : > { %v2003_v1 = vadd.f32 %v4924_v41, %v2002_v9  ;;  %v2280_v33 = vmul.f32 %v5212_v16, %v2244_v39  ;;  %v2252_v19 = vmax.f32 %v2220_v0, 0.0  ;;  %v2098_v5 = vadd.f32 %v5183_v51, %v1985_v2 }
 0x660   : > { %2317 = vadd.xlane.f32.xlu0 %v2282_v56  ;;  %v2227_v54 = vadd.f32 %v2187_v25, %v2071_v30  ;;  %v5234_v15 = vperm.slane %v2176_v42, 0  ;;  %v2065_v30 = vadd.f32 %v5132_v24, %v1952_v58  ;;  %v2191_v29 = vperm.slane %v2175_v55, 0 }
 0x661   : > { %v2228_v61 = vadd.f32 %v2187_v25, %v5144_v53  ;;  %v2245_v56 = vmax.f32 %v2213_v52, 0.0  ;;  %v2184_v42 = vperm.slane %v2169_v3, 0  ;;  %v2256_v58 = vmax.f32 %v2224_v59, 0.0 }
 0x662   : > { %v2259_v27 = vmax.f32 %v2227_v54, 0.0  ;;  %v2237_v49 = vadd.f32 %v5234_v15, %v2101_v26  ;;  %v5251_v43 = vadd.f32 %v5239_v13, %v2065_v30  ;;  %v2172_v39 = vrot.slane %v5222_v44, 1 }
 0x663   : > { %v2178_v26 = vrot.slane %v5222_v44, 7  ;;  %v2167_v9 = vrot.slane %v5202_v31, 3  ;;  %v2116_v25 = vadd.f32 %v5195_v45, %v2003_v1  ;;  %v2236_v53 = vadd.f32 %v2191_v29, %v2098_v5 }
 0x664   : > { %v2295_v6 = vmul.f32 %v5212_v16, %v2259_v27  ;;  %v2269_v11 = vmax.f32 %v2237_v49, 0.0  ;;  %v2260_v54 = vmax.f32 %v2228_v61, 0.0  ;;  %v2173_v55 = vrot.slane %v5222_v44, 2 }
 0x665   : > { %v2288_v51 = vmul.f32 %v5212_v16, %v2252_v19  ;;  %v2281_v0 = vmul.f32 %v5212_v16, %v2245_v56  ;;  %v2257_v52 = vmax.f32 %v5251_v43, 0.0  ;;  %v5264_v3 = vadd.f32 %v2184_v42, %v5105_v63 }
 0x666   : > { %2343 = vadd.xlane.f32.xlu1 %v2295_v6  ;;  %2313 = vadd.xlane.f32.xlu2 %v2280_v33  ;;  %v2305_v24 = vmul.f32 %v5212_v16, %v2269_v11  ;;  %v2292_v2 = vmul.f32 %v5212_v16, %v2256_v58  ;;  %v5267_v27 = vperm.slane %v2172_v39, 0  ;;  %v2177_v45 = vrot.slane %v5222_v44, 6 }
 0x667   : > { %v2189_v49 = vperm.slane %v2173_v55, 0  ;;  %v5270_v59 = vperm.slane %v2178_v26, 0  ;;  %v2182_v30 = vperm.slane %v2167_v9, 0  ;;  %v2174_v1 = vrot.slane %v5222_v44, 3 }
 0x668   : > { %2363 = vadd.xlane.f32.xlu0 %v2305_v24  ;;  %v2219_v33 = vadd.f32 %v2183_v28, %v5054_v10  ;;  %v2268_v6 = vmax.f32 %v2236_v53, 0.0  ;;  %v2296_v11 = vmul.f32 %v5212_v16, %v2260_v54  ;;  %v2193_v24 = vperm.slane %v2177_v45, 0 }
 0x669   : > { %v2231_v63 = vadd.f32 %v2189_v49, %v5169_v48  ;;  %v2232_v61 = vadd.f32 %v2189_v49, %v5172_v34  ;;  %v2217_v19 = vadd.f32 %v2182_v30, %v5024_v37  ;;  %v2218_v56 = vadd.f32 %v2182_v30, %v5039_v22 }
 0x66a   : > { %v2190_v43 = vperm.slane %v2174_v1, 0  ;;  %v2251_v5 = vmax.f32 %v2219_v33, 0.0  ;;  %v2235_v28 = vadd.f32 %v2191_v29, %v5181_v40  ;;  %v2221_v54 = vadd.f32 %v2184_v42, %v5094_v46 }
 0x66b   : > { %v2263_v58 = vmax.f32 %v2231_v63, 0.0  ;;  %v2264_v44 = vmax.f32 %v2232_v61, 0.0  ;;  %v2249_v10 = vmax.f32 %v2217_v19, 0.0  ;;  %v2250_v39 = vmax.f32 %v2218_v56, 0.0 }
 0x66c   : > { %v2233_v26 = vadd.f32 %v2190_v43, %v5175_v62  ;;  %v2234_v48 = vadd.f32 %v2190_v43, %v5178_v50  ;;  %v5289_v22 = vmul.f32 %v5212_v16, %v2251_v5  ;;  %v2267_v9 = vmax.f32 %v2235_v28, 0.0 }
 0x66d   : > { %v5283_v34 = vmul.f32 %v5212_v16, %v2263_v58  ;;  %v5286_v37 = vmul.f32 %v5212_v16, %v2264_v44  ;;  %v5292_v53 = vmul.f32 %v5212_v16, %v2249_v10  ;;  %v5295_v40 = vmul.f32 %v5212_v16, %v2250_v39 }
 0x66e   : > { %2329 = vadd.xlane.f32.xlu1 %v2288_v51  ;;  %2315 = vadd.xlane.f32.xlu2 %v2281_v0  ;;  %v2265_v62 = vmax.f32 %v2233_v26, 0.0  ;;  %v2266_v29 = vmax.f32 %v2234_v48, 0.0  ;;  %v5298_v50 = vmul.f32 %v5212_v16, %v2267_v9  ;;  %v2238_v55 = vadd.f32 %v5234_v15, %v5186_v38 }
 0x66f   : > { %v2239_v51 = vadd.f32 %v2193_v24, %v5189_v21  ;;  %v2229_v0 = vadd.f32 %v5267_v27, %v5154_v32  ;;  %v2226_v49 = vadd.f32 %v5239_v13, %v5138_v60  ;;  %v2304_v30 = vmul.f32 %v5212_v16, %v2268_v6 }
 0x670   : > { %2337 = vadd.xlane.f32.xlu0 %v2292_v2  ;;  %v2301_v2 = vmul.f32 %v5212_v16, %v2265_v62  ;;  %v2302_v45 = vmul.f32 %v5212_v16, %v2266_v29  ;;  %v2253_v1 = vmax.f32 %v2221_v54, 0.0  ;;  %v2270_v33 = vmax.f32 %v2238_v55, 0.0 }
 0x671   : > { %v2271_v46 = vmax.f32 %v2239_v51, 0.0  ;;  %v2293_v42 = vmul.f32 %v5212_v16, %v2257_v52  ;;  %v2242_v38 = vadd.f32 %v5270_v59, %v2116_v25  ;;  %v2258_v21 = vmax.f32 %v2226_v49, 0.0 }
 0x672   : > { %v2289_v32 = vmul.f32 %v5212_v16, %v2253_v1  ;;  %v5315_v15 = vmul.f32 %v5212_v16, %v2270_v33  ;;  %v2254_v13 = vmax.f32 %v5264_v3, 0.0  ;;  %v2261_v52 = vmax.f32 %v2229_v0, 0.0 }
 0x673   : > { %v5318_v63 = vmul.f32 %v5212_v16, %v2271_v46  ;;  %v5321_v60 = vmul.f32 %v5212_v16, %v2258_v21  ;;  %v2274_v6 = vmax.f32 %v2242_v38, 0.0  ;;  %v2166_v25 = vrot.slane %v5202_v31, 2 }
 0x674   : > { %v2297_v61 = vmul.f32 %v5212_v16, %v2261_v52  ;;  %v2223_v19 = vadd.f32 %v5229_v23, %v5113_v47  ;;  %v2230_v56 = vadd.f32 %v5267_v27, %v5166_v36  ;;  %v1997_v43 = vadd.f32 %v4924_v41, %v5197_v35 }
 0x675   : > { %v2310_v3 = vmul.f32 %v5212_v16, %v2274_v6  ;;  %v2181_v58 = vperm.slane %v2166_v25, 0  ;;  %v2000_v35 = vadd.f32 %v4924_v41, %v5204_v8 }
 0x676   : > { %2361 = vadd.xlane.f32.xlu1 %v2304_v30  ;;  %2345 = vadd.xlane.f32.xlu2 %v2296_v11  ;;  %v2290_v11 = vmul.f32 %v5212_v16, %v2254_v13  ;;  %v2255_v5 = vmax.f32 %v2223_v19, 0.0  ;;  %v2262_v31 = vmax.f32 %v2230_v56, 0.0  ;;  %v2110_v44 = vadd.f32 %v5191_v7, %v1997_v43 }
 0x677   : > { %v2215_v36 = vadd.f32 %v2181_v58, %v4994_v17  ;;  %v2113_v39 = vadd.f32 %v5193_v4, %v2000_v35  ;;  %v2216_v9 = vadd.f32 %v2181_v58, %v5009_v57 }
 0x678   : > { %2339 = vadd.xlane.f32.xlu0 %v2293_v42  ;;  %v2291_v28 = vmul.f32 %v5212_v16, %v2255_v5  ;;  %v2298_v23 = vmul.f32 %v5212_v16, %v2262_v31  ;;  %v2240_v47 = vadd.f32 %v2193_v24, %v2110_v44 }
 0x679   : > { %v2247_v10 = vmax.f32 %v2215_v36, 0.0  ;;  %v2241_v48 = vadd.f32 %v5270_v59, %v2113_v39  ;;  %v2248_v24 = vmax.f32 %v2216_v9, 0.0 }
 0x67a   : > { %v2272_v27 = vmax.f32 %v2240_v47, 0.0 }
 0x67b   : > { %v2283_v7 = vmul.f32 %v5212_v16, %v2247_v10  ;;  %v2273_v17 = vmax.f32 %v2241_v48, 0.0  ;;  %v2284_v8 = vmul.f32 %v5212_v16, %v2248_v24 }
 0x67c   : > { %v2308_v26 = vmul.f32 %v5212_v16, %v2272_v27 }
 0x67d   : > { %v2309_v41 = vmul.f32 %v5212_v16, %v2273_v17 }
 0x67e   : > { %2333 = vadd.xlane.f32.xlu1 %v2290_v11  ;;  %2347 = vadd.xlane.f32.xlu2 %v2297_v61 }
 0x680   : > { %2373 = vadd.xlane.f32.xlu0 %v2310_v3 }
 0x686   : > { %2335 = vadd.xlane.f32.xlu1 %v2291_v28  ;;  %2349 = vadd.xlane.f32.xlu2 %v2298_v23 }
 0x68e   : > { %2369 = vadd.xlane.f32.xlu1 %v2308_v26  ;;  %2319 = vadd.xlane.f32.xlu2 %v2283_v7 }
 0x696   : > { %2371 = vadd.xlane.f32.xlu1 %v2309_v41  ;;  %2321 = vadd.xlane.f32.xlu2 %v2284_v8  ;;  %v6205_v41 = vld [vmem:[#allocation5_spill] sm:$0xff] }
 0x69e   : > { %2351 = vadd.xlane.f32.xlu2 %v5283_v34 }
 0x6a6   : > { %2353 = vadd.xlane.f32.xlu2 %v5286_v37 }
 0x6ae   : > { %2323 = vadd.xlane.f32.xlu2 %v5292_v53 }
 0x6b6   : > { %2325 = vadd.xlane.f32.xlu2 %v5295_v40 }
 0x6be   : > { %2355 = vadd.xlane.f32.xlu2 %v2301_v2 }
 0x6c6   : > { %2357 = vadd.xlane.f32.xlu2 %v2302_v45 }
 0x6ce   : > { %2327 = vadd.xlane.f32.xlu2 %v5289_v22 }
 0x6d1   : > { %v2312_v57 = vpop.xlane.xlu2 %2311 }
 0x6d3   : > { %v2318_v34 = vpop.xlane.xlu0 %2317 }
 0x6d6   : > { %2359 = vadd.xlane.f32.xlu2 %v5298_v50 }
 0x6d9   : > { %v5353_v4 = vpop.xlane.xlu1 %2343  ;;  %v2314_v16 = vpop.xlane.xlu2 %2313 }
 0x6da   : > { %v2375_v59 = vmax.f32 %v2312_v57, %v2314_v16 }
 0x6dc   : > { %v2376_v62 = vrot.slane %v2375_v59, 4 }
 0x6de   : > { %v2377_v29 = vmax.f32 %v2375_v59, %v2376_v62  ;;  %2331 = vadd.xlane.f32.xlu2 %v2289_v32  ;;  %v6206_v62 = vld [vmem:[#allocation6_spill] sm:$0xff] }
 0x6e0   : > { %v2378_v37 = vrot.slane %v2377_v29, 2 }
 0x6e1   : > { %v5355_v54 = vpop.xlane.xlu1 %2329  ;;  %v2316_v53 = vpop.xlane.xlu2 %2315 }
 0x6e2   : > { %v2379_v40 = vmax.f32 %v2377_v29, %v2378_v37  ;;  %v2382_v55 = vmax.f32 %v2316_v53, %v2318_v34 }
 0x6e4   : > { %v2380_v51 = vrot.slane %v2379_v40, 1  ;;  %v2383_v0 = vrot.slane %v2382_v55, 4 }
 0x6e6   : > { %v2381_v22 = vmax.f32 %v2379_v40, %v2380_v51  ;;  %v2384_v2 = vmax.f32 %v2382_v55, %v2383_v0  ;;  %2365 = vadd.xlane.f32.xlu2 %v5315_v15  ;;  %v5362_v15 = vpop.xlane.xlu0 %2363 }
 0x6e8   : > { %v2487_v50 = vsub.f32 %v2312_v57, %v2381_v22  ;;  %v2488_v45 = vsub.f32 %v2314_v16, %v2381_v22  ;;  %v2385_v49 = vrot.slane %v2384_v2, 2 }
 0x6e9   : > { %v5358_v30 = vpop.xlane.xlu1 %2361  ;;  %v2346_v1 = vpop.xlane.xlu2 %2345 }
 0x6ea   : > { %v2519_v33 = vmul.f32 1.442695, %v2487_v50  ;;  %v2521_v46 = vmul.f32 1.442695, %v2488_v45  ;;  %v2386_v42 = vmax.f32 %v2384_v2, %v2385_v49  ;;  %v2431_v38 = vmax.f32 %v5353_v4, %v2346_v1 }
 0x6ec   : > { %3996 = vpow2.f32 %v2519_v33  ;;  %v2387_v21 = vrot.slane %v2386_v42, 1  ;;  %v2432_v32 = vrot.slane %v2431_v38, 4 }
 0x6ed   : > { %3998 = vpow2.f32 %v2521_v46 }
 0x6ee   : > { %v2388_v13 = vmax.f32 %v2386_v42, %v2387_v21  ;;  %v2433_v52 = vmax.f32 %v2431_v38, %v2432_v32  ;;  %2367 = vadd.xlane.f32.xlu2 %v5318_v63  ;;  %v5378_v17 = vpop.xlane.xlu0 %2337 }
 0x6f0   : > { %v2489_v6 = vsub.f32 %v2316_v53, %v2388_v13  ;;  %v2490_v25 = vsub.f32 %v2318_v34, %v2388_v13  ;;  %v2434_v11 = vrot.slane %v2433_v52, 2  ;;  %v6207_v34 = vld [vmem:[#allocation7_spill] sm:$0xff]  ;;  %v6208_v53 = vld [vmem:[#allocation8_spill] sm:$0xff] }
 0x6f1   : > { %v5364_v61 = vpop.xlane.xlu1 %2333  ;;  %v5366_v19 = vpop.xlane.xlu2 %2347 }
 0x6f2   : > { %v3997_v56 = vpop.eup %3996  ;;  %v2523_v43 = vmul.f32 1.442695, %v2489_v6  ;;  %v2525_v3 = vmul.f32 1.442695, %v2490_v25  ;;  %v2435_v5 = vmax.f32 %v2433_v52, %v2434_v11 }
 0x6f3   : > { %v3999_v31 = vpop.eup %3998  ;;  %v2695_v58 = vmul.f32 %v3997_v56, %v4774_v12  ;;  %v2696_v44 = vmul.f32 %v3997_v56, %v4777_v14 }
 0x6f4   : > { %v2583_v28 = vadd.f32 %v3999_v31, %v3997_v56  ;;  %v2697_v63 = vmul.f32 %v3999_v31, %v4786_v18  ;;  %v2698_v23 = vmul.f32 %v3999_v31, %v4789_v20  ;;  %4000 = vpow2.f32 %v2523_v43 }
 0x6f5   : > { %4002 = vpow2.f32 %v2525_v3  ;;  %v2436_v47 = vrot.slane %v2435_v5, 1 }
 0x6f6   : > { %v2584_v36 = vrot.slane %v2583_v28, 4  ;;  %v2759_v35 = vadd.f32 %v2697_v63, %v2695_v58  ;;  %v2766_v27 = vadd.f32 %v2698_v23, %v2696_v44  ;;  %2341 = vadd.xlane.f32.xlu2 %v5321_v60 }
 0x6f7   : > { %v2437_v10 = vmax.f32 %v2435_v5, %v2436_v47  ;;  %v5392_v47 = vpop.xlane.xlu0 %2339 }
 0x6f8   : > { %v2585_v39 = vadd.f32 %v2584_v36, %v2583_v28  ;;  %v2760_v20 = vrot.slane %v2759_v35, 4  ;;  %v2767_v9 = vrot.slane %v2766_v27, 4 }
 0x6f9   : > { %v2503_v26 = vsub.f32 %v5353_v4, %v2437_v10  ;;  %v2504_v12 = vsub.f32 %v2346_v1, %v2437_v10  ;;  %v5374_v7 = vpop.xlane.xlu1 %2335  ;;  %v5376_v14 = vpop.xlane.xlu2 %2349 }
 0x6fa   : > { %v4001_v18 = vpop.eup %4000  ;;  %v2586_v48 = vrot.slane %v2585_v39, 2  ;;  %v2417_v16 = vmax.f32 %v5374_v7, %v5378_v17  ;;  %v2761_v51 = vadd.f32 %v2760_v20, %v2759_v35  ;;  %v2768_v22 = vadd.f32 %v2767_v9, %v2766_v27 }
 0x6fb   : > { %v4003_v24 = vpop.eup %4002  ;;  %v2699_v8 = vmul.f32 %v4001_v18, %v6205_v41  ;;  %v2551_v57 = vmul.f32 1.442695, %v2503_v26  ;;  %v2553_v60 = vmul.f32 1.442695, %v2504_v12  ;;  %v2700_v29 = vmul.f32 %v4001_v18, %v6206_v62 }
 0x6fc   : > { %v2587_v4 = vadd.f32 %v2586_v48, %v2585_v39  ;;  %v2590_v59 = vadd.f32 %v4003_v24, %v4001_v18  ;;  %v2701_v37 = vmul.f32 %v4003_v24, %v6207_v34  ;;  %v2702_v40 = vmul.f32 %v4003_v24, %v6208_v53 }
 0x6fd   : > { %4004 = vpow2.f32 %v2551_v57  ;;  %v2418_v50 = vrot.slane %v2417_v16, 4  ;;  %v2438_v33 = vmax.f32 %v5366_v19, %v5376_v14  ;;  %v2762_v42 = vrot.slane %v2761_v51, 2 }
 0x6fe   : > { %v2588_v55 = vrot.slane %v2587_v4, 1  ;;  %v2591_v0 = vrot.slane %v2590_v59, 4  ;;  %v2773_v2 = vadd.f32 %v2701_v37, %v2699_v8  ;;  %4006 = vpow2.f32 %v2553_v60  ;;  %v6209_v60 = vld [vmem:[#allocation33_spill] sm:$0xff] }
 0x6ff   : > { %v2780_v1 = vadd.f32 %v2702_v40, %v2700_v29  ;;  %v2769_v32 = vrot.slane %v2768_v22, 2  ;;  %v2419_v52 = vmax.f32 %v2417_v16, %v2418_v50  ;;  %v2763_v56 = vadd.f32 %v2762_v42, %v2761_v51  ;;  %v6212_v50 = vld [vmem:[#allocation36_spill] sm:$0xff] }
 0x700   : > { %v2589_v45 = vadd.f32 %v2588_v55, %v2587_v4  ;;  %v2592_v49 = vadd.f32 %v2591_v0, %v2590_v59  ;;  %v2774_v38 = vrot.slane %v2773_v2, 4  ;;  %v2439_v12 = vrot.slane %v2438_v33, 4  ;;  %v6210_v4 = vld [vmem:[#allocation35_spill] sm:$0xff] }
 0x701   : > { %v5388_v46 = vpop.xlane.xlu2 %2319  ;;  %v2781_v6 = vrot.slane %v2780_v1, 4  ;;  %v5390_v5 = vpop.xlane.xlu1 %2369  ;;  %v2770_v31 = vadd.f32 %v2769_v32, %v2768_v22  ;;  %v2420_v44 = vrot.slane %v2419_v52, 2  ;;  %v2764_v10 = vrot.slane %v2763_v56, 1  ;;  %v6211_v22 = vld [vmem:[#allocation34_spill] sm:$0xff] }
 0x702   : > { %4008 = vrcp.f32 %v2589_v45  ;;  %v2593_v13 = vrot.slane %v2592_v49, 2  ;;  %v2775_v43 = vadd.f32 %v2774_v38, %v2773_v2  ;;  %v2992_v9 = vand.u32 2147483647, %v2589_v45 }
 0x703   : > { %v4005_v21 = vpop.eup %4004  ;;  %v2782_v63 = vadd.f32 %v2781_v6, %v2780_v1  ;;  %v2771_v18 = vrot.slane %v2770_v31, 1  ;;  %v2421_v20 = vmax.f32 %v2419_v52, %v2420_v44  ;;  %v2994_v24 = vand.u32 2147483648, %v2589_v45 }
 0x704   : > { %v4007_v25 = vpop.eup %4006  ;;  %v2594_v11 = vadd.f32 %v2593_v13, %v2592_v49  ;;  %v2776_v39 = vrot.slane %v2775_v43, 2  ;;  %v2727_v16 = vmul.f32 %v4005_v21, %v6209_v60  ;;  %v2765_v62 = vadd.f32 %v2764_v10, %v2763_v56 }
 0x705   : > { %v2639_v3 = vadd.f32 %v4007_v25, %v4005_v21  ;;  %v2783_v41 = vrot.slane %v2782_v63, 2  ;;  %v2729_v59 = vmul.f32 %v4007_v25, %v6210_v4  ;;  %v2440_v37 = vmax.f32 %v2438_v33, %v2439_v12 }
 0x706   : > { %v2595_v58 = vrot.slane %v2594_v11, 1  ;;  %v2777_v29 = vadd.f32 %v2776_v39, %v2775_v43  ;;  %v2772_v53 = vadd.f32 %v2771_v18, %v2770_v31  ;;  %vm2988_vm1 = vweird.f32 %v2589_v45 }
 0x707   : > { %v2640_v23 = vrot.slane %v2639_v3, 4  ;;  %v2422_v55 = vrot.slane %v2421_v20, 1  ;;  %v2995_v51 = vor.u32 1.1754944e-38, %v2994_v24  ;;  %v2784_v0 = vadd.f32 %v2783_v41, %v2782_v63 }
 0x708   : > { %v4009_v28 = vpop.eup %4008  ;;  %v5394_v35 = vadd.f32 %v2595_v58, %v2594_v11  ;;  %v2728_v2 = vmul.f32 %v4005_v21, %v6211_v22  ;;  %v2730_v49 = vmul.f32 %v4007_v25, %v6212_v50  ;;  %vm2993_vm3 = vcmp.eq.f32.partialorder %v2992_v9, 8.507059e+37  ;;  %v5408_v11 = vpop.xlane.xlu0 %2373 }
 0x709   : > { %v2984_v36 = vmul.f32 %v4009_v28, %v2589_v45  ;;  %v5396_v27 = vpop.xlane.xlu2 %2321  ;;  %v2641_v26 = vadd.f32 %v2640_v23, %v2639_v3  ;;  %vm2989_vm0 = vweird.f32 %v4009_v28  ;;  %v5403_v1 = vpop.xlane.xlu1 %2371  ;;  %v2871_v13 = vadd.f32 %v2729_v59, %v2727_v16 }
 0x70a   : > { %4010 = vrcp.f32 %v5394_v35  ;;  %vm2990_vm2 = vmor %vm2988_vm1, %vm2989_vm0  ;;  %v2778_v6 = vrot.slane %v2777_v29, 1  ;;  %v2441_v56 = vrot.slane %v2440_v37, 2  ;;  %v2423_v3 = vmax.f32 %v2421_v20, %v2422_v55 }
 0x70b   : > { %v2985_v48 = vsub.f32 1.0, %v2984_v36  ;;  %v2642_v8 = vrot.slane %v2641_v26, 2  ;;  %v2480_v25 = vmax.f32 %v5403_v1, %v5408_v11  ;;  %v2785_v31 = vrot.slane %v2784_v0, 1 }
 0x70c   : > { %v2878_v44 = vadd.f32 %v2730_v49, %v2728_v2  ;;  %v3009_v63 = vand.u32 2147483648, %v5394_v35  ;;  %v2872_v36 = vrot.slane %v2871_v13, 4  ;;  %v2779_v10 = vadd.f32 %v2778_v6, %v2777_v29 }
 0x70d   : > { %v2986_v57 = vmul.f32 %v4009_v28, %v2985_v48  ;;  %v2643_v34 = vadd.f32 %v2642_v8, %v2641_v26  ;;  %v2442_v26 = vmax.f32 %v2440_v37, %v2441_v56  ;;  %vm3003_vm6 = vweird.f32 %v5394_v35 }
 0x70e   : > { %v2499_v12 = vsub.f32 %v5374_v7, %v2423_v3  ;;  %v2481_v18 = vrot.slane %v2480_v25, 4  ;;  %v2389_v48 = vmax.f32 %v5388_v46, %v5396_v27  ;;  %v2786_v20 = vadd.f32 %v2785_v31, %v2784_v0 }
 0x70f   : > { %v2987_v40 = vadd.f32 %v4009_v28, %v2986_v57  ;;  %v2644_v32 = vrot.slane %v2643_v34, 1  ;;  %v2500_v24 = vsub.f32 %v5378_v17, %v2423_v3  ;;  %v2443_v41 = vrot.slane %v2442_v26, 1 }
 0x710   : > { %v4011_v42 = vpop.eup %4010  ;;  %v3010_v8 = vor.u32 1.1754944e-38, %v3009_v63  ;;  %v2482_v57 = vmax.f32 %v2480_v25, %v2481_v18  ;;  %v2390_v7 = vrot.slane %v2389_v48, 4  ;;  %v2543_v29 = vmul.f32 1.442695, %v2499_v12  ;;  %v6213_v12 = vld [vmem:[#allocation37_spill] sm:$0xff] }
 0x711   : > { %v2991_v38 = vsel %vm2990_vm2, %v4009_v28, %v2987_v40  ;;  %v5405_v52 = vpop.xlane.xlu2 %2351  ;;  %v2999_v45 = vmul.f32 %v4011_v42, %v5394_v35  ;;  %v3007_v28 = vand.u32 2147483647, %v5394_v35  ;;  %v5414_v23 = vadd.f32 %v2644_v32, %v2643_v34 }
 0x712   : > { %v2996_v33 = vsel %vm2993_vm3, %v2995_v51, %v2991_v38  ;;  %vm3004_vm5 = vweird.f32 %v4011_v42  ;;  %v2444_v16 = vmax.f32 %v2442_v26, %v2443_v41  ;;  %v2483_v34 = vrot.slane %v2482_v57, 2  ;;  %v6214_v41 = vld [vmem:[#allocation38_spill] sm:$0xff] }
 0x713   : > { %v3223_v43 = vmul.f32 %v2996_v33, %v2765_v62  ;;  %v3224_v21 = vmul.f32 %v2996_v33, %v2772_v53  ;;  %v3000_v58 = vsub.f32 1.0, %v2999_v45  ;;  %vm3005_vm7 = vmor %vm3003_vm6, %vm3004_vm5  ;;  %vm3008_vm8 = vcmp.eq.f32.partialorder %v3007_v28, 8.507059e+37 }
 0x714   : > { %4012 = vrcp.f32 %v5414_v23  ;;  %v2879_v62 = vrot.slane %v2878_v44, 4  ;;  %v2545_v53 = vmul.f32 1.442695, %v2500_v24  ;;  %v2505_v40 = vsub.f32 %v5366_v19, %v2444_v16 }
 0x715   : > { %v3001_v39 = vmul.f32 %v4011_v42, %v3000_v58  ;;  %v2506_v55 = vsub.f32 %v5376_v14, %v2444_v16  ;;  %v2484_v51 = vmax.f32 %v2482_v57, %v2483_v34  ;;  %v2391_v2 = vmax.f32 %v2389_v48, %v2390_v7 }
 0x716   : > { %v2873_v49 = vadd.f32 %v2872_v36, %v2871_v13  ;;  %4014 = vpow2.f32 %v2543_v29  ;;  %v2555_v38 = vmul.f32 1.442695, %v2505_v40  ;;  %vm3108_vm9 = vweird.f32 %v5414_v23  ;;  %v6217_v29 = vld [vmem:[#allocation40_spill] sm:$0xff] }
 0x717   : > { %v3002_v9 = vadd.f32 %v4011_v42, %v3001_v39  ;;  %4016 = vpow2.f32 %v2545_v53  ;;  %v2557_v32 = vmul.f32 1.442695, %v2506_v55  ;;  %v2392_v33 = vrot.slane %v2391_v2, 2  ;;  %v6218_v53 = vld [vmem:[#allocation26_spill] sm:$0xff] }
 0x718   : > { %v2485_v19 = vrot.slane %v2484_v51, 1  ;;  %4018 = vpow2.f32 %v2555_v38 }
 0x719   : > { %v5422_v60 = vpop.xlane.xlu2 %2353  ;;  %v3006_v35 = vsel %vm3005_vm7, %v4011_v42, %v3002_v9  ;;  %v2880_v42 = vadd.f32 %v2879_v62, %v2878_v44  ;;  %v2393_v14 = vmax.f32 %v2391_v2, %v2392_v33  ;;  %4020 = vpow2.f32 %v2557_v32 }
 0x71a   : > { %v2445_v4 = vmax.f32 %v5405_v52, %v5422_v60  ;;  %v3011_v59 = vsel %vm3008_vm8, %v3010_v8, %v3006_v35  ;;  %v5434_v50 = vpop.eup %4012  ;;  %v2486_v13 = vmax.f32 %v2484_v51, %v2485_v19 }
 0x71b   : > { %v3225_v17 = vmul.f32 %v3011_v59, %v2779_v10  ;;  %v3226_v37 = vmul.f32 %v3011_v59, %v2786_v20  ;;  %v3104_v56 = vmul.f32 %v5434_v50, %v5414_v23  ;;  %v2394_v31 = vrot.slane %v2393_v14, 1 }
 0x71c   : > { %v2446_v45 = vrot.slane %v2445_v4, 4  ;;  %v4015_v3 = vpop.eup %4014  ;;  %v3114_v10 = vand.u32 2147483648, %v5414_v23  ;;  %v2517_v48 = vsub.f32 %v5403_v1, %v2486_v13  ;;  %v2518_v20 = vsub.f32 %v5408_v11, %v2486_v13  ;;  %v6215_v1 = vld [vmem:[#allocation39_spill] sm:$0xff]  ;;  %v6216_v11 = vld [vmem:[#allocation25_spill] sm:$0xff] }
 0x71d   : > { %v5429_v0 = vsel %vm3287_vm4, %v3225_v17, %v3223_v43  ;;  %v5432_v22 = vsel %vm3287_vm4, %v3226_v37, %v3224_v21  ;;  %v2874_v43 = vrot.slane %v2873_v49, 2  ;;  %v2881_v21 = vrot.slane %v2880_v42, 2  ;;  %v4017_v25 = vpop.eup %4016 }
 0x71e   : > { %v2447_v58 = vmax.f32 %v2445_v4, %v2446_v45  ;;  %v3105_v44 = vsub.f32 1.0, %v3104_v56  ;;  %v4019_v28 = vpop.eup %4018  ;;  %v2395_v39 = vmax.f32 %v2393_v14, %v2394_v31  ;;  %v2625_v26 = vadd.f32 %v4017_v25, %v4015_v3  ;;  %v6219_v56 = vld [vmem:[#allocation27_spill] sm:$0xff] }
 0x71f   : > { %v5440_v63 = vadd.f32 %v2874_v43, %v2873_v49  ;;  %v5442_v36 = vadd.f32 %v2881_v21, %v2880_v42  ;;  %v2731_v18 = vmul.f32 %v4019_v28, %v6213_v12  ;;  %v4021_v24 = vpop.eup %4020  ;;  %v2732_v8 = vmul.f32 %v4019_v28, %v6214_v41  ;;  %v6220_v21 = vld [vmem:[#allocation28_spill] sm:$0xff] }
 0x720   : > { %v2491_v57 = vsub.f32 %v5388_v46, %v2395_v39  ;;  %v2492_v35 = vsub.f32 %v5396_v27, %v2395_v39  ;;  %v2448_v16 = vrot.slane %v2447_v58, 2  ;;  %v3106_v7 = vmul.f32 %v5434_v50, %v3105_v44 }
 0x721   : > { %v5436_v6 = vpop.xlane.xlu2 %2323  ;;  %vm3109_vm10 = vweird.f32 %v5434_v50  ;;  %v2646_v4 = vadd.f32 %v4021_v24, %v4019_v28  ;;  %v2733_v59 = vmul.f32 %v4021_v24, %v6215_v1  ;;  %v2719_v62 = vmul.f32 %v4015_v3, %v6216_v11 }
 0x722   : > { %v2734_v34 = vmul.f32 %v4021_v24, %v6217_v29  ;;  %v2527_v17 = vmul.f32 1.442695, %v2491_v57  ;;  %v2529_v37 = vmul.f32 1.442695, %v2492_v35  ;;  %v2720_v40 = vmul.f32 %v4015_v3, %v6218_v53  ;;  %vm5476_vm11 = vmor %vm3108_vm9, %vm3109_vm10 }
 0x723   : > { %v2647_v55 = vrot.slane %v2646_v4, 4  ;;  %v2885_v46 = vadd.f32 %v2733_v59, %v2731_v18  ;;  %v2579_v51 = vmul.f32 1.442695, %v2517_v48  ;;  %v2626_v27 = vrot.slane %v2625_v26, 4 }
 0x724   : > { %v2892_v2 = vadd.f32 %v2734_v34, %v2732_v8  ;;  %v2581_v49 = vmul.f32 1.442695, %v2518_v20  ;;  %v2449_v42 = vmax.f32 %v2447_v58, %v2448_v16  ;;  %v3107_v38 = vadd.f32 %v5434_v50, %v3106_v7 }
 0x725   : > { %v2648_v32 = vadd.f32 %v2647_v55, %v2646_v4  ;;  %v2886_v33 = vrot.slane %v2885_v46, 4  ;;  %4022 = vpow2.f32 %v2527_v17  ;;  %v2721_v43 = vmul.f32 %v4017_v25, %v6219_v56 }
 0x726   : > { %v2893_v19 = vrot.slane %v2892_v2, 4  ;;  %4024 = vpow2.f32 %v2529_v37  ;;  %v2450_v14 = vrot.slane %v2449_v42, 1  ;;  %v2722_v3 = vmul.f32 %v4017_v25, %v6220_v21  ;;  %v6223_v37 = vld [vmem:[#allocation9_spill] sm:$0xff] }
 0x727   : > { %v2649_v13 = vrot.slane %v2648_v32, 2  ;;  %4026 = vpow2.f32 %v2579_v51  ;;  %v3112_v58 = vand.u32 2147483647, %v5414_v23  ;;  %v2627_v44 = vadd.f32 %v2626_v27, %v2625_v26 }
 0x728   : > { %4028 = vpow2.f32 %v2581_v49  ;;  %v2451_v28 = vmax.f32 %v2449_v42, %v2450_v14  ;;  %v2876_v39 = vrot.slane %v5440_v63, 1  ;;  %v2883_v12 = vrot.slane %v5442_v36, 1  ;;  %v6227_v14 = vld [vmem:[#allocation62_spill] sm:$0xff] }
 0x729   : > { %v5448_v9 = vpop.xlane.xlu2 %2325  ;;  %v2650_v25 = vadd.f32 %v2649_v13, %v2648_v32  ;;  %v3111_v48 = vsel %vm5476_vm11, %v5434_v50, %v3107_v38  ;;  %v2887_v26 = vadd.f32 %v2886_v33, %v2885_v46  ;;  %v2894_v20 = vadd.f32 %v2893_v19, %v2892_v2  ;;  %v6225_v2 = vld [vmem:[#allocation61_spill] sm:$0xff]  ;;  %v6226_v38 = vld [vmem:[#allocation11_spill] sm:$0xff] }
 0x72a   : > { %v5463_v45 = vmax.f32 %v5436_v6, %v5448_v9  ;;  %v2507_v24 = vsub.f32 %v5405_v52, %v2451_v28  ;;  %v3115_v8 = vor.u32 1.1754944e-38, %v3114_v10  ;;  %v5484_v57 = vadd.f32 %v2721_v43, %v2719_v62  ;;  %v6228_v43 = vld [vmem:[#allocation12_spill] sm:$0xff] }
 0x72b   : > { %v4023_v41 = vpop.eup %4022  ;;  %v5486_v35 = vadd.f32 %v2722_v3, %v2720_v40  ;;  %v2651_v23 = vrot.slane %v2650_v25, 1  ;;  %vm3113_vm12 = vcmp.eq.f32.partialorder %v3112_v58, 8.507059e+37  ;;  %v2628_v7 = vrot.slane %v2627_v44, 2  ;;  %v6229_v3 = vld [vmem:[#allocation63_spill] sm:$0xff] }
 0x72c   : > { %v4025_v16 = vpop.eup %4024  ;;  %v2877_v1 = vadd.f32 %v2876_v39, %v5440_v63  ;;  %v3116_v59 = vsel %vm3113_vm12, %v3115_v8, %v3111_v48  ;;  %v2884_v29 = vadd.f32 %v2883_v12, %v5442_v36  ;;  %v2888_v52 = vrot.slane %v2887_v26, 2  ;;  %v6224_v36 = vld [vmem:[#allocation10_spill] sm:$0xff]  ;;  %v6230_v12 = vld [vmem:[#allocation64_spill] sm:$0xff] }
 0x72d   : > { %v4027_v4 = vpop.eup %4026  ;;  %v5489_v11 = vadd.f32 %v2651_v23, %v2650_v25  ;;  %v2895_v34 = vrot.slane %v2894_v20, 2  ;;  %v2597_v10 = vadd.f32 %v4025_v16, %v4023_v41  ;;  %v2844_v62 = vrot.slane %v5484_v57, 4 }
 0x72e   : > { %v4029_v50 = vpop.eup %4028  ;;  %v2851_v17 = vrot.slane %v5486_v35, 4  ;;  %v2703_v53 = vmul.f32 %v4023_v41, %v6223_v37  ;;  %v5498_v63 = vmul.f32 %v3116_v59, %v2877_v1  ;;  %v5500_v55 = vmul.f32 %v3116_v59, %v2884_v29 }
 0x72f   : > { %4030 = vrcp.f32 %v5489_v11  ;;  %v5502_v46 = vadd.f32 %v2628_v7, %v2627_v44  ;;  %v2704_v51 = vmul.f32 %v4023_v41, %v6224_v36  ;;  %v2688_v27 = vadd.f32 %v4029_v50, %v4027_v4 }
 0x730   : > { %v5506_v49 = vmul.f32 %v4027_v4, %v6225_v2  ;;  %v2598_v42 = vrot.slane %v2597_v10, 4  ;;  %v2705_v32 = vmul.f32 %v4025_v16, %v6226_v38  ;;  %v2889_v33 = vadd.f32 %v2888_v52, %v2887_v26 }
 0x731   : > { %v5467_v31 = vpop.xlane.xlu2 %2355  ;;  %v2896_v19 = vadd.f32 %v2895_v34, %v2894_v20  ;;  %v5510_v56 = vmul.f32 %v4027_v4, %v6227_v14  ;;  %v2706_v21 = vmul.f32 %v4025_v16, %v6228_v43  ;;  %v5514_v13 = vmul.f32 %v4029_v50, %v6229_v3 }
 0x732   : > { %v2599_v58 = vadd.f32 %v2598_v42, %v2597_v10  ;;  %v2787_v44 = vadd.f32 %v2705_v32, %v2703_v53  ;;  %v2508_v39 = vsub.f32 %v5422_v60, %v2451_v28  ;;  %v5518_v18 = vmul.f32 %v4029_v50, %v6230_v12 }
 0x733   : > { %v2794_v25 = vadd.f32 %v2706_v21, %v2704_v51  ;;  %v2559_v48 = vmul.f32 1.442695, %v2507_v24  ;;  %v2397_v26 = vrot.slane %v5463_v45, 4  ;;  %v2689_v41 = vrot.slane %v2688_v27, 4 }
 0x734   : > { %v2600_v8 = vrot.slane %v2599_v58, 2  ;;  %v2788_v23 = vrot.slane %v2787_v44, 4  ;;  %v2561_v7 = vmul.f32 1.442695, %v2508_v39  ;;  %v2890_v16 = vrot.slane %v2889_v33, 1 }
 0x735   : > { %v4031_v20 = vpop.eup %4030  ;;  %v2897_v4 = vrot.slane %v2896_v19, 1  ;;  %v3127_v59 = vand.u32 2147483647, %v5489_v11  ;;  %v3129_v60 = vand.u32 2147483648, %v5489_v11  ;;  %v2795_v29 = vrot.slane %v2794_v25, 4 }
 0x736   : > { %v3119_v1 = vmul.f32 %v4031_v20, %v5489_v11  ;;  %v2601_v28 = vadd.f32 %v2600_v8, %v2599_v58  ;;  %v2789_v50 = vadd.f32 %v2788_v23, %v2787_v44  ;;  %4032 = vpow2.f32 %v2559_v48 }
 0x737   : > { %v2398_v24 = vmax.f32 %v5463_v45, %v2397_v26  ;;  %v2796_v36 = vadd.f32 %v2795_v29, %v2794_v25  ;;  %4034 = vpow2.f32 %v2561_v7  ;;  %vm3124_vm13 = vweird.f32 %v4031_v20 }
 0x738   : > { %v3120_v52 = vsub.f32 1.0, %v3119_v1  ;;  %v2602_v37 = vrot.slane %v2601_v28, 1  ;;  %v2790_v53 = vrot.slane %v2789_v50, 2  ;;  %v2891_v43 = vadd.f32 %v2890_v16, %v2889_v33 }
 0x739   : > { %v5496_v40 = vpop.xlane.xlu2 %2357  ;;  %v2399_v2 = vrot.slane %v2398_v24, 2  ;;  %v2797_v14 = vrot.slane %v2796_v36, 2  ;;  %vm3123_vm14 = vweird.f32 %v5489_v11  ;;  %v5534_v3 = vadd.f32 %v2689_v41, %v2688_v27 }
 0x73a   : > { %v2452_v34 = vmax.f32 %v5467_v31, %v5496_v40  ;;  %v3121_v51 = vmul.f32 %v4031_v20, %v3120_v52  ;;  %v5529_v38 = vadd.f32 %v2602_v37, %v2601_v28  ;;  %v2791_v32 = vadd.f32 %v2790_v53, %v2789_v50  ;;  %vm3125_vm15 = vmor %vm3123_vm14, %vm3124_vm13  ;;  %v6231_v50 = vld [vmem:[#allocation41_spill] sm:$0xff]  ;;  %v6232_v52 = vld [vmem:[#allocation42_spill] sm:$0xff] }
 0x73b   : > { %v3130_v58 = vor.u32 1.1754944e-38, %v3129_v60  ;;  %v2798_v39 = vadd.f32 %v2797_v14, %v2796_v36  ;;  %v2898_v25 = vadd.f32 %v2897_v4, %v2896_v19  ;;  %vm3128_vm0 = vcmp.eq.f32.partialorder %v3127_v59, 8.507059e+37  ;;  %v6233_v59 = vld [vmem:[#allocation43_spill] sm:$0xff] }
 0x73c   : > { %v2453_v42 = vrot.slane %v2452_v34, 4  ;;  %v3122_v21 = vadd.f32 %v4031_v20, %v3121_v51  ;;  %v2792_v44 = vrot.slane %v2791_v32, 1  ;;  %4036 = vrcp.f32 %v5529_v38  ;;  %v4033_v12 = vpop.eup %4032 }
 0x73d   : > { %v2400_v26 = vmax.f32 %v2398_v24, %v2399_v2  ;;  %v4035_v8 = vpop.eup %4034  ;;  %v3022_v33 = vand.u32 2147483647, %v5529_v38  ;;  %v3024_v1 = vand.u32 2147483648, %v5529_v38  ;;  %v2799_v60 = vrot.slane %v2798_v39, 1 }
 0x73e   : > { %v3126_v48 = vsel %vm3125_vm15, %v4031_v20, %v3122_v21  ;;  %v2454_v7 = vmax.f32 %v2452_v34, %v2453_v42  ;;  %v2793_v41 = vadd.f32 %v2792_v44, %v2791_v32  ;;  %v2653_v28 = vadd.f32 %v4035_v8, %v4033_v12  ;;  %v6234_v34 = vld [vmem:[#allocation44_spill] sm:$0xff] }
 0x73f   : > { %v3131_v23 = vsel %vm3128_vm0, %v3130_v58, %v3126_v48  ;;  %v2735_v29 = vmul.f32 %v4033_v12, %v6231_v50  ;;  %v2736_v19 = vmul.f32 %v4033_v12, %v6232_v52  ;;  %vm3018_vm1 = vweird.f32 %v5529_v38 }
 0x740   : > { %v3241_v11 = vmul.f32 %v3131_v23, %v2891_v43  ;;  %v3242_v27 = vmul.f32 %v3131_v23, %v2898_v25  ;;  %v2737_v24 = vmul.f32 %v4035_v8, %v6233_v59  ;;  %v2738_v37 = vmul.f32 %v4035_v8, %v6234_v34 }
 0x741   : > { %v5527_v10 = vpop.xlane.xlu2 %2327  ;;  %v2654_v36 = vrot.slane %v2653_v28, 4  ;;  %v2401_v51 = vrot.slane %v2400_v26, 1  ;;  %v2455_v2 = vrot.slane %v2454_v7, 2  ;;  %vm5553_vm2 = vcmp.eq.f32.partialorder %v3022_v33, 8.507059e+37 }
 0x742   : > { %v2403_v45 = vmax.f32 %v5527_v10, %v5355_v54  ;;  %v5543_v20 = vsel %vm3287_vm4, %v3241_v11, %v5498_v63  ;;  %v5547_v4 = vsel %vm3287_vm4, %v3242_v27, %v5500_v55  ;;  %v4037_v53 = vpop.eup %4036  ;;  %v2899_v14 = vadd.f32 %v2737_v24, %v2735_v29 }
 0x743   : > { %v3014_v32 = vmul.f32 %v4037_v53, %v5529_v38  ;;  %v2906_v55 = vadd.f32 %v2738_v37, %v2736_v19  ;;  %v2655_v43 = vadd.f32 %v2654_v36, %v2653_v28  ;;  %v2402_v21 = vmax.f32 %v2400_v26, %v2401_v51 }
 0x744   : > { %v2404_v16 = vrot.slane %v2403_v45, 4  ;;  %v2456_v58 = vmax.f32 %v2454_v7, %v2455_v2  ;;  %vm3019_vm3 = vweird.f32 %v4037_v53  ;;  %v2900_v25 = vrot.slane %v2899_v14, 4 }
 0x745   : > { %v3015_v12 = vsub.f32 1.0, %v3014_v32  ;;  %v2907_v48 = vrot.slane %v2906_v55, 4  ;;  %v2656_v8 = vrot.slane %v2655_v43, 2  ;;  %v2493_v23 = vsub.f32 %v5436_v6, %v2402_v21  ;;  %vm3020_vm4 = vmor %vm3018_vm1, %vm3019_vm3 }
 0x746   : > { %v2405_v42 = vmax.f32 %v2403_v45, %v2404_v16  ;;  %v2494_v45 = vsub.f32 %v5448_v9, %v2402_v21  ;;  %v2457_v16 = vrot.slane %v2456_v58, 1  ;;  %v2901_v11 = vadd.f32 %v2900_v25, %v2899_v14 }
 0x747   : > { %v3016_v33 = vmul.f32 %v4037_v53, %v3015_v12  ;;  %v2908_v27 = vadd.f32 %v2907_v48, %v2906_v55  ;;  %v2657_v29 = vadd.f32 %v2656_v8, %v2655_v43  ;;  %v2531_v52 = vmul.f32 1.442695, %v2493_v23  ;;  %v6238_v43 = vld [vmem:[#allocation14_spill] sm:$0xff]  ;;  %v6239_v48 = vld [vmem:[#allocation15_spill] sm:$0xff]  ;;  %v6240_v23 = vld [vmem:[#allocation16_spill] sm:$0xff] }
 0x748   : > { %v2406_v44 = vrot.slane %v2405_v42, 2  ;;  %v2533_v28 = vmul.f32 1.442695, %v2494_v45  ;;  %v2458_v26 = vmax.f32 %v2456_v58, %v2457_v16  ;;  %v2800_v7 = vadd.f32 %v2799_v60, %v2798_v39 }
 0x749   : > { %v3017_v19 = vadd.f32 %v4037_v53, %v3016_v33  ;;  %v3025_v59 = vor.u32 1.1754944e-38, %v3024_v1  ;;  %v2902_v24 = vrot.slane %v2901_v11, 2  ;;  %v2658_v6 = vrot.slane %v2657_v29, 1 }
 0x74a   : > { %v2407_v50 = vmax.f32 %v2405_v42, %v2406_v44  ;;  %4038 = vpow2.f32 %v2531_v52  ;;  %v2509_v9 = vsub.f32 %v5467_v31, %v2458_v26  ;;  %v2510_v34 = vsub.f32 %v5496_v40, %v2458_v26 }
 0x74b   : > { %v3021_v37 = vsel %vm3020_vm4, %v4037_v53, %v3017_v19  ;;  %v2909_v36 = vrot.slane %v2908_v27, 2  ;;  %4040 = vpow2.f32 %v2533_v28  ;;  %v5566_v60 = vadd.f32 %v2658_v6, %v2657_v29 }
 0x74c   : > { %v2408_v51 = vrot.slane %v2407_v50, 1  ;;  %v3026_v39 = vsel %vm5553_vm2, %v3025_v59, %v3021_v37  ;;  %v2563_v1 = vmul.f32 1.442695, %v2509_v9  ;;  %v2565_v2 = vmul.f32 1.442695, %v2510_v34 }
 0x74d   : > { %v5568_v42 = vmul.f32 %v3026_v39, %v2793_v41  ;;  %v5570_v38 = vmul.f32 %v3026_v39, %v2800_v7  ;;  %v5575_v31 = vadd.f32 %v2844_v62, %v5484_v57  ;;  %v2969_v40 = vadd.f32 %v5514_v13, %v5506_v49  ;;  %v5591_v49 = vpop.xlane.xlu2 %2359  ;;  %v6237_v13 = vld [vmem:[#allocation13_spill] sm:$0xff] }
 0x74e   : > { %v5581_v53 = vadd.f32 %v5518_v18, %v5510_v56  ;;  %4042 = vrcp.f32 %v5566_v60  ;;  %v2691_v32 = vrot.slane %v5534_v3, 2  ;;  %v2903_v41 = vadd.f32 %v2902_v24, %v2901_v11 }
 0x74f   : > { %4044 = vpow2.f32 %v2563_v1  ;;  %v2409_v63 = vmax.f32 %v2407_v50, %v2408_v51  ;;  %v2630_v55 = vrot.slane %v5502_v46, 1  ;;  %v5589_v57 = vadd.f32 %v2851_v17, %v5486_v35  ;;  %v6241_v51 = vld [vmem:[#allocation45_spill] sm:$0xff]  ;;  %v6242_v1 = vld [vmem:[#allocation47_spill] sm:$0xff] }
 0x750   : > { %v4039_v14 = vpop.eup %4038  ;;  %v2910_v62 = vadd.f32 %v2909_v36, %v2908_v27  ;;  %4046 = vpow2.f32 %v2565_v2  ;;  %v2970_v12 = vrot.slane %v2969_v40, 4  ;;  %v5600_v17 = vadd.f32 %v2691_v32, %v5534_v3 }
 0x751   : > { %v4041_v56 = vpop.eup %4040  ;;  %v2707_v18 = vmul.f32 %v4039_v14, %v6237_v13  ;;  %v2708_v21 = vmul.f32 %v4039_v14, %v6238_v43  ;;  %v2495_v58 = vsub.f32 %v5527_v10, %v2409_v63  ;;  %v2496_v44 = vsub.f32 %v5355_v54, %v2409_v63 }
 0x752   : > { %v2604_v25 = vadd.f32 %v4041_v56, %v4039_v14  ;;  %v2709_v8 = vmul.f32 %v4041_v56, %v6239_v48  ;;  %v2710_v35 = vmul.f32 %v4041_v56, %v6240_v23  ;;  %v2977_v45 = vrot.slane %v5581_v53, 4 }
 0x753   : > { %v2904_v16 = vrot.slane %v2903_v41, 1  ;;  %v2459_v33 = vmax.f32 %v5591_v49, %v5358_v30  ;;  %v2535_v54 = vmul.f32 1.442695, %v2495_v58  ;;  %v2911_v52 = vrot.slane %v2910_v62, 1 }
 0x754   : > { %v4043_v11 = vpop.eup %4042  ;;  %v2605_v27 = vrot.slane %v2604_v25, 4  ;;  %v2801_v10 = vadd.f32 %v2709_v8, %v2707_v18  ;;  %v2808_v50 = vadd.f32 %v2710_v35, %v2708_v21  ;;  %v3142_v26 = vand.u32 2147483647, %v5566_v60 }
 0x755   : > { %v4045_v29 = vpop.eup %4044  ;;  %v3134_v28 = vmul.f32 %v4043_v11, %v5566_v60  ;;  %v2537_v7 = vmul.f32 1.442695, %v2496_v44  ;;  %v3144_v19 = vand.u32 2147483648, %v5566_v60  ;;  %vm3139_vm5 = vweird.f32 %v4043_v11  ;;  %v5611_v21 = vpop.xlane.xlu2 %2331 }
 0x756   : > { %v4047_v3 = vpop.eup %4046  ;;  %v2606_v59 = vadd.f32 %v2605_v27, %v2604_v25  ;;  %v2802_v24 = vrot.slane %v2801_v10, 4  ;;  %v2809_v6 = vrot.slane %v2808_v50, 4  ;;  %v2460_v37 = vrot.slane %v2459_v33, 4 }
 0x757   : > { %v3135_v9 = vsub.f32 1.0, %v3134_v28  ;;  %v2660_v34 = vadd.f32 %v4047_v3, %v4045_v29  ;;  %v2739_v39 = vmul.f32 %v4045_v29, %v6241_v51  ;;  %v2741_v2 = vmul.f32 %v4047_v3, %v6242_v1 }
 0x758   : > { %v2607_v36 = vrot.slane %v2606_v59, 2  ;;  %4048 = vpow2.f32 %v2535_v54  ;;  %v2803_v63 = vadd.f32 %v2802_v24, %v2801_v10  ;;  %v2693_v56 = vrot.slane %v5600_v17, 1 }
 0x759   : > { %v3136_v32 = vmul.f32 %v4043_v11, %v3135_v9  ;;  %v2661_v14 = vrot.slane %v2660_v34, 4  ;;  %4050 = vpow2.f32 %v2537_v7  ;;  %v2971_v13 = vadd.f32 %v2970_v12, %v2969_v40 }
 0x75a   : > { %v2608_v18 = vadd.f32 %v2607_v36, %v2606_v59  ;;  %v2810_v43 = vadd.f32 %v2809_v6, %v2808_v50  ;;  %v2905_v58 = vadd.f32 %v2904_v16, %v2903_v41  ;;  %vm3138_vm6 = vweird.f32 %v5566_v60 }
 0x75b   : > { %v3137_v44 = vadd.f32 %v4043_v11, %v3136_v32  ;;  %v2662_v25 = vadd.f32 %v2661_v14, %v2660_v34  ;;  %v2912_v48 = vadd.f32 %v2911_v52, %v2910_v62  ;;  %vm3140_vm7 = vmor %vm3138_vm6, %vm3139_vm5  ;;  %v3145_v8 = vor.u32 1.1754944e-38, %v3144_v19  ;;  %v6243_v52 = vld [vmem:[#allocation46_spill] sm:$0xff]  ;;  %v6244_v19 = vld [vmem:[#allocation48_spill] sm:$0xff] }
 0x75c   : > { %v2609_v23 = vrot.slane %v2608_v18, 1  ;;  %v2913_v35 = vadd.f32 %v2741_v2, %v2739_v39  ;;  %vm3143_vm8 = vcmp.eq.f32.partialorder %v3142_v26, 8.507059e+37  ;;  %v2804_v10 = vrot.slane %v2803_v63, 2 }
 0x75d   : > { %v3141_v27 = vsel %vm3140_vm7, %v4043_v11, %v3137_v44  ;;  %v2461_v54 = vmax.f32 %v2459_v33, %v2460_v37  ;;  %v2811_v41 = vrot.slane %v2810_v43, 2  ;;  %v2663_v16 = vrot.slane %v2662_v25, 2  ;;  %v5649_v39 = vpop.xlane.xlu2 %2365 }
 0x75e   : > { %v5615_v40 = vpop.eup %4048  ;;  %v3146_v12 = vsel %vm3143_vm8, %v3145_v8, %v3141_v27  ;;  %v5617_v50 = vadd.f32 %v2609_v23, %v2608_v18  ;;  %v2740_v7 = vmul.f32 %v4045_v29, %v6243_v52  ;;  %v2742_v11 = vmul.f32 %v4047_v3, %v6244_v19 }
 0x75f   : > { %v5619_v28 = vpop.eup %4050  ;;  %v5621_v60 = vmul.f32 %v3146_v12, %v2905_v58  ;;  %v5623_v62 = vmul.f32 %v3146_v12, %v2912_v48  ;;  %v5630_v33 = vadd.f32 %v2630_v55, %v5502_v46  ;;  %v5633_v26 = vadd.f32 %v2977_v45, %v5581_v53 }
 0x760   : > { %4052 = vrcp.f32 %v5617_v50  ;;  %v2914_v59 = vrot.slane %v2913_v35, 4  ;;  %v5637_v24 = vadd.f32 %v2693_v56, %v5600_v17  ;;  %v2972_v6 = vrot.slane %v2971_v13, 2 }
 0x761   : > { %v2462_v9 = vrot.slane %v2461_v54, 2  ;;  %v2410_v29 = vmax.f32 %v5611_v21, %v5364_v61  ;;  %v2805_v3 = vadd.f32 %v2804_v10, %v2803_v63  ;;  %v2812_v34 = vadd.f32 %v2811_v41, %v2810_v43 }
 0x762   : > { %v2664_v37 = vadd.f32 %v2663_v16, %v2662_v25  ;;  %v2611_v46 = vadd.f32 %v5619_v28, %v5615_v40  ;;  %v2846_v53 = vrot.slane %v5575_v31, 2  ;;  %v2853_v55 = vrot.slane %v5589_v57, 2  ;;  %v6245_v25 = vld [vmem:[#allocation17_spill] sm:$0xff] }
 0x763   : > { %v5645_v45 = vadd.f32 %v2742_v11, %v2740_v7  ;;  %4054 = vrcp.f32 %v5630_v33  ;;  %v2979_v17 = vrot.slane %v5633_v26, 2  ;;  %v2915_v36 = vadd.f32 %v2914_v59, %v2913_v35 }
 0x764   : > { %v2612_v51 = vrot.slane %v2611_v46, 4  ;;  %v5651_v1 = vadd.f32 %v2972_v6, %v2971_v13  ;;  %4056 = vrcp.f32 %v5637_v24  ;;  %v2463_v2 = vmax.f32 %v2461_v54, %v2462_v9  ;;  %v6246_v54 = vld [vmem:[#allocation19_spill] sm:$0xff] }
 0x765   : > { %v2411_v32 = vrot.slane %v2410_v29, 4  ;;  %v2806_v14 = vrot.slane %v2805_v3, 1  ;;  %v2813_v56 = vrot.slane %v2812_v34, 1  ;;  %v2665_v18 = vrot.slane %v2664_v37, 1 }
 0x766   : > { %v4053_v63 = vpop.eup %4052  ;;  %v2613_v43 = vadd.f32 %v2612_v51, %v2611_v46  ;;  %v2921_v44 = vrot.slane %v5645_v45, 4  ;;  %v2711_v48 = vmul.f32 %v5615_v40, %v6245_v25  ;;  %v2466_v13 = vmax.f32 %v5362_v15, %v5649_v39 }
 0x767   : > { %v3029_v58 = vmul.f32 %v4053_v63, %v5617_v50  ;;  %v3037_v8 = vand.u32 2147483647, %v5617_v50  ;;  %v3039_v23 = vand.u32 2147483648, %v5617_v50  ;;  %v2916_v35 = vrot.slane %v2915_v36, 2 }
 0x768   : > { %v2614_v27 = vrot.slane %v2613_v43, 2  ;;  %v2713_v12 = vmul.f32 %v5619_v28, %v6246_v54  ;;  %v2464_v41 = vrot.slane %v2463_v2, 1  ;;  %v2412_v16 = vmax.f32 %v2410_v29, %v2411_v32  ;;  %v6249_v32 = vld [vmem:[#allocation18_spill] sm:$0xff] }
 0x769   : > { %v3030_v10 = vsub.f32 1.0, %v3029_v58  ;;  %v5664_v52 = vpop.eup %4054  ;;  %v2807_v7 = vadd.f32 %v2806_v14, %v2805_v3  ;;  %v2814_v19 = vadd.f32 %v2813_v56, %v2812_v34  ;;  %v5666_v11 = vadd.f32 %v2665_v18, %v2664_v37  ;;  %v6250_v18 = vld [vmem:[#allocation20_spill] sm:$0xff] }
 0x76a   : > { %v2615_v59 = vadd.f32 %v2614_v27, %v2613_v43  ;;  %v5668_v6 = vpop.eup %4056  ;;  %vm3034_vm9 = vweird.f32 %v4053_v63  ;;  %v2465_v46 = vmax.f32 %v2463_v2, %v2464_v41  ;;  %v2413_v51 = vrot.slane %v2412_v16, 2 }
 0x76b   : > { %v3031_v9 = vmul.f32 %v4053_v63, %v3030_v10  ;;  %vm3033_vm10 = vweird.f32 %v5617_v50  ;;  %vm5671_vm11 = vcmp.eq.f32.partialorder %v3037_v8, 8.507059e+37  ;;  %v3040_v29 = vor.u32 1.1754944e-38, %v3039_v23 }
 0x76c   : > { %v2712_v3 = vmul.f32 %v5615_v40, %v6249_v32  ;;  %v2815_v37 = vadd.f32 %v2713_v12, %v2711_v48  ;;  %v2511_v14 = vsub.f32 %v5591_v49, %v2465_v46  ;;  %v2512_v56 = vsub.f32 %v5358_v30, %v2465_v46  ;;  %vm3035_vm12 = vmor %vm3033_vm10, %vm3034_vm9  ;;  %v5695_v12 = vpop.xlane.xlu2 %2367 }
 0x76d   : > { %v3032_v34 = vadd.f32 %v4053_v63, %v3031_v9  ;;  %4058 = vrcp.f32 %v5666_v11  ;;  %v2616_v2 = vrot.slane %v2615_v59, 1  ;;  %v2714_v50 = vmul.f32 %v5619_v28, %v6250_v18 }
 0x76e   : > { %v2467_v43 = vrot.slane %v2466_v13, 4  ;;  %v2567_v8 = vmul.f32 1.442695, %v2511_v14  ;;  %v2569_v23 = vmul.f32 1.442695, %v2512_v56  ;;  %v2414_v27 = vmax.f32 %v2412_v16, %v2413_v51 }
 0x76f   : > { %v3036_v25 = vsel %vm3035_vm12, %v4053_v63, %v3032_v34  ;;  %v5683_v40 = vadd.f32 %v2846_v53, %v5575_v31  ;;  %v3074_v49 = vmul.f32 %v5664_v52, %v5630_v33  ;;  %v2980_v30 = vadd.f32 %v2979_v17, %v5633_v26 }
 0x770   : > { %v3041_v48 = vsel %vm5671_vm11, %v3040_v29, %v3036_v25  ;;  %v2974_v10 = vrot.slane %v5651_v1, 1  ;;  %v2816_v63 = vrot.slane %v2815_v37, 4  ;;  %v2917_v41 = vadd.f32 %v2916_v35, %v2915_v36 }
 0x771   : > { %6251 = vst [vmem:[#allocation5_spill] sm:$0xff] %v5683_v40  ;;  %v5691_v54 = vmul.f32 %v3041_v48, %v2807_v7  ;;  %v5693_v28 = vmul.f32 %v3041_v48, %v2814_v19  ;;  %v5697_v31 = vadd.f32 %v2616_v2, %v2615_v59  ;;  %v2822_v53 = vadd.f32 %v2714_v50, %v2712_v3 }
 0x772   : > { %4060 = vpow2.f32 %v2567_v8  ;;  %v2922_v16 = vadd.f32 %v2921_v44, %v5645_v45  ;;  %v2415_v26 = vrot.slane %v2414_v27, 1  ;;  %v2468_v17 = vmax.f32 %v2466_v13, %v2467_v43 }
 0x773   : > { %4062 = vpow2.f32 %v2569_v23  ;;  %v5700_v9 = vpop.eup %4058  ;;  %v5705_v7 = vadd.f32 %v2853_v55, %v5589_v57  ;;  %v3075_v19 = vsub.f32 1.0, %v3074_v49  ;;  %v2981_v46 = vrot.slane %v2980_v30, 1 }
 0x774   : > { %v2473_v36 = vmax.f32 %v5695_v12, %v5390_v5  ;;  %v5711_v35 = vmul.f32 %v5668_v6, %v5637_v24  ;;  %v2817_v45 = vadd.f32 %v2816_v63, %v2815_v37  ;;  %v2416_v44 = vmax.f32 %v2414_v27, %v2415_v26 }
 0x775   : > { %6252 = vst [vmem:[#allocation6_spill] sm:$0xff] %v5705_v7  ;;  %v2469_v59 = vrot.slane %v2468_v17, 2  ;;  %v2918_v13 = vrot.slane %v2917_v41, 1  ;;  %v2823_v51 = vrot.slane %v2822_v53, 4  ;;  %4064 = vrcp.f32 %v5697_v31 }
 0x776   : > { %v2474_v58 = vrot.slane %v2473_v36, 4  ;;  %v5715_v57 = vadd.f32 %v2974_v10, %v5651_v1  ;;  %v2923_v55 = vrot.slane %v2922_v16, 2  ;;  %v2497_v29 = vsub.f32 %v5611_v21, %v2416_v44 }
 0x777   : > { %v2498_v32 = vsub.f32 %v5364_v61, %v2416_v44  ;;  %v5719_v34 = vadd.f32 %v2981_v46, %v2980_v30  ;;  %v3149_v37 = vmul.f32 %v5700_v9, %v5666_v11  ;;  %v2470_v14 = vmax.f32 %v2468_v17, %v2469_v59  ;;  %v6253_v17 = vld [vmem:[#allocation49_spill] sm:$0xff]  ;;  %v6254_v46 = vld [vmem:[#allocation51_spill] sm:$0xff]  ;;  %v6255_v44 = vld [vmem:[#allocation50_spill] sm:$0xff] }
 0x778   : > { %v4061_v3 = vpop.eup %4060  ;;  %v2475_v56 = vmax.f32 %v2473_v36, %v2474_v58  ;;  %v2818_v50 = vrot.slane %v2817_v45, 2  ;;  %v2539_v43 = vmul.f32 1.442695, %v2497_v29  ;;  %v5725_v1 = vmul.f32 %v5664_v52, %v3075_v19 }
 0x779   : > { %v4063_v2 = vpop.eup %4062  ;;  %v5727_v25 = vadd.f32 %v2918_v13, %v2917_v41  ;;  %v2824_v21 = vadd.f32 %v2823_v51, %v2822_v53  ;;  %v2541_v8 = vmul.f32 1.442695, %v2498_v32  ;;  %v2924_v23 = vadd.f32 %v2923_v55, %v2922_v16  ;;  %v6256_v13 = vld [vmem:[#allocation52_spill] sm:$0xff]  ;;  %v5741_v32 = vpop.xlane.xlu2 %2341 }
 0x77a   : > { %v2667_v61 = vadd.f32 %v4063_v2, %v4061_v3  ;;  %4066 = vpow2.f32 %v2539_v43  ;;  %v2471_v27 = vrot.slane %v2470_v14, 1  ;;  %v2476_v49 = vrot.slane %v2475_v56, 2 }
 0x77b   : > { %v5729_v30 = vpop.eup %4064  ;;  %v3150_v48 = vsub.f32 1.0, %v3149_v37  ;;  %v3159_v10 = vand.u32 2147483648, %v5666_v11  ;;  %4068 = vpow2.f32 %v2541_v8  ;;  %v2819_v26 = vadd.f32 %v2818_v50, %v2817_v45 }
 0x77c   : > { %v2668_v63 = vrot.slane %v2667_v61, 4  ;;  %v2743_v19 = vmul.f32 %v4061_v3, %v6253_v17  ;;  %v2745_v41 = vmul.f32 %v4063_v2, %v6254_v46  ;;  %v2472_v36 = vmax.f32 %v2470_v14, %v2471_v27 }
 0x77d   : > { %vm3153_vm13 = vweird.f32 %v5666_v11  ;;  %v2825_v53 = vrot.slane %v2824_v21, 2  ;;  %v2744_v59 = vmul.f32 %v4061_v3, %v6255_v44  ;;  %v2746_v51 = vmul.f32 %v4063_v2, %v6256_v13 }
 0x77e   : > { %v2669_v16 = vadd.f32 %v2668_v63, %v2667_v61  ;;  %v3044_v58 = vmul.f32 %v5729_v30, %v5697_v31  ;;  %v2513_v55 = vsub.f32 %v5362_v15, %v2472_v36  ;;  %v2514_v45 = vsub.f32 %v5649_v39, %v2472_v36 }
 0x77f   : > { %v2477_v29 = vmax.f32 %v2475_v56, %v2476_v49  ;;  %v2925_v37 = vrot.slane %v2924_v23, 1  ;;  %v3151_v14 = vmul.f32 %v5700_v9, %v3150_v48  ;;  %v3157_v50 = vand.u32 2147483647, %v5666_v11 }
 0x780   : > { %v2670_v43 = vrot.slane %v2669_v16, 2  ;;  %v4067_v61 = vpop.eup %4066  ;;  %v3160_v3 = vor.u32 1.1754944e-38, %v3159_v10  ;;  %v2927_v8 = vadd.f32 %v2745_v41, %v2743_v19  ;;  %v2571_v2 = vmul.f32 1.442695, %v2513_v55 }
 0x781   : > { %v2573_v27 = vmul.f32 1.442695, %v2514_v45  ;;  %v4069_v63 = vpop.eup %4068  ;;  %v2820_v17 = vrot.slane %v2819_v26, 1  ;;  %v2934_v15 = vadd.f32 %v2746_v51, %v2744_v59  ;;  %v2424_v39 = vmax.f32 %v5392_v47, %v5741_v32 }
 0x782   : > { %v2671_v46 = vadd.f32 %v2670_v43, %v2669_v16  ;;  %v2826_v56 = vadd.f32 %v2825_v53, %v2824_v21  ;;  %v3045_v49 = vsub.f32 1.0, %v3044_v58  ;;  %v2618_v36 = vadd.f32 %v4069_v63, %v4067_v61  ;;  %v6261_v43 = vld [vmem:[#allocation21_spill] sm:$0xff] }
 0x783   : > { %v2478_v44 = vrot.slane %v2477_v29, 1  ;;  %v3152_v48 = vadd.f32 %v5700_v9, %v3151_v14  ;;  %vm3154_vm14 = vweird.f32 %v5700_v9  ;;  %vm5749_vm15 = vcmp.eq.f32.partialorder %v3157_v50, 8.507059e+37 }
 0x784   : > { %v2672_v19 = vrot.slane %v2671_v46, 1  ;;  %4070 = vpow2.f32 %v2571_v2  ;;  %v5753_v41 = vadd.f32 %v2925_v37, %v2924_v23  ;;  %v2928_v16 = vrot.slane %v2927_v8, 4  ;;  %vm5761_vm0 = vmor %vm3153_vm13, %vm3154_vm14 }
 0x785   : > { %v2619_v59 = vrot.slane %v2618_v36, 4  ;;  %4072 = vpow2.f32 %v2573_v27  ;;  %v5755_v13 = vadd.f32 %v2820_v17, %v2819_v26  ;;  %v2935_v53 = vrot.slane %v2934_v15, 4  ;;  %v6262_v27 = vld [vmem:[#allocation23_spill] sm:$0xff] }
 0x786   : > { %v5757_v21 = vadd.f32 %v2672_v19, %v2671_v46  ;;  %v2425_v51 = vrot.slane %v2424_v39, 4  ;;  %v2827_v55 = vrot.slane %v2826_v56, 1  ;;  %v3046_v45 = vmul.f32 %v5729_v30, %v3045_v49 }
 0x787   : > { %v2620_v23 = vadd.f32 %v2619_v59, %v2618_v36  ;;  %v2479_v37 = vmax.f32 %v2477_v29, %v2478_v44  ;;  %v3156_v26 = vsel %vm5761_vm0, %v5700_v9, %v3152_v48  ;;  %vm3048_vm1 = vweird.f32 %v5697_v31  ;;  %v6263_v36 = vld [vmem:[#allocation22_spill] sm:$0xff]  ;;  %v6264_v44 = vld [vmem:[#allocation24_spill] sm:$0xff] }
 0x788   : > { %v3054_v14 = vand.u32 2147483648, %v5697_v31  ;;  %4074 = vrcp.f32 %v5757_v21  ;;  %v2929_v11 = vadd.f32 %v2928_v16, %v2927_v8  ;;  %v2715_v2 = vmul.f32 %v4067_v61, %v6261_v43 }
 0x789   : > { %v2621_v50 = vrot.slane %v2620_v23, 2  ;;  %v2717_v17 = vmul.f32 %v4069_v63, %v6262_v27  ;;  %v2936_v49 = vadd.f32 %v2935_v53, %v2934_v15  ;;  %v2716_v29 = vmul.f32 %v4067_v61, %v6263_v36 }
 0x78a   : > { %v4071_v46 = vpop.eup %4070  ;;  %v2718_v19 = vmul.f32 %v4069_v63, %v6264_v44  ;;  %v2426_v59 = vmax.f32 %v2424_v39, %v2425_v51  ;;  %v3047_v48 = vadd.f32 %v5729_v30, %v3046_v45  ;;  %vm3049_vm2 = vweird.f32 %v5729_v30 }
 0x78b   : > { %v4073_v9 = vpop.eup %4072  ;;  %v3052_v58 = vand.u32 2147483647, %v5697_v31  ;;  %v2515_v8 = vsub.f32 %v5695_v12, %v2479_v37  ;;  %v2828_v16 = vadd.f32 %v2827_v55, %v2826_v56  ;;  %v3055_v43 = vor.u32 1.1754944e-38, %v3054_v14  ;;  %vm5787_vm3 = vmor %vm3048_vm1, %vm3049_vm2 }
 0x78c   : > { %v2674_v18 = vadd.f32 %v4073_v9, %v4071_v46  ;;  %v2516_v27 = vsub.f32 %v5390_v5, %v2479_v37  ;;  %v3161_v61 = vsel %vm5749_vm15, %v3160_v3, %v3156_v26  ;;  %v2930_v15 = vrot.slane %v2929_v11, 2  ;;  %v6267_v3 = vld [vmem:[#allocation53_spill] sm:$0xff] }
 0x78d   : > { %v2622_v63 = vadd.f32 %v2621_v50, %v2620_v23  ;;  %v2829_v39 = vadd.f32 %v2717_v17, %v2715_v2  ;;  %v2937_v12 = vrot.slane %v2936_v49, 2  ;;  %v2836_v56 = vadd.f32 %v2718_v19, %v2716_v29  ;;  %v6268_v23 = vld [vmem:[#allocation55_spill] sm:$0xff]  ;;  %v6269_v50 = vld [vmem:[#allocation54_spill] sm:$0xff]  ;;  %v6270_v2 = vld [vmem:[#allocation56_spill] sm:$0xff] }
 0x78e   : > { %v5783_v53 = vpop.eup %4074  ;;  %v2675_v55 = vrot.slane %v2674_v18, 4  ;;  %v2427_v45 = vrot.slane %v2426_v59, 2  ;;  %v3051_v5 = vsel %vm5787_vm3, %v5729_v30, %v3047_v48  ;;  %v2747_v10 = vmul.f32 %v4071_v46, %v6267_v3 }
 0x78f   : > { %v2749_v37 = vmul.f32 %v4073_v9, %v6268_v23  ;;  %v2575_v26 = vmul.f32 1.442695, %v2515_v8  ;;  %v2748_v31 = vmul.f32 %v4071_v46, %v6269_v50  ;;  %v2750_v17 = vmul.f32 %v4073_v9, %v6270_v2 }
 0x790   : > { %v2676_v14 = vadd.f32 %v2675_v55, %v2674_v18  ;;  %v2577_v36 = vmul.f32 1.442695, %v2516_v27  ;;  %v2931_v44 = vadd.f32 %v2930_v15, %v2929_v11  ;;  %v3164_v29 = vmul.f32 %v5783_v53, %v5757_v21 }
 0x791   : > { %v2623_v19 = vrot.slane %v2622_v63, 1  ;;  %v2830_v7 = vrot.slane %v2829_v39, 4  ;;  %v2938_v40 = vadd.f32 %v2937_v12, %v2936_v49  ;;  %v2837_v51 = vrot.slane %v2836_v56, 4 }
 0x792   : > { %v2677_v30 = vrot.slane %v2676_v14, 2  ;;  %v2428_v48 = vmax.f32 %v2426_v59, %v2427_v45  ;;  %v5801_v3 = vmul.f32 %v3161_v61, %v5727_v25  ;;  %vm3053_vm4 = vcmp.eq.f32.partialorder %v3052_v58, 8.507059e+37 }
 0x793   : > { %v2941_v18 = vadd.f32 %v2749_v37, %v2747_v10  ;;  %4076 = vpow2.f32 %v2575_v26  ;;  %v3056_v46 = vsel %vm3053_vm4, %v3055_v43, %v3051_v5  ;;  %v2948_v9 = vadd.f32 %v2750_v17, %v2748_v31  ;;  %v6273_v17 = vld [vmem:[#allocation57_spill] sm:$0xff] }
 0x794   : > { %v2678_v8 = vadd.f32 %v2677_v30, %v2676_v14  ;;  %4078 = vpow2.f32 %v2577_v36  ;;  %v2932_v11 = vrot.slane %v2931_v44, 1  ;;  %v3165_v27 = vsub.f32 1.0, %v3164_v29 }
 0x795   : > { %v5803_v15 = vadd.f32 %v2623_v19, %v2622_v63  ;;  %v2831_v55 = vadd.f32 %v2830_v7, %v2829_v39  ;;  %v2939_v23 = vrot.slane %v2938_v40, 1  ;;  %v2838_v49 = vadd.f32 %v2837_v51, %v2836_v56 }
 0x796   : > { %v2679_v12 = vrot.slane %v2678_v8, 1  ;;  %v2429_v50 = vrot.slane %v2428_v48, 1  ;;  %v5806_v59 = vmul.f32 %v3161_v61, %v5753_v41  ;;  %v5809_v25 = vmul.f32 %v3056_v46, %v5755_v13 }
 0x797   : > { %v2942_v58 = vrot.slane %v2941_v18, 4  ;;  %v5813_v43 = vadd.f32 %v5664_v52, %v5725_v1  ;;  %v5815_v45 = vmul.f32 %v3056_v46, %v2828_v16  ;;  %v3172_v63 = vand.u32 2147483647, %v5757_v21  ;;  %v6276_v46 = vld [vmem:[#allocation60_spill] sm:$0xff] }
 0x798   : > { %v5818_v7 = vadd.f32 %v2679_v12, %v2678_v8  ;;  %v2949_v39 = vrot.slane %v2948_v9, 4  ;;  %v2933_v5 = vadd.f32 %v2932_v11, %v2931_v44  ;;  %v3166_v41 = vmul.f32 %v5783_v53, %v3165_v27  ;;  %v6274_v44 = vld [vmem:[#allocation58_spill] sm:$0xff] }
 0x799   : > { %v4077_v56 = vpop.eup %4076  ;;  %v2832_v61 = vrot.slane %v2831_v55, 2  ;;  %4080 = vrcp.f32 %v5803_v15  ;;  %v2940_v10 = vadd.f32 %v2939_v23, %v2938_v40  ;;  %v2839_v37 = vrot.slane %v2838_v49, 2 }
 0x79a   : > { %v4079_v13 = vpop.eup %4078  ;;  %4082 = vrcp.f32 %v5818_v7  ;;  %v2430_v1 = vmax.f32 %v2428_v48, %v2429_v50  ;;  %vm3168_vm5 = vweird.f32 %v5757_v21  ;;  %v3174_v16 = vand.u32 2147483648, %v5757_v21  ;;  %v6275_v48 = vld [vmem:[#allocation59_spill] sm:$0xff] }
 0x79b   : > { %v2943_v26 = vadd.f32 %v2942_v58, %v2941_v18  ;;  %v2681_v14 = vadd.f32 %v4079_v13, %v4077_v56  ;;  %vm5825_vm6 = vcmp.eq.f32.partialorder %v3172_v63, 8.507059e+37  ;;  %v2950_v2 = vadd.f32 %v2949_v39, %v2948_v9 }
 0x79c   : > { %v2751_v36 = vmul.f32 %v4077_v56, %v6273_v17  ;;  %v2752_v29 = vmul.f32 %v4077_v56, %v6274_v44  ;;  %v3167_v40 = vadd.f32 %v5783_v53, %v3166_v41  ;;  %vm3169_vm7 = vweird.f32 %v5783_v53 }
 0x79d   : > { %v5833_v19 = vadd.f32 %v2832_v61, %v2831_v55  ;;  %v2682_v51 = vrot.slane %v2681_v14, 4  ;;  %v5835_v30 = vadd.f32 %v2839_v37, %v2838_v49  ;;  %v2753_v18 = vmul.f32 %v4079_v13, %v6275_v48  ;;  %vm5847_vm8 = vmor %vm3168_vm5, %vm3169_vm7 }
 0x79e   : > { %v2754_v8 = vmul.f32 %v4079_v13, %v6276_v46  ;;  %v2501_v11 = vsub.f32 %v5392_v47, %v2430_v1  ;;  %v3175_v27 = vor.u32 1.1754944e-38, %v3174_v16  ;;  %v2944_v23 = vrot.slane %v2943_v26, 2 }
 0x79f   : > { %v5840_v9 = vpop.eup %4080  ;;  %v2683_v12 = vadd.f32 %v2682_v51, %v2681_v14  ;;  %v2502_v50 = vsub.f32 %v5741_v32, %v2430_v1  ;;  %v2951_v49 = vrot.slane %v2950_v2, 2  ;;  %v2955_v63 = vadd.f32 %v2753_v18, %v2751_v36 }
 0x7a0   : > { %v5843_v58 = vpop.eup %4082  ;;  %v2962_v39 = vadd.f32 %v2754_v8, %v2752_v29  ;;  %v2547_v56 = vmul.f32 1.442695, %v2501_v11  ;;  %v3171_v47 = vsel %vm5847_vm8, %v5783_v53, %v3167_v40  ;;  %v2834_v41 = vrot.slane %v5833_v19, 1 }
 0x7a1   : > { %v3179_v32 = vmul.f32 %v5843_v58, %v5818_v7  ;;  %v2684_v61 = vrot.slane %v2683_v12, 2  ;;  %v2841_v21 = vrot.slane %v5835_v30, 1  ;;  %v3059_v13 = vmul.f32 %v5840_v9, %v5803_v15 }
 0x7a2   : > { %v2956_v37 = vrot.slane %v2955_v63, 4  ;;  %v2963_v1 = vrot.slane %v2962_v39, 4  ;;  %4084 = vpow2.f32 %v2547_v56  ;;  %v2549_v17 = vmul.f32 1.442695, %v2502_v50 }
 0x7a3   : > { %v3180_v16 = vsub.f32 1.0, %v3179_v32  ;;  %v2685_v14 = vadd.f32 %v2684_v61, %v2683_v12  ;;  %v3176_v53 = vsel %vm5825_vm6, %v3175_v27, %v3171_v47  ;;  %v2945_v36 = vadd.f32 %v2944_v23, %v2943_v26  ;;  %v6282_v32 = vld [vmem:[#allocation29_spill] sm:$0xff] }
 0x7a4   : > { %v2952_v44 = vadd.f32 %v2951_v49, %v2950_v2  ;;  %v2957_v29 = vadd.f32 %v2956_v37, %v2955_v63  ;;  %v3067_v40 = vand.u32 2147483647, %v5803_v15  ;;  %4086 = vpow2.f32 %v2549_v17 }
 0x7a5   : > { %v3181_v51 = vmul.f32 %v5843_v58, %v3180_v16  ;;  %v2686_v48 = vrot.slane %v2685_v14, 1  ;;  %v3060_v18 = vsub.f32 1.0, %v3059_v13  ;;  %v3187_v46 = vand.u32 2147483647, %v5818_v7 }
 0x7a6   : > { %v2964_v8 = vadd.f32 %v2963_v1, %v2962_v39  ;;  %v6279_v11 = vsub.f32 1.0, %v5711_v35  ;;  %v5868_v50 = vmul.f32 %v3176_v53, %v2933_v5  ;;  %v5870_v31 = vmul.f32 %v3176_v53, %v2940_v10  ;;  %v6285_v53 = vld [vmem:[#allocation31_spill] sm:$0xff] }
 0x7a7   : > { %v3069_v26 = vand.u32 2147483648, %v5803_v15  ;;  %v5873_v2 = vadd.f32 %v2686_v48, %v2685_v14  ;;  %v2946_v27 = vrot.slane %v2945_v36, 1  ;;  %v2953_v23 = vrot.slane %v2952_v44, 1 }
 0x7a8   : > { %v3211_v12 = vmul.f32 %v5668_v6, %v6279_v11  ;;  %vm3183_vm9 = vweird.f32 %v5818_v7  ;;  %v2958_v55 = vrot.slane %v2957_v29, 2  ;;  %v4085_v49 = vpop.eup %4084  ;;  %v3182_v63 = vadd.f32 %v5843_v58, %v3181_v51  ;;  %v6287_v11 = vld [vmem:[#allocation32_spill] sm:$0xff] }
 0x7a9   : > { %vm3184_vm10 = vweird.f32 %v5843_v58  ;;  %v3189_v35 = vand.u32 2147483648, %v5818_v7  ;;  %4088 = vrcp.f32 %v5873_v2  ;;  %v5881_v5 = vmul.f32 %v5840_v9, %v3060_v18  ;;  %v6286_v18 = vld [vmem:[#allocation30_spill] sm:$0xff] }
 0x7aa   : > { %vm5883_vm11 = vcmp.eq.f32.partialorder %v3187_v46, 8.507059e+37  ;;  %v2965_v39 = vrot.slane %v2964_v8, 2  ;;  %v3212_v56 = vadd.f32 %v5668_v6, %v3211_v12  ;;  %v4087_v47 = vpop.eup %4086  ;;  %v2723_v61 = vmul.f32 %v4085_v49, %v6282_v32  ;;  %vm5894_vm13 = vmor %vm3183_vm9, %vm3184_vm10 }
 0x7ab   : > { %vm3214_vm12 = vweird.f32 %v5668_v6  ;;  %v3217_v13 = vand.u32 2147483647, %v5637_v24  ;;  %v3219_v37 = vand.u32 2147483648, %v5637_v24  ;;  %v2947_v1 = vadd.f32 %v2946_v27, %v2945_v36 }
 0x7ac   : > { %v2959_v14 = vadd.f32 %v2958_v55, %v2957_v29  ;;  %v2632_v17 = vadd.f32 %v4087_v47, %v4085_v49  ;;  %v2725_v51 = vmul.f32 %v4087_v47, %v6285_v53  ;;  %v3186_v48 = vsel %vm5894_vm13, %v5843_v58, %v3182_v63 }
 0x7ad   : > { %v2724_v46 = vmul.f32 %v4085_v49, %v6286_v18  ;;  %v2726_v12 = vmul.f32 %v4087_v47, %v6287_v11  ;;  %vm3213_vm14 = vweird.f32 %v5637_v24  ;;  %v2954_v36 = vadd.f32 %v2953_v23, %v2952_v44 }
 0x7ae   : > { %v3190_v7 = vor.u32 1.1754944e-38, %v3189_v35  ;;  %v2966_v27 = vadd.f32 %v2965_v39, %v2964_v8  ;;  %v2633_v32 = vrot.slane %v2632_v17, 4  ;;  %vm5907_vm15 = vmor %vm3213_vm14, %vm3214_vm12  ;;  %v2857_v53 = vadd.f32 %v2725_v51, %v2723_v61 }
 0x7af   : > { %v4089_v55 = vpop.eup %4088  ;;  %v3216_v58 = vsel %vm5907_vm15, %v5668_v6, %v3212_v56  ;;  %vm5914_vm0 = vcmp.eq.f32.partialorder %v3217_v13, 8.507059e+37  ;;  %v3220_v24 = vor.u32 1.1754944e-38, %v3219_v37  ;;  %v2960_v8 = vrot.slane %v2959_v14, 1 }
 0x7b0   : > { %v3191_v44 = vsel %vm5883_vm11, %v3190_v7, %v3186_v48  ;;  %v3194_v23 = vmul.f32 %v4089_v55, %v5873_v2  ;;  %v2634_v63 = vadd.f32 %v2633_v32, %v2632_v17  ;;  %v2864_v35 = vadd.f32 %v2726_v12, %v2724_v46 }
 0x7b1   : > { %vm3289_vm1 = vcmask 1042434   ;;  %vm3291_vm2 = vcmask 1043459   ;;  %vm3293_vm3 = vcmask 1044484   ;;  %vm3064_vm4 = vweird.f32 %v5840_v9 }
 0x7b2   : > { %v3195_v39 = vsub.f32 1.0, %v3194_v23  ;;  %v2635_v6 = vrot.slane %v2634_v63, 2  ;;  %v3202_v56 = vand.u32 2147483647, %v5873_v2  ;;  %v3290_v47 = vsel %vm3289_vm1, %v5568_v42, %v5429_v0 }
 0x7b3   : > { %v2967_v10 = vrot.slane %v2966_v27, 1  ;;  %v2858_v61 = vrot.slane %v2857_v53, 4  ;;  %v3204_v13 = vand.u32 2147483648, %v5873_v2  ;;  %v3292_v37 = vsel %vm3291_vm2, %v5691_v54, %v3290_v47 }
 0x7b4   : > { %vm3063_vm5 = vweird.f32 %v5803_v15  ;;  %v2636_v16 = vadd.f32 %v2635_v6, %v2634_v63  ;;  %v3196_v17 = vmul.f32 %v4089_v55, %v3195_v39  ;;  %vm3199_vm6 = vweird.f32 %v4089_v55 }
 0x7b5   : > { %v5932_v51 = vsel %vm3293_vm3, %v5809_v25, %v3292_v37  ;;  %v3249_v48 = vmul.f32 %v3191_v44, %v2947_v1  ;;  %v2865_v18 = vrot.slane %v2864_v35, 4  ;;  %vm3198_vm7 = vweird.f32 %v5873_v2  ;;  %vm5978_vm13 = vmor %vm3063_vm5, %vm3064_vm4 }
 0x7b6   : > { %v3302_v0 = vsel %vm3289_vm1, %v5570_v38, %v5432_v22  ;;  %v2637_v42 = vrot.slane %v2636_v16, 1  ;;  %v3197_v46 = vadd.f32 %v4089_v55, %v3196_v17  ;;  %vm5938_vm8 = vcmp.eq.f32.partialorder %v3202_v56, 8.507059e+37  ;;  %vm3200_vm10 = vmor %vm3198_vm7, %vm3199_vm6  ;;  %v6296_v56 = vld [vmem:[#allocation5_spill] sm:$0xff] }
 0x7b7   : > { %v3221_v11 = vsel %vm5914_vm0, %v3220_v24, %v3216_v58  ;;  %vm3079_vm9 = vweird.f32 %v5664_v52  ;;  %v3205_v25 = vor.u32 1.1754944e-38, %v3204_v13  ;;  %v3303_v2 = vsel %vm3291_vm2, %v5693_v28, %v3302_v0  ;;  %v6299_v13 = vld [vmem:[#allocation6_spill] sm:$0xff] }
 0x7b8   : > { %v3309_v22 = vsel %vm3289_vm1, %v5621_v60, %v5543_v20  ;;  %v3316_v38 = vsel %vm3289_vm1, %v5623_v62, %v5547_v4  ;;  %v5954_v1 = vadd.f32 %v2637_v42, %v2636_v16  ;;  %v2859_v12 = vadd.f32 %v2858_v61, %v2857_v53 }
 0x7b9   : > { %v3201_v7 = vsel %vm3200_vm10, %v4089_v55, %v3197_v46  ;;  %v5958_v32 = vsel %vm3293_vm3, %v5815_v45, %v3303_v2  ;;  %v2961_v29 = vadd.f32 %v2960_v8, %v2959_v14  ;;  %v2968_v58 = vadd.f32 %v2967_v10, %v2966_v27 }
 0x7ba   : > { %v2866_v49 = vadd.f32 %v2865_v18, %v2864_v35  ;;  %v3206_v28 = vsel %vm5938_vm8, %v3205_v25, %v3201_v7  ;;  %v3062_v20 = vadd.f32 %v5840_v9, %v5881_v5  ;;  %v3250_v60 = vmul.f32 %v3191_v44, %v2954_v36 }
 0x7bb   : > { %4090 = vrcp.f32 %v5954_v1  ;;  %v3253_v4 = vmul.f32 %v3221_v11, %v5715_v57  ;;  %v3251_v62 = vmul.f32 %v3206_v28, %v2961_v29  ;;  %v3252_v55 = vmul.f32 %v3206_v28, %v2968_v58 }
 0x7bc   : > { %vm3295_vm11 = vcmask 1045509   ;;  %v3310_v45 = vsel %vm3291_vm2, %v5801_v3, %v3309_v22  ;;  %v2860_v14 = vrot.slane %v2859_v12, 2  ;;  %vm3299_vm12 = vcmask 1047559  }
 0x7bd   : > { %v3311_v27 = vsel %vm3293_vm3, %v5868_v50, %v3310_v45  ;;  %v3317_v5 = vsel %vm3291_vm2, %v5806_v59, %v3316_v38  ;;  %v2867_v36 = vrot.slane %v2866_v49, 2  ;;  %vm3297_vm14 = vcmask 1046534  }
 0x7be   : > { %v3312_v3 = vsel %vm3295_vm11, %v3249_v48, %v3311_v27  ;;  %v3318_v53 = vsel %vm3293_vm3, %v5870_v31, %v3317_v5  ;;  %v3066_v50 = vsel %vm5978_vm13, %v5840_v9, %v3062_v20  ;;  %v3254_v59 = vmul.f32 %v3221_v11, %v5719_v34 }
 0x7bf   : > { %v3313_v24 = vsel %vm3297_vm14, %v3251_v62, %v3312_v3  ;;  %v3319_v44 = vsel %vm3295_vm11, %v3250_v60, %v3318_v53  ;;  %v3070_v8 = vor.u32 1.1754944e-38, %v3069_v26  ;;  %v3084_v23 = vand.u32 2147483648, %v5630_v33 }
 0x7c0   : > { %v3314_v63 = vsel %vm3299_vm12, %v3253_v4, %v3313_v24  ;;  %v3320_v35 = vsel %vm3297_vm14, %v3252_v55, %v3319_v44  ;;  %vm3068_vm15 = vcmp.eq.f32.partialorder %v3067_v40, 8.507059e+37  ;;  %v2861_v9 = vadd.f32 %v2860_v14, %v2859_v12 }
 0x7c1   : > { %v4091_v31 = vpop.eup %4090  ;;  %v3321_v34 = vsel %vm3299_vm12, %v3254_v59, %v3320_v35  ;;  %3328 = vst [vmem:[%s5999_s21 + $0x10] sm:$0xff] %v3314_v63  ;;  %v3071_v26 = vsel %vm3068_vm15, %v3070_v8, %v3066_v50  ;;  %v2868_v39 = vadd.f32 %v2867_v36, %v2866_v49  ;;  %vm3078_vm0 = vweird.f32 %v5630_v33 }
 0x7c2   : > { %v3089_v6 = vmul.f32 %v4091_v31, %v5954_v1  ;;  %3329 = vst [vmem:[%s5999_s21 + $0x18] sm:$0xff] %v3321_v34  ;;  %v2848_v47 = vrot.slane %v6296_v56, 1  ;;  %v2835_v15 = vadd.f32 %v2834_v41, %v5833_v19  ;;  %v2842_v40 = vadd.f32 %v2841_v21, %v5835_v30  ;;  %vm6014_vm1 = vmor %vm3078_vm0, %vm3079_vm9 }
 0x7c3   : > { %v3082_v61 = vand.u32 2147483647, %v5630_v33  ;;  %v2855_v37 = vrot.slane %v6299_v13, 1  ;;  %v3081_v19 = vsel %vm6014_vm1, %v5664_v52, %v5813_v43  ;;  %v3085_v41 = vor.u32 1.1754944e-38, %v3084_v23 }
 0x7c4   : > { %v3090_v16 = vsub.f32 1.0, %v3089_v6  ;;  %v3233_v17 = vmul.f32 %v3071_v26, %v2835_v15  ;;  %v3234_v30 = vmul.f32 %v3071_v26, %v2842_v40  ;;  %v2862_v21 = vrot.slane %v2861_v9, 1 }
 0x7c5   : > { %v3099_v48 = vand.u32 2147483648, %v5954_v1  ;;  %v2869_v18 = vrot.slane %v2868_v39, 1  ;;  %vm3094_vm2 = vweird.f32 %v4091_v31  ;;  %v3097_v33 = vand.u32 2147483647, %v5954_v1 }
 0x7c6   : > { %v3091_v0 = vmul.f32 %v4091_v31, %v3090_v16  ;;  %vm3083_vm3 = vcmp.eq.f32.partialorder %v3082_v61, 8.507059e+37  ;;  %v2849_v52 = vadd.f32 %v2848_v47, %v6296_v56  ;;  %vm3093_vm4 = vweird.f32 %v5954_v1 }
 0x7c7   : > { %v3086_v43 = vsel %vm3083_vm3, %v3085_v41, %v3081_v19  ;;  %v2856_v46 = vadd.f32 %v2855_v37, %v6299_v13  ;;  %vm3095_vm5 = vmor %vm3093_vm4, %vm3094_vm2  ;;  %v3100_v54 = vor.u32 1.1754944e-38, %v3099_v48  ;;  %v3296_v11 = vsel %vm3295_vm11, %v3233_v17, %v5932_v51 }
 0x7c8   : > { %v3092_v42 = vadd.f32 %v4091_v31, %v3091_v0  ;;  %v3305_v25 = vsel %vm3295_vm11, %v3234_v30, %v5958_v32  ;;  %v2863_v2 = vadd.f32 %v2862_v21, %v2861_v9  ;;  %v2870_v22 = vadd.f32 %v2869_v18, %v2868_v39 }
 0x7c9   : > { %vm3098_vm6 = vcmp.eq.f32.partialorder %v3097_v33, 8.507059e+37  ;;  %v3235_v12 = vmul.f32 %v3086_v43, %v2849_v52  ;;  %v3236_v7 = vmul.f32 %v3086_v43, %v2856_v46 }
 0x7ca   : > { %v3096_v38 = vsel %vm3095_vm5, %v4091_v31, %v3092_v42 }
 0x7cb   : > { %v3101_v1 = vsel %vm3098_vm6, %v3100_v54, %v3096_v38  ;;  %v3298_v51 = vsel %vm3297_vm14, %v3235_v12, %v3296_v11  ;;  %v3306_v49 = vsel %vm3297_vm14, %v3236_v7, %v3305_v25 }
 0x7cc   : > { %v3237_v29 = vmul.f32 %v3101_v1, %v2863_v2  ;;  %v3238_v58 = vmul.f32 %v3101_v1, %v2870_v22 }
 0x7ce   : > { %v3300_v32 = vsel %vm3299_vm12, %v3237_v29, %v3298_v51  ;;  %v3307_v28 = vsel %vm3299_vm12, %v3238_v58, %v3306_v49 }
 0x7cf   : > { %3326 = vst [vmem:[%s5999_s21] sm:$0xff] %v3300_v32 }
 0x7d0   : > { %3327 = vst [vmem:[%s5999_s21 + $0x8] sm:$0xff] %v3307_v28 }
 0x7d1   : > { %4119 = shalt.err (!%p4116_p4)
}
 0x7d2   : > { %s4156_s20 = smov 256   ;;  %s4157_s21 = smov 16  }
 0x7d3   : > { %3952 = dma.vmem_to_hbm [thread:$0]  (%p4236_p5), %s3345_s28, 512, %s3347_s9, %s3331_s13, %s4156_s20, %s4156_s20, %s4157_s21  }
 0x7d4 PF: > { %p3958_p7 = scmp.ge.s32.totalorder %s4154_s27, 2  ;;  %s3361_s23 = sand.u32 1, %s4142_s24  }
 0x7d5   : > { %s3362_s29 = scalar_lea.sflag [#allocation3], %s3361_s23 }
 0x7d6   : > { %p3955_p8 = pnand %p3958_p7, %p4240_p6 }
 0x7d8   : > { %p3956_p9 = pneg %p3955_p8 }
 0x7da   : > { %4137 = dma.done.wait (%p3956_p9), %s3362_s29, 512  }
 0x7db   : > { %4139 = vsyncadd (%p3956_p9), %s3362_s29, 4294966784  ;;  %p17_p10 = scmp.ge.s32.totalorder %s4223_s30, 4   ;;  %s6300_s24 = smov %s4146_s25 }
 0x7dc   : > { %s6301_s25 = smov %s4150_s26  ;;  %s6302_s26 = smov %s4234_s10 }
 0x7dd   : > { %s6303_s27 = smov %s4223_s30  ;;  %19 = sbr.rel (!%p17_p10) target bundleno = 3 (0x3), region = 101 }
 0x7e2   :  { %3368 = vsyncpa [#allocation3], 1 }
 0x7e3   :  { %3370 = vsyncpa [#allocation3 + $0x1], 1 }

</bundles_post_ra>
